<compile_context>
chip_gen: v7x
topology: tpu7x:2x2x1
jax: 0.10.0
libtpu: 0.0.40
codegen_flags: <defaults>
</compile_context>

<pallas_src>
import jax
import jax.numpy as jnp
from jax.experimental import pallas as pl
from jax.experimental.pallas import tpu as pltpu

BN_EPS = 1e-5


def vae_kernel(
    x_ref, eps_ref,
    w1_ref, b1_ref, g1_ref, be1_ref,   # encoder Linear1 + BatchNorm1d
    w2_ref, b2_ref,                    # encoder head Linear(inter, 2*latent)
    w3_ref, b3_ref, g2_ref, be2_ref,   # decoder Linear1 + BatchNorm1d
    w4_ref, b4_ref,                    # decoder Linear2 (-> input_dim)
    recon_ref, z_ref, kl_ref,
):
    x = x_ref[...]                     # (B, D) bf16
    eps = eps_ref[...]                 # (B, L) f32
    inv_b = 1.0 / x.shape[0]

    # ---------------- encoder ----------------
    h = jnp.dot(x, w1_ref[...], preferred_element_type=jnp.float32) + b1_ref[...]
    # BatchNorm1d (training mode): single-pass batch stats over axis 0.
    s1 = jnp.sum(h, axis=0, keepdims=True)
    s2 = jnp.sum(h * h, axis=0, keepdims=True)
    mean = s1 * inv_b
    var = s2 * inv_b - mean * mean     # biased variance
    h = (h - mean) * jax.lax.rsqrt(var + BN_EPS) * g1_ref[...] + be1_ref[...]
    h = jnp.maximum(h, 0.0)            # ReLU
    h_bf = h.astype(jnp.bfloat16)

    # Fused head: one 256-wide matmul; split at lane 128 is free (latent=128).
    head = jnp.dot(h_bf, w2_ref[...], preferred_element_type=jnp.float32) + b2_ref[...]
    lat = head.shape[1] // 2
    mu = head[:, :lat]
    logvar = head[:, lat:]

    # reparameterise: std = exp(logvar/2); reuse std*std = exp(logvar) in KL.
    std = jnp.exp(0.5 * logvar)
    z = mu + eps * std
    z_ref[...] = z

    # KL divergence: -0.5 * sum(1 + logvar - mu^2 - exp(logvar))  (SMEM scalar)
    kl_ref[0, 0] = -0.5 * jnp.sum(1.0 + logvar - mu * mu - std * std)

    # ---------------- decoder ----------------
    d = jnp.dot(z.astype(jnp.bfloat16), w3_ref[...],
                preferred_element_type=jnp.float32) + b3_ref[...]
    t1 = jnp.sum(d, axis=0, keepdims=True)
    t2 = jnp.sum(d * d, axis=0, keepdims=True)
    mean2 = t1 * inv_b
    var2 = t2 * inv_b - mean2 * mean2
    d = (d - mean2) * jax.lax.rsqrt(var2 + BN_EPS) * g2_ref[...] + be2_ref[...]
    d = jnp.maximum(d, 0.0)
    recon = jnp.dot(d.astype(jnp.bfloat16), w4_ref[...],
                    preferred_element_type=jnp.float32) + b4_ref[...]
    recon_ref[...] = recon


def vae_forward(x, params, eps):
    """x: any shape (batch, ...); returns (recon_x [same shape as x], z, kl)."""
    org_shape = x.shape
    batch = org_shape[0]
    x2d = x.reshape(batch, -1).astype(jnp.bfloat16)   # MXU-native input dtype

    (w1, b1, g1, be1, w2, b2, w3, b3, g2, be2, w4, b4) = params
    input_dim = w1.shape[0]
    inter_dim = w1.shape[1]
    latent_dim = w3.shape[0]
    assert x2d.shape[1] == input_dim
    assert w2.dtype == jnp.bfloat16    # weights pre-stored in bf16 (no per-call cast)

    flops = 2 * batch * (input_dim * inter_dim          # enc Linear1
                         + inter_dim * 2 * latent_dim   # fused mu/logvar head
                         + latent_dim * inter_dim       # dec Linear1
                         + inter_dim * input_dim)       # dec Linear2
    bytes_accessed = (
        x2d.size * 2 + eps.size * 4
        + (w1.size + w2.size + w3.size + w4.size) * 2          # bf16 weights
        + (b1.size + g1.size + be1.size + b2.size
           + b3.size + g2.size + be2.size + b4.size) * 4       # f32 small params
        + batch * input_dim * 4 + batch * latent_dim * 4 + 4   # outputs
    )

    vmem = pl.BlockSpec(memory_space=pltpu.MemorySpace.VMEM)
    n_in = 14
    recon2d, z, kl = pl.pallas_call(
        vae_kernel,
        out_shape=(
            jax.ShapeDtypeStruct((batch, input_dim), jnp.float32),
            jax.ShapeDtypeStruct((batch, latent_dim), jnp.float32),
            jax.ShapeDtypeStruct((1, 1), jnp.float32),
        ),
        in_specs=[vmem] * n_in,
        out_specs=(
            vmem,
            vmem,
            pl.BlockSpec(memory_space=pltpu.MemorySpace.SMEM),
        ),
        compiler_params=pltpu.CompilerParams(vmem_limit_bytes=16 << 20),
        cost_estimate=pl.CostEstimate(
            flops=flops,
            transcendentals=batch * latent_dim + 2 * inter_dim,
            bytes_accessed=bytes_accessed,
        ),
    )(x2d, eps, w1, b1, g1, be1, w2, b2, w3, b3, g2, be2, w4, b4)

    return recon2d.reshape(org_shape), z, kl[0, 0]


def init_params(key, input_dim, inter_dim, latent_dim):
    """Deterministic synthetic parameters (not a checkpoint load).
    Linear weights stored as (in, out) and kept in bf16 (MXU-native), so no
    per-call cast traffic; biases / BN affine stay f32.
    The encoder head Linear(inter_dim, 2*latent) is kept fused — mu = cols
    [:latent], logvar = cols [latent:], identical math to chunk(2, dim=1)."""
    ks = jax.random.split(key, 4)

    def lin(k, fan_in, fan_out):
        kw, kb = jax.random.split(k)
        lim = 1.0 / jnp.sqrt(fan_in)
        w = jax.random.uniform(kw, (fan_in, fan_out), jnp.float32, -lim, lim)
        b = jax.random.uniform(kb, (1, fan_out), jnp.float32, -lim, lim)
        return w.astype(jnp.bfloat16), b

    w1, b1 = lin(ks[0], input_dim, inter_dim)
    g1 = jnp.ones((1, inter_dim), jnp.float32)
    be1 = jnp.zeros((1, inter_dim), jnp.float32)
    w2, b2 = lin(ks[1], inter_dim, 2 * latent_dim)
    w3, b3 = lin(ks[2], latent_dim, inter_dim)
    g2 = jnp.ones((1, inter_dim), jnp.float32)
    be2 = jnp.zeros((1, inter_dim), jnp.float32)
    w4, b4 = lin(ks[3], inter_dim, input_dim)
    return (w1, b1, g1, be1, w2, b2, w3, b3, g2, be2, w4, b4)


if __name__ == "__main__":
    # Shapes consistent with the module defaults: input flattens to 1024,
    # inter_dim=512, latent_dim=128 (all lane-aligned); batch=8 (sublane-aligned).
    batch, C, H, W = 8, 4, 16, 16
    input_dim, inter_dim, latent_dim = C * H * W, 512, 128

    key = jax.random.PRNGKey(0)
    kx, keps, kp = jax.random.split(key, 3)

    x = jax.random.normal(kx, (batch, C, H, W), dtype=jnp.float32)
    # epsilon for the reparameterisation trick (torch.randn_like(mu) equivalent)
    eps = jax.random.normal(keps, (batch, latent_dim), dtype=jnp.float32)
    params = init_params(kp, input_dim, inter_dim, latent_dim)

    recon_x, z, kl = vae_forward(x, params, eps)
    jax.block_until_ready((recon_x, z, kl))

    assert recon_x.shape == x.shape
    assert z.shape == (batch, latent_dim)
    assert jnp.isfinite(kl)
    assert jnp.all(jnp.isfinite(recon_x)) and jnp.all(jnp.isfinite(z))
    print("KERNEL_OK")
</pallas_src>

<mosaic_0001>
module attributes {stable_mosaic.version = 11 : i64} {
  func.func @vae_kernel(%arg0: memref<8x1024xbf16, #tpu.memory_space<vmem>>, %arg1: memref<8x128xf32, #tpu.memory_space<vmem>>, %arg2: memref<1024x512xbf16, #tpu.memory_space<vmem>>, %arg3: memref<1x512xf32, #tpu.memory_space<vmem>>, %arg4: memref<1x512xf32, #tpu.memory_space<vmem>>, %arg5: memref<1x512xf32, #tpu.memory_space<vmem>>, %arg6: memref<512x256xbf16, #tpu.memory_space<vmem>>, %arg7: memref<1x256xf32, #tpu.memory_space<vmem>>, %arg8: memref<128x512xbf16, #tpu.memory_space<vmem>>, %arg9: memref<1x512xf32, #tpu.memory_space<vmem>>, %arg10: memref<1x512xf32, #tpu.memory_space<vmem>>, %arg11: memref<1x512xf32, #tpu.memory_space<vmem>>, %arg12: memref<512x1024xbf16, #tpu.memory_space<vmem>>, %arg13: memref<1x1024xf32, #tpu.memory_space<vmem>>, %arg14: memref<8x1024xf32, #tpu.memory_space<vmem>>, %arg15: memref<8x128xf32, #tpu.memory_space<vmem>>, %arg16: memref<1x1xf32, #tpu.memory_space<smem>>) attributes {dimension_semantics = [], scalar_prefetch = 0 : i64, scratch_operands = 0 : i64, tpu.core_type = #tpu.core_type<tc>} {
    %c0 = arith.constant 0 : index
    %c0_0 = arith.constant 0 : index
    %0 = vector.load %arg0[%c0, %c0_0] : memref<8x1024xbf16, #tpu.memory_space<vmem>>, vector<8x1024xbf16>
    %c0_1 = arith.constant 0 : index
    %c0_2 = arith.constant 0 : index
    %1 = vector.load %arg1[%c0_1, %c0_2] : memref<8x128xf32, #tpu.memory_space<vmem>>, vector<8x128xf32>
    %c0_3 = arith.constant 0 : index
    %c0_4 = arith.constant 0 : index
    %2 = vector.load %arg2[%c0_3, %c0_4] : memref<1024x512xbf16, #tpu.memory_space<vmem>>, vector<1024x512xbf16>
    %cst = arith.constant dense<0.000000e+00> : vector<8x512xf32>
    %3 = tpu.matmul %0, %2, %cst {dimension_numbers = #tpu.dot_dimension_numbers<[1], [0], [0], [1], [0, 0, 1, 1], [], []>} : vector<8x1024xbf16>, vector<1024x512xbf16>, vector<8x512xf32> -> vector<8x512xf32>
    %c0_5 = arith.constant 0 : index
    %c0_6 = arith.constant 0 : index
    %4 = vector.load %arg3[%c0_5, %c0_6] : memref<1x512xf32, #tpu.memory_space<vmem>>, vector<1x512xf32>
    %5 = vector.broadcast %4 : vector<1x512xf32> to vector<8x512xf32>
    %6 = arith.addf %3, %5 : vector<8x512xf32>
    %cst_7 = arith.constant dense<0.000000e+00> : vector<512xf32>
    %7 = vector.multi_reduction <add>, %6, %cst_7 [0] : vector<8x512xf32> to vector<512xf32>
    %8 = vector.shape_cast %7 : vector<512xf32> to vector<1x512xf32>
    %9 = arith.mulf %6, %6 : vector<8x512xf32>
    %cst_8 = arith.constant dense<0.000000e+00> : vector<512xf32>
    %10 = vector.multi_reduction <add>, %9, %cst_8 [0] : vector<8x512xf32> to vector<512xf32>
    %11 = vector.shape_cast %10 : vector<512xf32> to vector<1x512xf32>
    %cst_9 = arith.constant 1.250000e-01 : f32
    %12 = vector.broadcast %cst_9 : f32 to vector<1x512xf32>
    %13 = arith.mulf %8, %12 : vector<1x512xf32>
    %cst_10 = arith.constant 1.250000e-01 : f32
    %14 = vector.broadcast %cst_10 : f32 to vector<1x512xf32>
    %15 = arith.mulf %11, %14 : vector<1x512xf32>
    %16 = arith.mulf %13, %13 : vector<1x512xf32>
    %17 = arith.subf %15, %16 : vector<1x512xf32>
    %18 = vector.broadcast %13 : vector<1x512xf32> to vector<8x512xf32>
    %19 = arith.subf %6, %18 : vector<8x512xf32>
    %cst_11 = arith.constant 9.99999974E-6 : f32
    %20 = vector.broadcast %cst_11 : f32 to vector<1x512xf32>
    %21 = arith.addf %17, %20 : vector<1x512xf32>
    %22 = math.rsqrt %21 : vector<1x512xf32>
    %23 = vector.broadcast %22 : vector<1x512xf32> to vector<8x512xf32>
    %24 = arith.mulf %19, %23 : vector<8x512xf32>
    %c0_12 = arith.constant 0 : index
    %c0_13 = arith.constant 0 : index
    %25 = vector.load %arg4[%c0_12, %c0_13] : memref<1x512xf32, #tpu.memory_space<vmem>>, vector<1x512xf32>
    %26 = vector.broadcast %25 : vector<1x512xf32> to vector<8x512xf32>
    %27 = arith.mulf %24, %26 : vector<8x512xf32>
    %c0_14 = arith.constant 0 : index
    %c0_15 = arith.constant 0 : index
    %28 = vector.load %arg5[%c0_14, %c0_15] : memref<1x512xf32, #tpu.memory_space<vmem>>, vector<1x512xf32>
    %29 = vector.broadcast %28 : vector<1x512xf32> to vector<8x512xf32>
    %30 = arith.addf %27, %29 : vector<8x512xf32>
    %cst_16 = arith.constant 0.000000e+00 : f32
    %31 = vector.broadcast %cst_16 : f32 to vector<8x512xf32>
    %32 = arith.maximumf %30, %31 : vector<8x512xf32>
    %33 = arith.truncf %32 : vector<8x512xf32> to vector<8x512xbf16>
    %c0_17 = arith.constant 0 : index
    %c0_18 = arith.constant 0 : index
    %34 = vector.load %arg6[%c0_17, %c0_18] : memref<512x256xbf16, #tpu.memory_space<vmem>>, vector<512x256xbf16>
    %cst_19 = arith.constant dense<0.000000e+00> : vector<8x256xf32>
    %35 = tpu.matmul %33, %34, %cst_19 {dimension_numbers = #tpu.dot_dimension_numbers<[1], [0], [0], [1], [0, 0, 1, 1], [], []>} : vector<8x512xbf16>, vector<512x256xbf16>, vector<8x256xf32> -> vector<8x256xf32>
    %c0_20 = arith.constant 0 : index
    %c0_21 = arith.constant 0 : index
    %36 = vector.load %arg7[%c0_20, %c0_21] : memref<1x256xf32, #tpu.memory_space<vmem>>, vector<1x256xf32>
    %37 = vector.broadcast %36 : vector<1x256xf32> to vector<8x256xf32>
    %38 = arith.addf %35, %37 : vector<8x256xf32>
    %39 = vector.extract_strided_slice %38 {offsets = [0, 0], sizes = [8, 128], strides = [1, 1]} : vector<8x256xf32> to vector<8x128xf32>
    %40 = vector.extract_strided_slice %38 {offsets = [0, 128], sizes = [8, 128], strides = [1, 1]} : vector<8x256xf32> to vector<8x128xf32>
    %cst_22 = arith.constant 5.000000e-01 : f32
    %41 = vector.broadcast %cst_22 : f32 to vector<8x128xf32>
    %42 = arith.mulf %41, %40 : vector<8x128xf32>
    %43 = math.exp %42 : vector<8x128xf32>
    %44 = arith.mulf %1, %43 : vector<8x128xf32>
    %45 = arith.addf %39, %44 : vector<8x128xf32>
    %c0_23 = arith.constant 0 : index
    %c0_24 = arith.constant 0 : index
    %46 = vector.load %arg15[%c0_23, %c0_24] : memref<8x128xf32, #tpu.memory_space<vmem>>, vector<8x128xf32>
    tpu.vector_store %arg15[%c0_23, %c0_24], %45 {strides = array<i32>} : memref<8x128xf32, #tpu.memory_space<vmem>>, vector<8x128xf32>,
    %cst_25 = arith.constant 1.000000e+00 : f32
    %47 = vector.broadcast %cst_25 : f32 to vector<8x128xf32>
    %48 = arith.addf %47, %40 : vector<8x128xf32>
    %49 = arith.mulf %39, %39 : vector<8x128xf32>
    %50 = arith.subf %48, %49 : vector<8x128xf32>
    %51 = arith.mulf %43, %43 : vector<8x128xf32>
    %52 = arith.subf %50, %51 : vector<8x128xf32>
    %53 = vector.shape_cast %52 : vector<8x128xf32> to vector<1x8x128xf32>
    %cst_26 = arith.constant dense<0.000000e+00> : vector<1xf32>
    %54 = vector.multi_reduction <add>, %53, %cst_26 [1, 2] : vector<1x8x128xf32> to vector<1xf32>
    %55 = vector.shape_cast %54 : vector<1xf32> to vector<1x1x1xf32>
    %56 = vector.extract %55[0, 0, 0] : f32 from vector<1x1x1xf32>
    %cst_27 = arith.constant -5.000000e-01 : f32
    %57 = arith.mulf %cst_27, %56 : f32
    %c0_28 = arith.constant 0 : index
    %c0_29 = arith.constant 0 : index
    %58 = memref.load %arg16[%c0_28, %c0_29] : memref<1x1xf32, #tpu.memory_space<smem>>
    memref.store %57, %arg16[%c0_28, %c0_29] : memref<1x1xf32, #tpu.memory_space<smem>>
    %59 = arith.truncf %45 : vector<8x128xf32> to vector<8x128xbf16>
    %c0_30 = arith.constant 0 : index
    %c0_31 = arith.constant 0 : index
    %60 = vector.load %arg8[%c0_30, %c0_31] : memref<128x512xbf16, #tpu.memory_space<vmem>>, vector<128x512xbf16>
    %cst_32 = arith.constant dense<0.000000e+00> : vector<8x512xf32>
    %61 = tpu.matmul %59, %60, %cst_32 {dimension_numbers = #tpu.dot_dimension_numbers<[1], [0], [0], [1], [0, 0, 1, 1], [], []>} : vector<8x128xbf16>, vector<128x512xbf16>, vector<8x512xf32> -> vector<8x512xf32>
    %c0_33 = arith.constant 0 : index
    %c0_34 = arith.constant 0 : index
    %62 = vector.load %arg9[%c0_33, %c0_34] : memref<1x512xf32, #tpu.memory_space<vmem>>, vector<1x512xf32>
    %63 = vector.broadcast %62 : vector<1x512xf32> to vector<8x512xf32>
    %64 = arith.addf %61, %63 : vector<8x512xf32>
    %cst_35 = arith.constant dense<0.000000e+00> : vector<512xf32>
    %65 = vector.multi_reduction <add>, %64, %cst_35 [0] : vector<8x512xf32> to vector<512xf32>
    %66 = vector.shape_cast %65 : vector<512xf32> to vector<1x512xf32>
    %67 = arith.mulf %64, %64 : vector<8x512xf32>
    %cst_36 = arith.constant dense<0.000000e+00> : vector<512xf32>
    %68 = vector.multi_reduction <add>, %67, %cst_36 [0] : vector<8x512xf32> to vector<512xf32>
    %69 = vector.shape_cast %68 : vector<512xf32> to vector<1x512xf32>
    %cst_37 = arith.constant 1.250000e-01 : f32
    %70 = vector.broadcast %cst_37 : f32 to vector<1x512xf32>
    %71 = arith.mulf %66, %70 : vector<1x512xf32>
    %cst_38 = arith.constant 1.250000e-01 : f32
    %72 = vector.broadcast %cst_38 : f32 to vector<1x512xf32>
    %73 = arith.mulf %69, %72 : vector<1x512xf32>
    %74 = arith.mulf %71, %71 : vector<1x512xf32>
    %75 = arith.subf %73, %74 : vector<1x512xf32>
    %76 = vector.broadcast %71 : vector<1x512xf32> to vector<8x512xf32>
    %77 = arith.subf %64, %76 : vector<8x512xf32>
    %cst_39 = arith.constant 9.99999974E-6 : f32
    %78 = vector.broadcast %cst_39 : f32 to vector<1x512xf32>
    %79 = arith.addf %75, %78 : vector<1x512xf32>
    %80 = math.rsqrt %79 : vector<1x512xf32>
    %81 = vector.broadcast %80 : vector<1x512xf32> to vector<8x512xf32>
    %82 = arith.mulf %77, %81 : vector<8x512xf32>
    %c0_40 = arith.constant 0 : index
    %c0_41 = arith.constant 0 : index
    %83 = vector.load %arg10[%c0_40, %c0_41] : memref<1x512xf32, #tpu.memory_space<vmem>>, vector<1x512xf32>
    %84 = vector.broadcast %83 : vector<1x512xf32> to vector<8x512xf32>
    %85 = arith.mulf %82, %84 : vector<8x512xf32>
    %c0_42 = arith.constant 0 : index
    %c0_43 = arith.constant 0 : index
    %86 = vector.load %arg11[%c0_42, %c0_43] : memref<1x512xf32, #tpu.memory_space<vmem>>, vector<1x512xf32>
    %87 = vector.broadcast %86 : vector<1x512xf32> to vector<8x512xf32>
    %88 = arith.addf %85, %87 : vector<8x512xf32>
    %cst_44 = arith.constant 0.000000e+00 : f32
    %89 = vector.broadcast %cst_44 : f32 to vector<8x512xf32>
    %90 = arith.maximumf %88, %89 : vector<8x512xf32>
    %91 = arith.truncf %90 : vector<8x512xf32> to vector<8x512xbf16>
    %c0_45 = arith.constant 0 : index
    %c0_46 = arith.constant 0 : index
    %92 = vector.load %arg12[%c0_45, %c0_46] : memref<512x1024xbf16, #tpu.memory_space<vmem>>, vector<512x1024xbf16>
    %cst_47 = arith.constant dense<0.000000e+00> : vector<8x1024xf32>
    %93 = tpu.matmul %91, %92, %cst_47 {dimension_numbers = #tpu.dot_dimension_numbers<[1], [0], [0], [1], [0, 0, 1, 1], [], []>} : vector<8x512xbf16>, vector<512x1024xbf16>, vector<8x1024xf32> -> vector<8x1024xf32>
    %c0_48 = arith.constant 0 : index
    %c0_49 = arith.constant 0 : index
    %94 = vector.load %arg13[%c0_48, %c0_49] : memref<1x1024xf32, #tpu.memory_space<vmem>>, vector<1x1024xf32>
    %95 = vector.broadcast %94 : vector<1x1024xf32> to vector<8x1024xf32>
    %96 = arith.addf %93, %95 : vector<8x1024xf32>
    %c0_50 = arith.constant 0 : index
    %c0_51 = arith.constant 0 : index
    %97 = vector.load %arg14[%c0_50, %c0_51] : memref<8x1024xf32, #tpu.memory_space<vmem>>, vector<8x1024xf32>
    tpu.vector_store %arg14[%c0_50, %c0_51], %96 {strides = array<i32>} : memref<8x1024xf32, #tpu.memory_space<vmem>>, vector<8x1024xf32>,
    return
  }
}

</mosaic_0001>

<bundles_post_ra>
// kernel: tpu_custom_call.1
= control target key start
LH: loop header
LB: loop body
LE: loop exit
PB: predicated region body
PF: predicated region fallthrough
CT: control target
= control target key end

     0   :  { %s7014_s0 = inlined_call_operand.hbm [shape: bf16[8,1024], index: 0, kind: input, shape index: {}]   ;;  %s7015_s1 = inlined_call_operand.hbm [shape: f32[8,128], index: 1, kind: input, shape index: {}]   ;;  %s7016_s2 = inlined_call_operand.hbm [shape: bf16[1024,512], index: 2, kind: input, shape index: {}]   ;;  %s7017_s3 = inlined_call_operand.vmem [shape: f32[1,512], index: 3, kind: input, shape index: {}]   ;;  %s7018_s4 = inlined_call_operand.hbm [shape: f32[1,512], index: 4, kind: input, shape index: {}]   ;;  %s7019_s5 = inlined_call_operand.vmem [shape: f32[1,512], index: 5, kind: input, shape index: {}]   ;;  %s7020_s6 = inlined_call_operand.hbm [shape: bf16[512,256], index: 6, kind: input, shape index: {}]   ;;  %s7021_s7 = inlined_call_operand.vmem [shape: f32[1,256], index: 7, kind: input, shape index: {}]   ;;  %s7022_s8 = inlined_call_operand.hbm [shape: bf16[128,512], index: 8, kind: input, shape index: {}]   ;;  %s7023_s9 = inlined_call_operand.vmem [shape: f32[1,512], index: 9, kind: input, shape index: {}]   ;;  %s7024_s10 = inlined_call_operand.vmem [shape: f32[1,512], index: 10, kind: input, shape index: {}]   ;;  %s7025_s11 = inlined_call_operand.vmem [shape: f32[1,512], index: 11, kind: input, shape index: {}]   ;;  %s7026_s12 = inlined_call_operand.hbm [shape: bf16[512,1024], index: 12, kind: input, shape index: {}]   ;;  %s7027_s13 = inlined_call_operand.vmem [shape: f32[1,1024], index: 13, kind: input, shape index: {}]   ;;  %s7028_s14 = inlined_call_operand.hbm [shape: f32[8,1024], index: 14, kind: output, shape index: {0}]   ;;  %s7029_s15 = inlined_call_operand.hbm [shape: f32[8,128], index: 15, kind: output, shape index: {1}]   ;;  %s7030_s16 = inlined_call_operand.hbm [shape: f32[1,1], index: 16, kind: output, shape index: {2}]  }
   0x1   :  { %7032 = sst [smem:[#allocation26_spill]] %s7014_s0 }
   0x2   :  { %22 = vsyncpa [#allocation3], 0 }
   0x3   :  { %23 = vsyncpa [#allocation7], 0 }
   0x4   :  { %24 = vsyncpa [#allocation10], 0 }
   0x5   :  { %25 = vsyncpa [#allocation13], 0 }
   0x6   :  { %26 = vsyncpa [#allocation4], 0 }
   0x7   :  { %27 = vsyncpa [#allocation17], 0 }
   0x8   :  { %28 = vsyncpa [#allocation5], 0  ;;  %s6576_s21 = smov [#allocation6]   ;;  %s6577_s23 = smov [#allocation9]  }
   0x9   :  { %s45_s22 = sshll.u32 %s6576_s21, 4  ;;  %s69_s24 = sshll.u32 %s6577_s23, 4  ;;  %s46_s22 = int_to_ptr.vmem [resolvable:$true] %s45_s22  ;;  %s70_s24 = int_to_ptr.vmem [resolvable:$true] %s69_s24 }
   0xa   :  { %s6354_s27 = scalar_lea.hbm %s7015_s1, 128 }
   0xb   :  { %p6355_p0 = scmp.ne.s32.totalorder %s7015_s1, %s6354_s27  ;;  %p6358_p1 = scmp.lt.u32.totalorder %s6354_s27, %s7015_s1 }
   0xd   :  { %p6360_p2 = pnand %p6358_p1, %p6355_p0 }
   0xf   :  { %6363 = shalt.err (!%p6360_p2)
}
  0x10   :  { %s6364_s17 = scalar_lea.vmem %s46_s22, 128  ;;  %p6369_p4 = scmp.lt.s32.totalorder %s46_s22, %s46_s22 }
  0x11   :  { %p6365_p3 = scmp.ne.s32.totalorder %s46_s22, %s6364_s17  ;;  %p6370_p5 = scmp.lt.s32.totalorder %s6364_s17, %s6364_s17 }
  0x13   :  { %p6371_p6 = por %p6370_p5, %p6369_p4 }
  0x15   :  { %p6372_p7 = pnand %p6371_p6, %p6365_p3 }
  0x17   :  { %6375 = shalt.err (!%p6372_p7)
}
  0x18   :  { %48 = dma.hbm_to_vmem [thread:$0]  %s7015_s1, 128, %s46_s22, [#allocation7]  }
  0x19   :  { %s6376_s23 = scalar_lea.hbm %s7018_s4, 64 }
  0x1a   :  { %p6377_p8 = scmp.ne.s32.totalorder %s7018_s4, %s6376_s23  ;;  %p6380_p9 = scmp.lt.u32.totalorder %s6376_s23, %s7018_s4 }
  0x1c   :  { %p6382_p10 = pnand %p6380_p9, %p6377_p8 }
  0x1e   :  { %6385 = shalt.err (!%p6382_p10)
}
  0x1f   :  { %s6386_s29 = scalar_lea.vmem %s70_s24, 64  ;;  %p6391_p12 = scmp.lt.s32.totalorder %s70_s24, %s70_s24 }
  0x20   :  { %p6387_p11 = scmp.ne.s32.totalorder %s70_s24, %s6386_s29  ;;  %p6392_p13 = scmp.lt.s32.totalorder %s6386_s29, %s6386_s29 }
  0x22   :  { %p6393_p0 = por %p6392_p13, %p6391_p12 }
  0x24   :  { %p6394_p1 = pnand %p6393_p0, %p6387_p11 }
  0x26   :  { %6397 = shalt.err (!%p6394_p1)
}
  0x27   :  { %72 = dma.hbm_to_vmem [thread:$0]  %s7018_s4, 64, %s70_s24, [#allocation10]  }
  0x28   :  { %s6578_s30 = smov [#allocation12]   ;;  %s6579_s17 = smov [#allocation2]  }
  0x29   :  { %s94_s0 = sshll.u32 %s6578_s30, 4  ;;  %s35_s18 = sshll.u32 %s6579_s17, 4  ;;  %s95_s0 = int_to_ptr.vmem [resolvable:$true] %s94_s0  ;;  %s36_s18 = int_to_ptr.vmem [resolvable:$true] %s35_s18 }
  0x2a   :  { %s6398_s21 = scalar_lea.hbm %s7022_s8, 4096 }
  0x2b   :  { %p6399_p2 = scmp.ne.s32.totalorder %s7022_s8, %s6398_s21  ;;  %p6402_p3 = scmp.lt.u32.totalorder %s6398_s21, %s7022_s8 }
  0x2d   :  { %p6404_p4 = pnand %p6402_p3, %p6399_p2 }
  0x2f   :  { %6407 = shalt.err (!%p6404_p4)
}
  0x30   :  { %s6408_s4 = scalar_lea.vmem %s95_s0, 4096  ;;  %p6413_p6 = scmp.lt.s32.totalorder %s95_s0, %s95_s0 }
  0x31   :  { %p6409_p5 = scmp.ne.s32.totalorder %s95_s0, %s6408_s4  ;;  %p6414_p7 = scmp.lt.s32.totalorder %s6408_s4, %s6408_s4 }
  0x33   :  { %p6415_p8 = por %p6414_p7, %p6413_p6 }
  0x35   :  { %p6416_p9 = pnand %p6415_p8, %p6409_p5 }
  0x37   :  { %6419 = shalt.err (!%p6416_p9)
}
  0x38   :  { %s6580_s24 = smov 256   ;;  %s6581_s28 = smov 16  }
  0x39   :  { %100 = dma.hbm_to_vmem [thread:$0]  %s7022_s8, 4096, %s95_s0, [#allocation13], %s6580_s24, %s6580_s24, %s6581_s28  }
  0x3a   :  { %s7033_s17 = sld [smem:[#allocation26_spill]] }
  0x40   :  { %s6420_s19 = scalar_lea.hbm %s7033_s17, 512 }
  0x41   :  { %p6421_p10 = scmp.ne.s32.totalorder %s7033_s17, %s6420_s19  ;;  %p6424_p11 = scmp.lt.u32.totalorder %s6420_s19, %s7033_s17 }
  0x43   :  { %p6426_p12 = pnand %p6424_p11, %p6421_p10 }
  0x45   :  { %6429 = shalt.err (!%p6426_p12)
}
  0x46   :  { %s6430_s26 = scalar_lea.vmem %s36_s18, 512  ;;  %p6435_p0 = scmp.lt.s32.totalorder %s36_s18, %s36_s18 }
  0x47   :  { %p6431_p13 = scmp.ne.s32.totalorder %s36_s18, %s6430_s26  ;;  %p6436_p1 = scmp.lt.s32.totalorder %s6430_s26, %s6430_s26 }
  0x49   :  { %p6437_p2 = por %p6436_p1, %p6435_p0 }
  0x4b   :  { %p6438_p3 = pnand %p6437_p2, %p6431_p13 }
  0x4d   :  { %6441 = shalt.err (!%p6438_p3)
}
  0x4e   :  { %38 = dma.hbm_to_vmem [thread:$0]  %s7033_s17, 512, %s36_s18, [#allocation3]  }
  0x4f   :  { %s6582_s27 = smov [#allocation8]   ;;  %s6583_s29 = smov [#allocation11]  }
  0x50   :  { %s54_s4 = sshll.u32 %s6582_s27, 4  ;;  %s80_s1 = sshll.u32 %s6583_s29, 4  ;;  %s55_s4 = int_to_ptr.vmem [resolvable:$true] %s54_s4  ;;  %s6729_s1 = int_to_ptr.vmem [resolvable:$true] %s80_s1 }
  0x51   :  { %s6442_s19 = scalar_lea.hbm %s7016_s2, 32768 }
  0x52   :  { %p6443_p4 = scmp.ne.s32.totalorder %s7016_s2, %s6442_s19  ;;  %p6446_p5 = scmp.lt.u32.totalorder %s6442_s19, %s7016_s2 }
  0x54   :  { %p6448_p6 = pnand %p6446_p5, %p6443_p4 }
  0x56   :  { %6451 = shalt.err (!%p6448_p6)
}
  0x57   :  { %s6452_s18 = scalar_lea.vmem %s55_s4, 32768  ;;  %p6457_p8 = scmp.lt.s32.totalorder %s55_s4, %s55_s4 }
  0x58   :  { %p6453_p7 = scmp.ne.s32.totalorder %s55_s4, %s6452_s18  ;;  %p6458_p9 = scmp.lt.s32.totalorder %s6452_s18, %s6452_s18 }
  0x5a   :  { %p6459_p10 = por %p6458_p9, %p6457_p8 }
  0x5c   :  { %p6460_p11 = pnand %p6459_p10, %p6453_p7 }
  0x5e   :  { %6463 = shalt.err (!%p6460_p11)
}
  0x5f   :  { %60 = dma.hbm_to_vmem [thread:$0]  %s7016_s2, 32768, %s55_s4, [#allocation7], %s6580_s24, %s6580_s24, %s6581_s28  }
  0x60   :  { %s6464_s27 = scalar_lea.hbm %s7020_s6, 8192 }
  0x61   :  { %p6465_p12 = scmp.ne.s32.totalorder %s7020_s6, %s6464_s27  ;;  %p6468_p13 = scmp.lt.u32.totalorder %s6464_s27, %s7020_s6 }
  0x63   :  { %p6470_p0 = pnand %p6468_p13, %p6465_p12 }
  0x65   :  { %6473 = shalt.err (!%p6470_p0)
}
  0x66   :  { %s6474_s20 = scalar_lea.vmem %s6729_s1, 8192  ;;  %p6479_p2 = scmp.lt.s32.totalorder %s6729_s1, %s6729_s1 }
  0x67   :  { %p6475_p1 = scmp.ne.s32.totalorder %s6729_s1, %s6474_s20  ;;  %p6480_p3 = scmp.lt.s32.totalorder %s6474_s20, %s6474_s20 }
  0x69   :  { %p6481_p4 = por %p6480_p3, %p6479_p2 }
  0x6b   :  { %p6482_p5 = pnand %p6481_p4, %p6475_p1 }
  0x6d   :  { %6485 = shalt.err (!%p6482_p5)
}
  0x6e   :  { %s6584_s2 = smov 128   ;;  %s6585_s24 = smov 8  }
  0x6f   :  { %86 = dma.hbm_to_vmem [thread:$0]  %s7020_s6, 8192, %s6729_s1, [#allocation10], %s6584_s2, %s6584_s2, %s6585_s24  }
  0x70   :  { %s6586_s21 = smov [#allocation14]   ;;  %s6486_s17 = scalar_lea.hbm %s7026_s12, 32768 }
  0x71   :  { %s112_s23 = sshll.u32 %s6586_s21, 4  ;;  %p6487_p6 = scmp.ne.s32.totalorder %s7026_s12, %s6486_s17  ;;  %s113_s23 = int_to_ptr.vmem [resolvable:$true] %s112_s23 }
  0x72   :  { %p6490_p7 = scmp.lt.u32.totalorder %s6486_s17, %s7026_s12 }
  0x74   :  { %p6492_p8 = pnand %p6490_p7, %p6487_p6 }
  0x76   :  { %6495 = shalt.err (!%p6492_p8)
}
  0x77   :  { %s6496_s29 = scalar_lea.vmem %s113_s23, 32768  ;;  %p6501_p10 = scmp.lt.s32.totalorder %s113_s23, %s113_s23 }
  0x78   :  { %p6497_p9 = scmp.ne.s32.totalorder %s113_s23, %s6496_s29  ;;  %p6502_p11 = scmp.lt.s32.totalorder %s6496_s29, %s6496_s29 }
  0x7a   :  { %p6503_p12 = por %p6502_p11, %p6501_p10 }
  0x7c   :  { %p6504_p13 = pnand %p6503_p12, %p6497_p9 }
  0x7e   :  { %6507 = shalt.err (!%p6504_p13)
}
  0x7f   :  { %s6587_s6 = smov 512   ;;  %s6588_s1 = smov 32  }
  0x80   :  { %118 = dma.hbm_to_vmem [thread:$0]  %s7026_s12, 32768, %s113_s23, [#allocation13], %s6587_s6, %s6587_s6, %s6588_s1  }
  0x81   :  { %6562 = dma.done.wait [#allocation3], 512  }
  0x82   :  { %6563 = vsyncadd [#allocation3], 4294966784 }
  0x83   :  { %6564 = dma.done.wait [#allocation7], 32896  }
  0x84   :  { %6565 = vsyncadd [#allocation7], 4294934400 }
  0x85   :  { %6566 = dma.done.wait [#allocation10], 8256  }
  0x86   :  { %6567 = vsyncadd [#allocation10], 4294959040 }
  0x87   :  { %6568 = dma.done.wait [#allocation13], 36864  }
  0x88   :  { %6569 = vsyncadd [#allocation13], 4294930432  ;;  %v5800_v0 = vld [vmem:[#allocation8 + $0x4] ss:$16 sps:$4 sm:$0xff]   ;;  %v5802_v1 = vld [vmem:[#allocation8 + $0xc] ss:$16 sps:$4 sm:$0xff]  }
  0x89   :  { %1734 = vmatprep.subr.bf16.mxu0 %v5800_v0  ;;  %v5804_v2 = vld [vmem:[#allocation8] ss:$16 sps:$4 sm:$0xff]   ;;  %v5805_v3 = vld [vmem:[#allocation8 + $0x8] ss:$16 sps:$4 sm:$0xff]   ;;  %1898 = vmatprep.subr.bf16.mxu1 %v5802_v1  ;;  %v5806_v4 = vld [vmem:[#allocation8 + $0x24] ss:$16 sps:$4 sm:$0xff]  }
  0x8a   :  { %1735 = vmatpush1.bf16.msra.mxu0 %v5804_v2  ;;  %1899 = vmatpush1.bf16.msra.mxu1 %v5805_v3  ;;  %v5808_v5 = vld [vmem:[#allocation8 + $0x2c] ss:$16 sps:$4 sm:$0xff]   ;;  %v5810_v6 = vld [vmem:[#allocation8 + $0x20] ss:$16 sps:$4 sm:$0xff]   ;;  %v5811_v7 = vld [vmem:[#allocation8 + $0x28] ss:$16 sps:$4 sm:$0xff]  }
  0x8b   :  { %1736 = vmatprep.subr.bf16.mxu0 %v5806_v4  ;;  %1900 = vmatprep.subr.bf16.mxu1 %v5808_v5  ;;  %v5812_v8 = vld [vmem:[#allocation8 + $0x44] ss:$16 sps:$4 sm:$0xff]   ;;  %v5814_v9 = vld [vmem:[#allocation8 + $0x4c] ss:$16 sps:$4 sm:$0xff]   ;;  %v5816_v10 = vld [vmem:[#allocation8 + $0x40] ss:$16 sps:$4 sm:$0xff]  }
  0x8c   :  { %v5817_v11 = vld [vmem:[#allocation8 + $0x48] ss:$16 sps:$4 sm:$0xff]   ;;  %v5818_v12 = vld [vmem:[#allocation8 + $0x64] ss:$16 sps:$4 sm:$0xff]   ;;  %v5820_v13 = vld [vmem:[#allocation8 + $0x6c] ss:$16 sps:$4 sm:$0xff]  }
  0x8d   :  { %v5822_v14 = vld [vmem:[#allocation8 + $0x60] ss:$16 sps:$4 sm:$0xff]   ;;  %v5823_v15 = vld [vmem:[#allocation8 + $0x68] ss:$16 sps:$4 sm:$0xff]   ;;  %v5824_v16 = vld [vmem:[#allocation8 + $0x84] ss:$16 sps:$4 sm:$0xff]  }
  0x8e   :  { %1737 = vmatpush1.bf16.msra.mxu0 %v5810_v6  ;;  %1901 = vmatpush1.bf16.msra.mxu1 %v5811_v7  ;;  %v5826_v17 = vld [vmem:[#allocation8 + $0x8c] ss:$16 sps:$4 sm:$0xff]   ;;  %v5828_v18 = vld [vmem:[#allocation8 + $0x80] ss:$16 sps:$4 sm:$0xff]   ;;  %v5829_v19 = vld [vmem:[#allocation8 + $0x88] ss:$16 sps:$4 sm:$0xff]  }
  0x8f   :  { %1738 = vmatprep.subr.bf16.mxu0 %v5812_v8  ;;  %1902 = vmatprep.subr.bf16.mxu1 %v5814_v9  ;;  %v5830_v20 = vld [vmem:[#allocation8 + $0xa4] ss:$16 sps:$4 sm:$0xff]   ;;  %v5832_v21 = vld [vmem:[#allocation8 + $0xac] ss:$16 sps:$4 sm:$0xff]   ;;  %v5834_v22 = vld [vmem:[#allocation8 + $0xa0] ss:$16 sps:$4 sm:$0xff]  }
  0x90   :  { %v5835_v23 = vld [vmem:[#allocation8 + $0xa8] ss:$16 sps:$4 sm:$0xff]   ;;  %v5836_v24 = vld [vmem:[#allocation8 + $0xc4] ss:$16 sps:$4 sm:$0xff]   ;;  %v5838_v25 = vld [vmem:[#allocation8 + $0xcc] ss:$16 sps:$4 sm:$0xff]  }
  0x91   :  { %v5840_v26 = vld [vmem:[#allocation8 + $0xc0] ss:$16 sps:$4 sm:$0xff]   ;;  %v5841_v27 = vld [vmem:[#allocation8 + $0xc8] ss:$16 sps:$4 sm:$0xff]   ;;  %v5842_v28 = vld [vmem:[#allocation8 + $0xe4] ss:$16 sps:$4 sm:$0xff]  }
  0x92   :  { %1739 = vmatpush1.bf16.msra.mxu0 %v5816_v10  ;;  %1903 = vmatpush1.bf16.msra.mxu1 %v5817_v11  ;;  %v5844_v29 = vld [vmem:[#allocation8 + $0xec] ss:$16 sps:$4 sm:$0xff]   ;;  %v5846_v30 = vld [vmem:[#allocation8 + $0xe0] ss:$16 sps:$4 sm:$0xff]   ;;  %v5847_v31 = vld [vmem:[#allocation8 + $0xe8] ss:$16 sps:$4 sm:$0xff]  }
  0x93   :  { %1740 = vmatprep.subr.bf16.mxu0 %v5818_v12  ;;  %1904 = vmatprep.subr.bf16.mxu1 %v5820_v13  ;;  %v5848_v32 = vld [vmem:[#allocation8 + $0x104] ss:$16 sps:$4 sm:$0xff]   ;;  %v5850_v33 = vld [vmem:[#allocation8 + $0x10c] ss:$16 sps:$4 sm:$0xff]   ;;  %v5852_v34 = vld [vmem:[#allocation8 + $0x100] ss:$16 sps:$4 sm:$0xff]  }
  0x94   :  { %v5853_v35 = vld [vmem:[#allocation8 + $0x108] ss:$16 sps:$4 sm:$0xff]   ;;  %v5854_v36 = vld [vmem:[#allocation8 + $0x124] ss:$16 sps:$4 sm:$0xff]   ;;  %v5856_v37 = vld [vmem:[#allocation8 + $0x12c] ss:$16 sps:$4 sm:$0xff]  }
  0x95   :  { %v5858_v38 = vld [vmem:[#allocation8 + $0x120] ss:$16 sps:$4 sm:$0xff]   ;;  %v5859_v39 = vld [vmem:[#allocation8 + $0x128] ss:$16 sps:$4 sm:$0xff]   ;;  %v5860_v40 = vld [vmem:[#allocation8 + $0x144] ss:$16 sps:$4 sm:$0xff]  }
  0x96   :  { %1741 = vmatpush1.bf16.msra.mxu0 %v5822_v14  ;;  %1905 = vmatpush1.bf16.msra.mxu1 %v5823_v15  ;;  %v5862_v41 = vld [vmem:[#allocation8 + $0x14c] ss:$16 sps:$4 sm:$0xff]   ;;  %v5864_v42 = vld [vmem:[#allocation8 + $0x140] ss:$16 sps:$4 sm:$0xff]   ;;  %v5865_v43 = vld [vmem:[#allocation8 + $0x148] ss:$16 sps:$4 sm:$0xff]  }
  0x97   :  { %1742 = vmatprep.subr.bf16.mxu0 %v5824_v16  ;;  %1906 = vmatprep.subr.bf16.mxu1 %v5826_v17  ;;  %v5866_v44 = vld [vmem:[#allocation8 + $0x164] ss:$16 sps:$4 sm:$0xff]   ;;  %v5868_v45 = vld [vmem:[#allocation8 + $0x16c] ss:$16 sps:$4 sm:$0xff]   ;;  %v5870_v47 = vld [vmem:[#allocation8 + $0x160] ss:$16 sps:$4 sm:$0xff]  }
  0x98   :  { %v143_v46 = vld [vmem:[#allocation2] sm:$0xff]  ;;  %v5872_v50 = vld [vmem:[#allocation8 + $0x184] ss:$16 sps:$4 sm:$0xff]   ;;  %v5876_v52 = vld [vmem:[#allocation8 + $0x180] ss:$16 sps:$4 sm:$0xff]  }
  0x99   :  { %v5108_v48 = vcombine.high %v143_v46, %v143_v46  ;;  %v5871_v49 = vld [vmem:[#allocation8 + $0x168] ss:$16 sps:$4 sm:$0xff]   ;;  %v5874_v51 = vld [vmem:[#allocation8 + $0x18c] ss:$16 sps:$4 sm:$0xff]   ;;  %v5878_v54 = vld [vmem:[#allocation8 + $0x1a4] ss:$16 sps:$4 sm:$0xff]   ;;  %v5107_v4 = vcombine.low %v143_v46, %v143_v46 }
  0x9a   :  { %1743 = vmatpush1.bf16.msra.mxu0 %v5828_v18  ;;  %1907 = vmatpush1.bf16.msra.mxu1 %v5829_v19  ;;  %v5877_v53 = vld [vmem:[#allocation8 + $0x188] ss:$16 sps:$4 sm:$0xff]   ;;  %v5880_v55 = vld [vmem:[#allocation8 + $0x1ac] ss:$16 sps:$4 sm:$0xff]   ;;  %v5882_v56 = vld [vmem:[#allocation8 + $0x1a0] ss:$16 sps:$4 sm:$0xff]  }
  0x9b   :  { %1744 = vmatprep.subr.bf16.mxu0 %v5830_v20  ;;  %1908 = vmatprep.subr.bf16.mxu1 %v5832_v21  ;;  %v5883_v57 = vld [vmem:[#allocation8 + $0x1a8] ss:$16 sps:$4 sm:$0xff]   ;;  %v5884_v58 = vld [vmem:[#allocation8 + $0x1c4] ss:$16 sps:$4 sm:$0xff]   ;;  %v5886_v59 = vld [vmem:[#allocation8 + $0x1cc] ss:$16 sps:$4 sm:$0xff]  }
  0x9c   :  { %1766 = vmatprep.mubr.bf16.mxu0 %v5108_v48  ;;  %1930 = vmatprep.mubr.bf16.mxu1 %v5108_v48  ;;  %v5888_v60 = vld [vmem:[#allocation8 + $0x1c0] ss:$16 sps:$4 sm:$0xff]   ;;  %v5889_v61 = vld [vmem:[#allocation8 + $0x1c8] ss:$16 sps:$4 sm:$0xff]   ;;  %v5890_v62 = vld [vmem:[#allocation8 + $0x1e4] ss:$16 sps:$4 sm:$0xff]  }
  0x9d   :  { %v5892_v63 = vld [vmem:[#allocation8 + $0x1ec] ss:$16 sps:$4 sm:$0xff]   ;;  %v5894_v0 = vld [vmem:[#allocation8 + $0x1e0] ss:$16 sps:$4 sm:$0xff]   ;;  %v5895_v1 = vld [vmem:[#allocation8 + $0x1e8] ss:$16 sps:$4 sm:$0xff]  }
  0x9e   :  { %1745 = vmatpush1.bf16.msra.mxu0 %v5834_v22  ;;  %1909 = vmatpush1.bf16.msra.mxu1 %v5835_v23  ;;  %v5900_v2 = vld [vmem:[#allocation8 + $0x204] ss:$16 sps:$4 sm:$0xff]   ;;  %v5903_v3 = vld [vmem:[#allocation8 + $0x20c] ss:$16 sps:$4 sm:$0xff]   ;;  %v5898_v5 = vld [vmem:[#allocation8 + $0x200] ss:$16 sps:$4 sm:$0xff]  }
  0x9f   :  { %1746 = vmatprep.subr.bf16.mxu0 %v5836_v24  ;;  %1910 = vmatprep.subr.bf16.mxu1 %v5838_v25  ;;  %v5901_v6 = vld [vmem:[#allocation8 + $0x208] ss:$16 sps:$4 sm:$0xff]   ;;  %v5906_v7 = vld [vmem:[#allocation8 + $0x224] ss:$16 sps:$4 sm:$0xff]   ;;  %v5909_v8 = vld [vmem:[#allocation8 + $0x22c] ss:$16 sps:$4 sm:$0xff]  }
  0xa0   :  { %v5904_v9 = vld [vmem:[#allocation8 + $0x220] ss:$16 sps:$4 sm:$0xff]   ;;  %v5907_v10 = vld [vmem:[#allocation8 + $0x228] ss:$16 sps:$4 sm:$0xff]   ;;  %v5912_v11 = vld [vmem:[#allocation8 + $0x244] ss:$16 sps:$4 sm:$0xff]  }
  0xa1   :  { %v5915_v12 = vld [vmem:[#allocation8 + $0x24c] ss:$16 sps:$4 sm:$0xff]   ;;  %v5910_v13 = vld [vmem:[#allocation8 + $0x240] ss:$16 sps:$4 sm:$0xff]   ;;  %v5913_v14 = vld [vmem:[#allocation8 + $0x248] ss:$16 sps:$4 sm:$0xff]  }
  0xa2   :  { %1747 = vmatpush1.bf16.msra.mxu0 %v5840_v26  ;;  %1911 = vmatpush1.bf16.msra.mxu1 %v5841_v27  ;;  %v5918_v15 = vld [vmem:[#allocation8 + $0x264] ss:$16 sps:$4 sm:$0xff]   ;;  %v5921_v16 = vld [vmem:[#allocation8 + $0x26c] ss:$16 sps:$4 sm:$0xff]   ;;  %v5916_v17 = vld [vmem:[#allocation8 + $0x260] ss:$16 sps:$4 sm:$0xff]  }
  0xa3   :  { %1748 = vmatprep.subr.bf16.mxu0 %v5842_v28  ;;  %1912 = vmatprep.subr.bf16.mxu1 %v5844_v29  ;;  %v5919_v18 = vld [vmem:[#allocation8 + $0x268] ss:$16 sps:$4 sm:$0xff]   ;;  %v5924_v19 = vld [vmem:[#allocation8 + $0x284] ss:$16 sps:$4 sm:$0xff]   ;;  %v5927_v20 = vld [vmem:[#allocation8 + $0x28c] ss:$16 sps:$4 sm:$0xff]  }
  0xa4   :  { %v5922_v21 = vld [vmem:[#allocation8 + $0x280] ss:$16 sps:$4 sm:$0xff]   ;;  %v5925_v22 = vld [vmem:[#allocation8 + $0x288] ss:$16 sps:$4 sm:$0xff]   ;;  %v5930_v23 = vld [vmem:[#allocation8 + $0x2a4] ss:$16 sps:$4 sm:$0xff]  }
  0xa5   :  { %v5933_v24 = vld [vmem:[#allocation8 + $0x2ac] ss:$16 sps:$4 sm:$0xff]   ;;  %v5928_v25 = vld [vmem:[#allocation8 + $0x2a0] ss:$16 sps:$4 sm:$0xff]   ;;  %v5931_v26 = vld [vmem:[#allocation8 + $0x2a8] ss:$16 sps:$4 sm:$0xff]  }
  0xa6   :  { %1749 = vmatpush1.bf16.msra.mxu0 %v5846_v30  ;;  %1913 = vmatpush1.bf16.msra.mxu1 %v5847_v31  ;;  %v5936_v27 = vld [vmem:[#allocation8 + $0x2c4] ss:$16 sps:$4 sm:$0xff]   ;;  %v5939_v28 = vld [vmem:[#allocation8 + $0x2cc] ss:$16 sps:$4 sm:$0xff]   ;;  %v5934_v31 = vld [vmem:[#allocation8 + $0x2c0] ss:$16 sps:$4 sm:$0xff]  }
  0xa7   :  { %1750 = vmatprep.subr.bf16.mxu0 %v5848_v32  ;;  %1914 = vmatprep.subr.bf16.mxu1 %v5850_v33  ;;  %v6775_v29 = vld [vmem:[#allocation2 + $0x8] sm:$0xff]  ;;  %v5937_v32 = vld [vmem:[#allocation8 + $0x2c8] ss:$16 sps:$4 sm:$0xff]   ;;  %v5963_v46 = vld [vmem:[#allocation8 + $0x34c] ss:$16 sps:$4 sm:$0xff]  }
  0xa8   :  { %v5110_v30 = vcombine.high %v6775_v29, %v6775_v29  ;;  %v5942_v33 = vld [vmem:[#allocation8 + $0x2e4] ss:$16 sps:$4 sm:$0xff]   ;;  %v5961_v48 = vld [vmem:[#allocation8 + $0x348] ss:$16 sps:$4 sm:$0xff]  }
  0xaa   :  { %1751 = vmatpush1.bf16.msra.mxu0 %v5852_v34  ;;  %1915 = vmatpush1.bf16.msra.mxu1 %v5853_v35  ;;  %v5945_v34 = vld [vmem:[#allocation8 + $0x2ec] ss:$16 sps:$4 sm:$0xff]   ;;  %v5940_v35 = vld [vmem:[#allocation8 + $0x2e0] ss:$16 sps:$4 sm:$0xff]  }
  0xab   :  { %1752 = vmatprep.subr.bf16.mxu0 %v5854_v36  ;;  %1916 = vmatprep.subr.bf16.mxu1 %v5856_v37  ;;  %v5943_v36 = vld [vmem:[#allocation8 + $0x2e8] ss:$16 sps:$4 sm:$0xff]   ;;  %v5948_v37 = vld [vmem:[#allocation8 + $0x304] ss:$16 sps:$4 sm:$0xff]  }
  0xae   :  { %1753 = vmatpush1.bf16.msra.mxu0 %v5858_v38  ;;  %1917 = vmatpush1.bf16.msra.mxu1 %v5859_v39  ;;  %v5951_v38 = vld [vmem:[#allocation8 + $0x30c] ss:$16 sps:$4 sm:$0xff]   ;;  %v5946_v39 = vld [vmem:[#allocation8 + $0x300] ss:$16 sps:$4 sm:$0xff]  }
  0xaf   :  { %1754 = vmatprep.subr.bf16.mxu0 %v5860_v40  ;;  %1918 = vmatprep.subr.bf16.mxu1 %v5862_v41  ;;  %v5949_v40 = vld [vmem:[#allocation8 + $0x308] ss:$16 sps:$4 sm:$0xff]   ;;  %v5954_v41 = vld [vmem:[#allocation8 + $0x324] ss:$16 sps:$4 sm:$0xff]  }
  0xb2   :  { %1755 = vmatpush1.bf16.msra.mxu0 %v5864_v42  ;;  %1919 = vmatpush1.bf16.msra.mxu1 %v5865_v43  ;;  %v5957_v42 = vld [vmem:[#allocation8 + $0x32c] ss:$16 sps:$4 sm:$0xff]   ;;  %v5952_v43 = vld [vmem:[#allocation8 + $0x320] ss:$16 sps:$4 sm:$0xff]  }
  0xb3   :  { %1756 = vmatprep.subr.bf16.mxu0 %v5866_v44  ;;  %1920 = vmatprep.subr.bf16.mxu1 %v5868_v45  ;;  %v5955_v44 = vld [vmem:[#allocation8 + $0x328] ss:$16 sps:$4 sm:$0xff]   ;;  %v5960_v45 = vld [vmem:[#allocation8 + $0x344] ss:$16 sps:$4 sm:$0xff]  }
  0xb6   :  { %1757 = vmatpush1.bf16.msra.mxu0 %v5870_v47  ;;  %1921 = vmatpush1.bf16.msra.mxu1 %v5871_v49  ;;  %v5958_v47 = vld [vmem:[#allocation8 + $0x340] ss:$16 sps:$4 sm:$0xff]   ;;  %v5966_v49 = vld [vmem:[#allocation8 + $0x364] ss:$16 sps:$4 sm:$0xff]  }
  0xb7   :  { %1758 = vmatprep.subr.bf16.mxu0 %v5872_v50  ;;  %1922 = vmatprep.subr.bf16.mxu1 %v5874_v51  ;;  %v5969_v50 = vld [vmem:[#allocation8 + $0x36c] ss:$16 sps:$4 sm:$0xff]   ;;  %v5964_v51 = vld [vmem:[#allocation8 + $0x360] ss:$16 sps:$4 sm:$0xff]  }
  0xba   :  { %1759 = vmatpush1.bf16.msra.mxu0 %v5876_v52  ;;  %1923 = vmatpush1.bf16.msra.mxu1 %v5877_v53  ;;  %v5967_v52 = vld [vmem:[#allocation8 + $0x368] ss:$16 sps:$4 sm:$0xff]   ;;  %v5972_v53 = vld [vmem:[#allocation8 + $0x384] ss:$16 sps:$4 sm:$0xff]  }
  0xbb   :  { %1760 = vmatprep.subr.bf16.mxu0 %v5878_v54  ;;  %1924 = vmatprep.subr.bf16.mxu1 %v5880_v55  ;;  %v5975_v54 = vld [vmem:[#allocation8 + $0x38c] ss:$16 sps:$4 sm:$0xff]   ;;  %v5970_v55 = vld [vmem:[#allocation8 + $0x380] ss:$16 sps:$4 sm:$0xff]  }
  0xbe   :  { %1761 = vmatpush1.bf16.msra.mxu0 %v5882_v56  ;;  %1925 = vmatpush1.bf16.msra.mxu1 %v5883_v57  ;;  %v5973_v56 = vld [vmem:[#allocation8 + $0x388] ss:$16 sps:$4 sm:$0xff]   ;;  %v5978_v57 = vld [vmem:[#allocation8 + $0x3a4] ss:$16 sps:$4 sm:$0xff]  }
  0xbf   :  { %1762 = vmatprep.subr.bf16.mxu0 %v5884_v58  ;;  %1926 = vmatprep.subr.bf16.mxu1 %v5886_v59  ;;  %v5981_v58 = vld [vmem:[#allocation8 + $0x3ac] ss:$16 sps:$4 sm:$0xff]   ;;  %v5976_v59 = vld [vmem:[#allocation8 + $0x3a0] ss:$16 sps:$4 sm:$0xff]  }
  0xc2   :  { %1763 = vmatpush1.bf16.msra.mxu0 %v5888_v60  ;;  %1927 = vmatpush1.bf16.msra.mxu1 %v5889_v61  ;;  %v5979_v60 = vld [vmem:[#allocation8 + $0x3a8] ss:$16 sps:$4 sm:$0xff]   ;;  %v5984_v61 = vld [vmem:[#allocation8 + $0x3c4] ss:$16 sps:$4 sm:$0xff]  }
  0xc3   :  { %1764 = vmatprep.subr.bf16.mxu0 %v5890_v62  ;;  %1928 = vmatprep.subr.bf16.mxu1 %v5892_v63  ;;  %v5987_v62 = vld [vmem:[#allocation8 + $0x3cc] ss:$16 sps:$4 sm:$0xff]   ;;  %v5982_v63 = vld [vmem:[#allocation8 + $0x3c0] ss:$16 sps:$4 sm:$0xff]  }
  0xc6   :  { %1765 = vmatpush1.bf16.msra.mxu0 %v5894_v0  ;;  %1929 = vmatpush1.bf16.msra.mxu1 %v5895_v1  ;;  %v5985_v0 = vld [vmem:[#allocation8 + $0x3c8] ss:$16 sps:$4 sm:$0xff]   ;;  %v5990_v1 = vld [vmem:[#allocation8 + $0x3e4] ss:$16 sps:$4 sm:$0xff]  }
  0xc7   :  { %1775 = vmatprep.subr.bf16.mxu0 %v5900_v2  ;;  %1939 = vmatprep.subr.bf16.mxu1 %v5903_v3  ;;  %v5993_v2 = vld [vmem:[#allocation8 + $0x3ec] ss:$16 sps:$4 sm:$0xff]   ;;  %v5988_v3 = vld [vmem:[#allocation8 + $0x3e0] ss:$16 sps:$4 sm:$0xff]  }
  0xc9   :  { %1767 = vmatmul.mubr.bf16.vlgmr.msra.gmra.mrb[0].mxu0 %v5107_v4  ;;  %1931 = vmatmul.mubr.bf16.vlgmr.msra.gmra.mrb[0].mxu1 %v5107_v4  ;;  %v5991_v4 = vld [vmem:[#allocation8 + $0x3e8] ss:$16 sps:$4 sm:$0xff]  }
  0xca   :  { %1776 = vmatpush1.bf16.msra.mxu0 %v5898_v5  ;;  %1940 = vmatpush1.bf16.msra.mxu1 %v5901_v6  ;;  %v5998_v5 = vld [vmem:[#allocation8 + $0x404] ss:$16 sps:$4 sm:$0xff]   ;;  %v6001_v6 = vld [vmem:[#allocation8 + $0x40c] ss:$16 sps:$4 sm:$0xff]  }
  0xcb   :  { %1777 = vmatprep.subr.bf16.mxu0 %v5906_v7  ;;  %1941 = vmatprep.subr.bf16.mxu1 %v5909_v8  ;;  %v5109_v7 = vcombine.low %v6775_v29, %v6775_v29  ;;  %v5996_v8 = vld [vmem:[#allocation8 + $0x400] ss:$16 sps:$4 sm:$0xff]   ;;  %v6031_v29 = vld [vmem:[#allocation8 + $0x4ac] ss:$16 sps:$4 sm:$0xff]  }
  0xcc   :  { %1807 = vmatprep.mubr.bf16.mxu0 %v5110_v30  ;;  %1971 = vmatprep.mubr.bf16.mxu1 %v5110_v30  ;;  %v6026_v30 = vld [vmem:[#allocation8 + $0x4a0] ss:$16 sps:$4 sm:$0xff]  }
  0xce   :  { %1778 = vmatpush1.bf16.msra.mxu0 %v5904_v9  ;;  %1942 = vmatpush1.bf16.msra.mxu1 %v5907_v10  ;;  %v5999_v9 = vld [vmem:[#allocation8 + $0x408] ss:$16 sps:$4 sm:$0xff]   ;;  %v6004_v10 = vld [vmem:[#allocation8 + $0x424] ss:$16 sps:$4 sm:$0xff]  }
  0xcf   :  { %1779 = vmatprep.subr.bf16.mxu0 %v5912_v11  ;;  %1943 = vmatprep.subr.bf16.mxu1 %v5915_v12  ;;  %v6781_v11 = vld [vmem:[#allocation2 + $0x10] sm:$0xff] }
  0xd0   :  { %v6007_v12 = vld [vmem:[#allocation8 + $0x42c] ss:$16 sps:$4 sm:$0xff]  }
  0xd2   :  { %1780 = vmatpush1.bf16.msra.mxu0 %v5910_v13  ;;  %1944 = vmatpush1.bf16.msra.mxu1 %v5913_v14  ;;  %v5112_v13 = vcombine.high %v6781_v11, %v6781_v11  ;;  %v6002_v14 = vld [vmem:[#allocation8 + $0x420] ss:$16 sps:$4 sm:$0xff]  }
  0xd3   :  { %1781 = vmatprep.subr.bf16.mxu0 %v5918_v15  ;;  %1945 = vmatprep.subr.bf16.mxu1 %v5921_v16  ;;  %v6005_v15 = vld [vmem:[#allocation8 + $0x428] ss:$16 sps:$4 sm:$0xff]   ;;  %v6010_v16 = vld [vmem:[#allocation8 + $0x444] ss:$16 sps:$4 sm:$0xff]  }
  0xd6   :  { %1782 = vmatpush1.bf16.msra.mxu0 %v5916_v17  ;;  %1946 = vmatpush1.bf16.msra.mxu1 %v5919_v18  ;;  %v6013_v17 = vld [vmem:[#allocation8 + $0x44c] ss:$16 sps:$4 sm:$0xff]   ;;  %v6008_v18 = vld [vmem:[#allocation8 + $0x440] ss:$16 sps:$4 sm:$0xff]  }
  0xd7   :  { %1783 = vmatprep.subr.bf16.mxu0 %v5924_v19  ;;  %1947 = vmatprep.subr.bf16.mxu1 %v5927_v20  ;;  %v6011_v19 = vld [vmem:[#allocation8 + $0x448] ss:$16 sps:$4 sm:$0xff]   ;;  %v6016_v20 = vld [vmem:[#allocation8 + $0x464] ss:$16 sps:$4 sm:$0xff]  }
  0xda   :  { %1784 = vmatpush1.bf16.msra.mxu0 %v5922_v21  ;;  %1948 = vmatpush1.bf16.msra.mxu1 %v5925_v22  ;;  %v6019_v21 = vld [vmem:[#allocation8 + $0x46c] ss:$16 sps:$4 sm:$0xff]   ;;  %v6014_v22 = vld [vmem:[#allocation8 + $0x460] ss:$16 sps:$4 sm:$0xff]  }
  0xdb   :  { %1785 = vmatprep.subr.bf16.mxu0 %v5930_v23  ;;  %1949 = vmatprep.subr.bf16.mxu1 %v5933_v24  ;;  %v6017_v23 = vld [vmem:[#allocation8 + $0x468] ss:$16 sps:$4 sm:$0xff]   ;;  %v6022_v24 = vld [vmem:[#allocation8 + $0x484] ss:$16 sps:$4 sm:$0xff]  }
  0xde   :  { %1786 = vmatpush1.bf16.msra.mxu0 %v5928_v25  ;;  %1950 = vmatpush1.bf16.msra.mxu1 %v5931_v26  ;;  %v6025_v25 = vld [vmem:[#allocation8 + $0x48c] ss:$16 sps:$4 sm:$0xff]   ;;  %v6020_v26 = vld [vmem:[#allocation8 + $0x480] ss:$16 sps:$4 sm:$0xff]  }
  0xdf   :  { %1787 = vmatprep.subr.bf16.mxu0 %v5936_v27  ;;  %1951 = vmatprep.subr.bf16.mxu1 %v5939_v28  ;;  %v6023_v27 = vld [vmem:[#allocation8 + $0x488] ss:$16 sps:$4 sm:$0xff]   ;;  %v6028_v28 = vld [vmem:[#allocation8 + $0x4a4] ss:$16 sps:$4 sm:$0xff]  }
  0xe2   :  { %1788 = vmatpush1.bf16.msra.mxu0 %v5934_v31  ;;  %1952 = vmatpush1.bf16.msra.mxu1 %v5937_v32  ;;  %v6029_v31 = vld [vmem:[#allocation8 + $0x4a8] ss:$16 sps:$4 sm:$0xff]   ;;  %v6034_v32 = vld [vmem:[#allocation8 + $0x4c4] ss:$16 sps:$4 sm:$0xff]  }
  0xe3   :  { %1789 = vmatprep.subr.bf16.mxu0 %v5942_v33  ;;  %1953 = vmatprep.subr.bf16.mxu1 %v5945_v34  ;;  %v6037_v33 = vld [vmem:[#allocation8 + $0x4cc] ss:$16 sps:$4 sm:$0xff]   ;;  %v6032_v34 = vld [vmem:[#allocation8 + $0x4c0] ss:$16 sps:$4 sm:$0xff]  }
  0xe6   :  { %1790 = vmatpush1.bf16.msra.mxu0 %v5940_v35  ;;  %1954 = vmatpush1.bf16.msra.mxu1 %v5943_v36  ;;  %v6035_v35 = vld [vmem:[#allocation8 + $0x4c8] ss:$16 sps:$4 sm:$0xff]   ;;  %v6040_v36 = vld [vmem:[#allocation8 + $0x4e4] ss:$16 sps:$4 sm:$0xff]  }
  0xe7   :  { %1791 = vmatprep.subr.bf16.mxu0 %v5948_v37  ;;  %1955 = vmatprep.subr.bf16.mxu1 %v5951_v38  ;;  %v6043_v37 = vld [vmem:[#allocation8 + $0x4ec] ss:$16 sps:$4 sm:$0xff]   ;;  %v6038_v38 = vld [vmem:[#allocation8 + $0x4e0] ss:$16 sps:$4 sm:$0xff]  }
  0xea   :  { %1792 = vmatpush1.bf16.msra.mxu0 %v5946_v39  ;;  %1956 = vmatpush1.bf16.msra.mxu1 %v5949_v40  ;;  %v6041_v39 = vld [vmem:[#allocation8 + $0x4e8] ss:$16 sps:$4 sm:$0xff]   ;;  %v6046_v40 = vld [vmem:[#allocation8 + $0x504] ss:$16 sps:$4 sm:$0xff]  }
  0xeb   :  { %1793 = vmatprep.subr.bf16.mxu0 %v5954_v41  ;;  %1957 = vmatprep.subr.bf16.mxu1 %v5957_v42  ;;  %v6049_v41 = vld [vmem:[#allocation8 + $0x50c] ss:$16 sps:$4 sm:$0xff]   ;;  %v6044_v42 = vld [vmem:[#allocation8 + $0x500] ss:$16 sps:$4 sm:$0xff]  }
  0xee   :  { %1794 = vmatpush1.bf16.msra.mxu0 %v5952_v43  ;;  %1958 = vmatpush1.bf16.msra.mxu1 %v5955_v44  ;;  %v6047_v43 = vld [vmem:[#allocation8 + $0x508] ss:$16 sps:$4 sm:$0xff]   ;;  %v6052_v44 = vld [vmem:[#allocation8 + $0x524] ss:$16 sps:$4 sm:$0xff]  }
  0xef   :  { %1795 = vmatprep.subr.bf16.mxu0 %v5960_v45  ;;  %1959 = vmatprep.subr.bf16.mxu1 %v5963_v46  ;;  %v6055_v45 = vld [vmem:[#allocation8 + $0x52c] ss:$16 sps:$4 sm:$0xff]   ;;  %v6050_v46 = vld [vmem:[#allocation8 + $0x520] ss:$16 sps:$4 sm:$0xff]  }
  0xf2   :  { %1796 = vmatpush1.bf16.msra.mxu0 %v5958_v47  ;;  %1960 = vmatpush1.bf16.msra.mxu1 %v5961_v48  ;;  %v6053_v47 = vld [vmem:[#allocation8 + $0x528] ss:$16 sps:$4 sm:$0xff]   ;;  %v6058_v48 = vld [vmem:[#allocation8 + $0x544] ss:$16 sps:$4 sm:$0xff]  }
  0xf3   :  { %1797 = vmatprep.subr.bf16.mxu0 %v5966_v49  ;;  %1961 = vmatprep.subr.bf16.mxu1 %v5969_v50  ;;  %v6061_v49 = vld [vmem:[#allocation8 + $0x54c] ss:$16 sps:$4 sm:$0xff]   ;;  %v6056_v50 = vld [vmem:[#allocation8 + $0x540] ss:$16 sps:$4 sm:$0xff]  }
  0xf6   :  { %1798 = vmatpush1.bf16.msra.mxu0 %v5964_v51  ;;  %1962 = vmatpush1.bf16.msra.mxu1 %v5967_v52  ;;  %v6059_v51 = vld [vmem:[#allocation8 + $0x548] ss:$16 sps:$4 sm:$0xff]   ;;  %v6064_v52 = vld [vmem:[#allocation8 + $0x564] ss:$16 sps:$4 sm:$0xff]  }
  0xf7   :  { %1799 = vmatprep.subr.bf16.mxu0 %v5972_v53  ;;  %1963 = vmatprep.subr.bf16.mxu1 %v5975_v54  ;;  %v6067_v53 = vld [vmem:[#allocation8 + $0x56c] ss:$16 sps:$4 sm:$0xff]   ;;  %v6062_v54 = vld [vmem:[#allocation8 + $0x560] ss:$16 sps:$4 sm:$0xff]  }
  0xfa   :  { %1800 = vmatpush1.bf16.msra.mxu0 %v5970_v55  ;;  %1964 = vmatpush1.bf16.msra.mxu1 %v5973_v56  ;;  %v6065_v55 = vld [vmem:[#allocation8 + $0x568] ss:$16 sps:$4 sm:$0xff]   ;;  %v6070_v56 = vld [vmem:[#allocation8 + $0x584] ss:$16 sps:$4 sm:$0xff]  }
  0xfb   :  { %1801 = vmatprep.subr.bf16.mxu0 %v5978_v57  ;;  %1965 = vmatprep.subr.bf16.mxu1 %v5981_v58  ;;  %v6073_v57 = vld [vmem:[#allocation8 + $0x58c] ss:$16 sps:$4 sm:$0xff]   ;;  %v6068_v58 = vld [vmem:[#allocation8 + $0x580] ss:$16 sps:$4 sm:$0xff]  }
  0xfe   :  { %1802 = vmatpush1.bf16.msra.mxu0 %v5976_v59  ;;  %1966 = vmatpush1.bf16.msra.mxu1 %v5979_v60  ;;  %v6071_v59 = vld [vmem:[#allocation8 + $0x588] ss:$16 sps:$4 sm:$0xff]   ;;  %v6076_v60 = vld [vmem:[#allocation8 + $0x5a4] ss:$16 sps:$4 sm:$0xff]  }
  0xff   :  { %1803 = vmatprep.subr.bf16.mxu0 %v5984_v61  ;;  %1967 = vmatprep.subr.bf16.mxu1 %v5987_v62  ;;  %v6079_v61 = vld [vmem:[#allocation8 + $0x5ac] ss:$16 sps:$4 sm:$0xff]   ;;  %v6074_v62 = vld [vmem:[#allocation8 + $0x5a0] ss:$16 sps:$4 sm:$0xff]  }
 0x102   :  { %1804 = vmatpush1.bf16.msra.mxu0 %v5982_v63  ;;  %1968 = vmatpush1.bf16.msra.mxu1 %v5985_v0  ;;  %v6077_v63 = vld [vmem:[#allocation8 + $0x5a8] ss:$16 sps:$4 sm:$0xff]   ;;  %v6082_v0 = vld [vmem:[#allocation8 + $0x5c4] ss:$16 sps:$4 sm:$0xff]  }
 0x103   :  { %1805 = vmatprep.subr.bf16.mxu0 %v5990_v1  ;;  %1969 = vmatprep.subr.bf16.mxu1 %v5993_v2  ;;  %v6085_v1 = vld [vmem:[#allocation8 + $0x5cc] ss:$16 sps:$4 sm:$0xff]   ;;  %v6080_v2 = vld [vmem:[#allocation8 + $0x5c0] ss:$16 sps:$4 sm:$0xff]  }
 0x106   :  { %1806 = vmatpush1.bf16.msra.mxu0 %v5988_v3  ;;  %1970 = vmatpush1.bf16.msra.mxu1 %v5991_v4  ;;  %v6083_v3 = vld [vmem:[#allocation8 + $0x5c8] ss:$16 sps:$4 sm:$0xff]   ;;  %v6088_v4 = vld [vmem:[#allocation8 + $0x5e4] ss:$16 sps:$4 sm:$0xff]  }
 0x107   :  { %1816 = vmatprep.subr.bf16.mxu0 %v5998_v5  ;;  %1980 = vmatprep.subr.bf16.mxu1 %v6001_v6  ;;  %v6091_v5 = vld [vmem:[#allocation8 + $0x5ec] ss:$16 sps:$4 sm:$0xff]   ;;  %v6086_v6 = vld [vmem:[#allocation8 + $0x5e0] ss:$16 sps:$4 sm:$0xff]  }
 0x109   :  { %1808 = vmatmul.mubr.bf16.vlgmr.msra.gmra.mrb[0].mxu0 %v5109_v7  ;;  %1972 = vmatmul.mubr.bf16.vlgmr.msra.gmra.mrb[0].mxu1 %v5109_v7  ;;  %v6089_v7 = vld [vmem:[#allocation8 + $0x5e8] ss:$16 sps:$4 sm:$0xff]  }
 0x10a   :  { %1817 = vmatpush1.bf16.msra.mxu0 %v5996_v8  ;;  %1981 = vmatpush1.bf16.msra.mxu1 %v5999_v9  ;;  %v6096_v8 = vld [vmem:[#allocation8 + $0x604] ss:$16 sps:$4 sm:$0xff]   ;;  %v6099_v9 = vld [vmem:[#allocation8 + $0x60c] ss:$16 sps:$4 sm:$0xff]  }
 0x10b   :  { %1818 = vmatprep.subr.bf16.mxu0 %v6004_v10  ;;  %1982 = vmatprep.subr.bf16.mxu1 %v6007_v12  ;;  %v6785_v10 = vld [vmem:[#allocation2 + $0x18] sm:$0xff] }
 0x10c   :  { %1848 = vmatprep.mubr.bf16.mxu0 %v5112_v13  ;;  %2012 = vmatprep.mubr.bf16.mxu1 %v5112_v13  ;;  %v6094_v12 = vld [vmem:[#allocation8 + $0x600] ss:$16 sps:$4 sm:$0xff]   ;;  %v6097_v13 = vld [vmem:[#allocation8 + $0x608] ss:$16 sps:$4 sm:$0xff]  }
 0x10e   :  { %1819 = vmatpush1.bf16.msra.mxu0 %v6002_v14  ;;  %1983 = vmatpush1.bf16.msra.mxu1 %v6005_v15  ;;  %v5111_v14 = vcombine.low %v6781_v11, %v6781_v11  ;;  %v6102_v15 = vld [vmem:[#allocation8 + $0x624] ss:$16 sps:$4 sm:$0xff]   ;;  %v6106_v11 = vld [vmem:[#allocation8 + $0x640] ss:$16 sps:$4 sm:$0xff]  }
 0x10f   :  { %1820 = vmatprep.subr.bf16.mxu0 %v6010_v16  ;;  %1984 = vmatprep.subr.bf16.mxu1 %v6013_v17  ;;  %v6105_v16 = vld [vmem:[#allocation8 + $0x62c] ss:$16 sps:$4 sm:$0xff]   ;;  %v6100_v17 = vld [vmem:[#allocation8 + $0x620] ss:$16 sps:$4 sm:$0xff]  }
 0x112   :  { %1821 = vmatpush1.bf16.msra.mxu0 %v6008_v18  ;;  %1985 = vmatpush1.bf16.msra.mxu1 %v6011_v19  ;;  %v6103_v18 = vld [vmem:[#allocation8 + $0x628] ss:$16 sps:$4 sm:$0xff]   ;;  %v5114_v19 = vcombine.high %v6785_v10, %v6785_v10 }
 0x113   :  { %1822 = vmatprep.subr.bf16.mxu0 %v6016_v20  ;;  %1986 = vmatprep.subr.bf16.mxu1 %v6019_v21  ;;  %v6108_v20 = vld [vmem:[#allocation8 + $0x644] ss:$16 sps:$4 sm:$0xff]   ;;  %v6111_v21 = vld [vmem:[#allocation8 + $0x64c] ss:$16 sps:$4 sm:$0xff]  }
 0x116   :  { %1823 = vmatpush1.bf16.msra.mxu0 %v6014_v22  ;;  %1987 = vmatpush1.bf16.msra.mxu1 %v6017_v23  ;;  %v6109_v22 = vld [vmem:[#allocation8 + $0x648] ss:$16 sps:$4 sm:$0xff]   ;;  %v6114_v23 = vld [vmem:[#allocation8 + $0x664] ss:$16 sps:$4 sm:$0xff]  }
 0x117   :  { %1824 = vmatprep.subr.bf16.mxu0 %v6022_v24  ;;  %1988 = vmatprep.subr.bf16.mxu1 %v6025_v25  ;;  %v6117_v24 = vld [vmem:[#allocation8 + $0x66c] ss:$16 sps:$4 sm:$0xff]   ;;  %v6112_v25 = vld [vmem:[#allocation8 + $0x660] ss:$16 sps:$4 sm:$0xff]  }
 0x11a   :  { %1825 = vmatpush1.bf16.msra.mxu0 %v6020_v26  ;;  %1989 = vmatpush1.bf16.msra.mxu1 %v6023_v27  ;;  %v6115_v26 = vld [vmem:[#allocation8 + $0x668] ss:$16 sps:$4 sm:$0xff]   ;;  %v6120_v27 = vld [vmem:[#allocation8 + $0x684] ss:$16 sps:$4 sm:$0xff]  }
 0x11b   :  { %1826 = vmatprep.subr.bf16.mxu0 %v6028_v28  ;;  %1990 = vmatprep.subr.bf16.mxu1 %v6031_v29  ;;  %v6123_v28 = vld [vmem:[#allocation8 + $0x68c] ss:$16 sps:$4 sm:$0xff]   ;;  %v6118_v29 = vld [vmem:[#allocation8 + $0x680] ss:$16 sps:$4 sm:$0xff]  }
 0x11e   :  { %1827 = vmatpush1.bf16.msra.mxu0 %v6026_v30  ;;  %1991 = vmatpush1.bf16.msra.mxu1 %v6029_v31  ;;  %v6121_v30 = vld [vmem:[#allocation8 + $0x688] ss:$16 sps:$4 sm:$0xff]   ;;  %v6126_v31 = vld [vmem:[#allocation8 + $0x6a4] ss:$16 sps:$4 sm:$0xff]  }
 0x11f   :  { %1828 = vmatprep.subr.bf16.mxu0 %v6034_v32  ;;  %1992 = vmatprep.subr.bf16.mxu1 %v6037_v33  ;;  %v6129_v32 = vld [vmem:[#allocation8 + $0x6ac] ss:$16 sps:$4 sm:$0xff]   ;;  %v6124_v33 = vld [vmem:[#allocation8 + $0x6a0] ss:$16 sps:$4 sm:$0xff]  }
 0x122   :  { %1829 = vmatpush1.bf16.msra.mxu0 %v6032_v34  ;;  %1993 = vmatpush1.bf16.msra.mxu1 %v6035_v35  ;;  %v6127_v34 = vld [vmem:[#allocation8 + $0x6a8] ss:$16 sps:$4 sm:$0xff]   ;;  %v6132_v35 = vld [vmem:[#allocation8 + $0x6c4] ss:$16 sps:$4 sm:$0xff]  }
 0x123   :  { %1830 = vmatprep.subr.bf16.mxu0 %v6040_v36  ;;  %1994 = vmatprep.subr.bf16.mxu1 %v6043_v37  ;;  %v6135_v36 = vld [vmem:[#allocation8 + $0x6cc] ss:$16 sps:$4 sm:$0xff]   ;;  %v6130_v37 = vld [vmem:[#allocation8 + $0x6c0] ss:$16 sps:$4 sm:$0xff]  }
 0x126   :  { %1831 = vmatpush1.bf16.msra.mxu0 %v6038_v38  ;;  %1995 = vmatpush1.bf16.msra.mxu1 %v6041_v39  ;;  %v6133_v38 = vld [vmem:[#allocation8 + $0x6c8] ss:$16 sps:$4 sm:$0xff]   ;;  %v6138_v39 = vld [vmem:[#allocation8 + $0x6e4] ss:$16 sps:$4 sm:$0xff]  }
 0x127   :  { %1832 = vmatprep.subr.bf16.mxu0 %v6046_v40  ;;  %1996 = vmatprep.subr.bf16.mxu1 %v6049_v41  ;;  %v6141_v40 = vld [vmem:[#allocation8 + $0x6ec] ss:$16 sps:$4 sm:$0xff]   ;;  %v6136_v41 = vld [vmem:[#allocation8 + $0x6e0] ss:$16 sps:$4 sm:$0xff]  }
 0x12a   :  { %1833 = vmatpush1.bf16.msra.mxu0 %v6044_v42  ;;  %1997 = vmatpush1.bf16.msra.mxu1 %v6047_v43  ;;  %v6139_v42 = vld [vmem:[#allocation8 + $0x6e8] ss:$16 sps:$4 sm:$0xff]   ;;  %v6144_v43 = vld [vmem:[#allocation8 + $0x704] ss:$16 sps:$4 sm:$0xff]  }
 0x12b   :  { %1834 = vmatprep.subr.bf16.mxu0 %v6052_v44  ;;  %1998 = vmatprep.subr.bf16.mxu1 %v6055_v45  ;;  %v6147_v44 = vld [vmem:[#allocation8 + $0x70c] ss:$16 sps:$4 sm:$0xff]   ;;  %v6142_v45 = vld [vmem:[#allocation8 + $0x700] ss:$16 sps:$4 sm:$0xff]  }
 0x12e   :  { %1835 = vmatpush1.bf16.msra.mxu0 %v6050_v46  ;;  %1999 = vmatpush1.bf16.msra.mxu1 %v6053_v47  ;;  %v6145_v46 = vld [vmem:[#allocation8 + $0x708] ss:$16 sps:$4 sm:$0xff]   ;;  %v6150_v47 = vld [vmem:[#allocation8 + $0x724] ss:$16 sps:$4 sm:$0xff]  }
 0x12f   :  { %1836 = vmatprep.subr.bf16.mxu0 %v6058_v48  ;;  %2000 = vmatprep.subr.bf16.mxu1 %v6061_v49  ;;  %v6153_v48 = vld [vmem:[#allocation8 + $0x72c] ss:$16 sps:$4 sm:$0xff]   ;;  %v6148_v49 = vld [vmem:[#allocation8 + $0x720] ss:$16 sps:$4 sm:$0xff]  }
 0x132   :  { %1837 = vmatpush1.bf16.msra.mxu0 %v6056_v50  ;;  %2001 = vmatpush1.bf16.msra.mxu1 %v6059_v51  ;;  %v6151_v50 = vld [vmem:[#allocation8 + $0x728] ss:$16 sps:$4 sm:$0xff]   ;;  %v6156_v51 = vld [vmem:[#allocation8 + $0x744] ss:$16 sps:$4 sm:$0xff]  }
 0x133   :  { %1838 = vmatprep.subr.bf16.mxu0 %v6064_v52  ;;  %2002 = vmatprep.subr.bf16.mxu1 %v6067_v53  ;;  %v6159_v52 = vld [vmem:[#allocation8 + $0x74c] ss:$16 sps:$4 sm:$0xff]   ;;  %v6154_v53 = vld [vmem:[#allocation8 + $0x740] ss:$16 sps:$4 sm:$0xff]  }
 0x136   :  { %1839 = vmatpush1.bf16.msra.mxu0 %v6062_v54  ;;  %2003 = vmatpush1.bf16.msra.mxu1 %v6065_v55  ;;  %v6157_v54 = vld [vmem:[#allocation8 + $0x748] ss:$16 sps:$4 sm:$0xff]   ;;  %v6162_v55 = vld [vmem:[#allocation8 + $0x764] ss:$16 sps:$4 sm:$0xff]  }
 0x137   :  { %1840 = vmatprep.subr.bf16.mxu0 %v6070_v56  ;;  %2004 = vmatprep.subr.bf16.mxu1 %v6073_v57  ;;  %v6165_v56 = vld [vmem:[#allocation8 + $0x76c] ss:$16 sps:$4 sm:$0xff]   ;;  %v6160_v57 = vld [vmem:[#allocation8 + $0x760] ss:$16 sps:$4 sm:$0xff]  }
 0x13a   :  { %1841 = vmatpush1.bf16.msra.mxu0 %v6068_v58  ;;  %2005 = vmatpush1.bf16.msra.mxu1 %v6071_v59  ;;  %v6163_v58 = vld [vmem:[#allocation8 + $0x768] ss:$16 sps:$4 sm:$0xff]   ;;  %v6168_v59 = vld [vmem:[#allocation8 + $0x784] ss:$16 sps:$4 sm:$0xff]  }
 0x13b   :  { %1842 = vmatprep.subr.bf16.mxu0 %v6076_v60  ;;  %2006 = vmatprep.subr.bf16.mxu1 %v6079_v61  ;;  %v6171_v60 = vld [vmem:[#allocation8 + $0x78c] ss:$16 sps:$4 sm:$0xff]   ;;  %v6166_v61 = vld [vmem:[#allocation8 + $0x780] ss:$16 sps:$4 sm:$0xff]  }
 0x13e   :  { %1843 = vmatpush1.bf16.msra.mxu0 %v6074_v62  ;;  %2007 = vmatpush1.bf16.msra.mxu1 %v6077_v63  ;;  %v6169_v62 = vld [vmem:[#allocation8 + $0x788] ss:$16 sps:$4 sm:$0xff]   ;;  %v6174_v63 = vld [vmem:[#allocation8 + $0x7a4] ss:$16 sps:$4 sm:$0xff]  }
 0x13f   :  { %1844 = vmatprep.subr.bf16.mxu0 %v6082_v0  ;;  %2008 = vmatprep.subr.bf16.mxu1 %v6085_v1  ;;  %v6177_v0 = vld [vmem:[#allocation8 + $0x7ac] ss:$16 sps:$4 sm:$0xff]   ;;  %v6172_v1 = vld [vmem:[#allocation8 + $0x7a0] ss:$16 sps:$4 sm:$0xff]  }
 0x142   :  { %1845 = vmatpush1.bf16.msra.mxu0 %v6080_v2  ;;  %2009 = vmatpush1.bf16.msra.mxu1 %v6083_v3  ;;  %v6175_v2 = vld [vmem:[#allocation8 + $0x7a8] ss:$16 sps:$4 sm:$0xff]   ;;  %v6180_v3 = vld [vmem:[#allocation8 + $0x7c4] ss:$16 sps:$4 sm:$0xff]  }
 0x143   :  { %1846 = vmatprep.subr.bf16.mxu0 %v6088_v4  ;;  %2010 = vmatprep.subr.bf16.mxu1 %v6091_v5  ;;  %v6183_v4 = vld [vmem:[#allocation8 + $0x7cc] ss:$16 sps:$4 sm:$0xff]   ;;  %v6178_v5 = vld [vmem:[#allocation8 + $0x7c0] ss:$16 sps:$4 sm:$0xff]  }
 0x146   :  { %1847 = vmatpush1.bf16.msra.mxu0 %v6086_v6  ;;  %2011 = vmatpush1.bf16.msra.mxu1 %v6089_v7  ;;  %v6181_v6 = vld [vmem:[#allocation8 + $0x7c8] ss:$16 sps:$4 sm:$0xff]   ;;  %v6186_v7 = vld [vmem:[#allocation8 + $0x7e4] ss:$16 sps:$4 sm:$0xff]  }
 0x147   :  { %1857 = vmatprep.subr.bf16.mxu0 %v6096_v8  ;;  %2021 = vmatprep.subr.bf16.mxu1 %v6099_v9  ;;  %v6189_v8 = vld [vmem:[#allocation8 + $0x7ec] ss:$16 sps:$4 sm:$0xff]   ;;  %v6184_v9 = vld [vmem:[#allocation8 + $0x7e0] ss:$16 sps:$4 sm:$0xff]  }
 0x149   :  { %1849 = vmatmul.mubr.bf16.vlgmr.msra.gmra.mrb[0].mxu0 %v5111_v14  ;;  %2013 = vmatmul.mubr.bf16.vlgmr.msra.gmra.mrb[0].mxu1 %v5111_v14  ;;  %v5113_v14 = vcombine.low %v6785_v10, %v6785_v10  ;;  %v6204_v10 = vld [vmem:[#allocation11 + $0x40] ss:$8 sps:$4 sm:$0xff]  }
 0x14a   :  { %1858 = vmatpush1.bf16.msra.mxu0 %v6094_v12  ;;  %2022 = vmatpush1.bf16.msra.mxu1 %v6097_v13  ;;  %v6187_v12 = vld [vmem:[#allocation8 + $0x7e8] ss:$16 sps:$4 sm:$0xff]  }
 0x14b   :  { %1859 = vmatprep.subr.bf16.mxu0 %v6102_v15  ;;  %2023 = vmatprep.subr.bf16.mxu1 %v6105_v16  ;;  %v6194_v13 = vld [vmem:[#allocation11 + $0x4] ss:$8 sps:$4 sm:$0xff]   ;;  %v6192_v15 = vld [vmem:[#allocation11] ss:$8 sps:$4 sm:$0xff]   ;;  %v6197_v16 = vld [vmem:[#allocation11 + $0x14] ss:$8 sps:$4 sm:$0xff]  }
 0x14c   :  { %1889 = vmatprep.mubr.bf16.mxu0 %v5114_v19  ;;  %2053 = vmatprep.mubr.bf16.mxu1 %v5114_v19  ;;  %v6198_v19 = vld [vmem:[#allocation11 + $0x20] ss:$8 sps:$4 sm:$0xff]  }
 0x14e   :  { %1860 = vmatpush1.bf16.msra.mxu0 %v6100_v17  ;;  %2024 = vmatpush1.bf16.msra.mxu1 %v6103_v18  ;;  %v6195_v17 = vld [vmem:[#allocation11 + $0x10] ss:$8 sps:$4 sm:$0xff]   ;;  %v6200_v18 = vld [vmem:[#allocation11 + $0x24] ss:$8 sps:$4 sm:$0xff]  }
 0x14f   :  { %1861 = vmatprep.subr.bf16.mxu0 %v6108_v20  ;;  %2025 = vmatprep.subr.bf16.mxu1 %v6111_v21  ;;  %v6203_v20 = vld [vmem:[#allocation11 + $0x34] ss:$8 sps:$4 sm:$0xff]   ;;  %v6201_v21 = vld [vmem:[#allocation11 + $0x30] ss:$8 sps:$4 sm:$0xff]  }
 0x152   :  { %1862 = vmatpush1.bf16.msra.mxu0 %v6106_v11  ;;  %2026 = vmatpush1.bf16.msra.mxu1 %v6109_v22  ;;  %v6206_v11 = vld [vmem:[#allocation11 + $0x44] ss:$8 sps:$4 sm:$0xff]   ;;  %v6209_v22 = vld [vmem:[#allocation11 + $0x54] ss:$8 sps:$4 sm:$0xff]  }
 0x153   :  { %1863 = vmatprep.subr.bf16.mxu0 %v6114_v23  ;;  %2027 = vmatprep.subr.bf16.mxu1 %v6117_v24  ;;  %v6207_v23 = vld [vmem:[#allocation11 + $0x50] ss:$8 sps:$4 sm:$0xff]   ;;  %v6212_v24 = vld [vmem:[#allocation11 + $0x64] ss:$8 sps:$4 sm:$0xff]  }
 0x156   :  { %1864 = vmatpush1.bf16.msra.mxu0 %v6112_v25  ;;  %2028 = vmatpush1.bf16.msra.mxu1 %v6115_v26  ;;  %v6210_v25 = vld [vmem:[#allocation11 + $0x60] ss:$8 sps:$4 sm:$0xff]   ;;  %v6215_v26 = vld [vmem:[#allocation11 + $0x74] ss:$8 sps:$4 sm:$0xff]  }
 0x157   :  { %1865 = vmatprep.subr.bf16.mxu0 %v6120_v27  ;;  %2029 = vmatprep.subr.bf16.mxu1 %v6123_v28  ;;  %v6213_v27 = vld [vmem:[#allocation11 + $0x70] ss:$8 sps:$4 sm:$0xff]   ;;  %v6218_v28 = vld [vmem:[#allocation11 + $0x84] ss:$8 sps:$4 sm:$0xff]  }
 0x15a   :  { %1866 = vmatpush1.bf16.msra.mxu0 %v6118_v29  ;;  %2030 = vmatpush1.bf16.msra.mxu1 %v6121_v30  ;;  %v6216_v29 = vld [vmem:[#allocation11 + $0x80] ss:$8 sps:$4 sm:$0xff]   ;;  %v6221_v30 = vld [vmem:[#allocation11 + $0x94] ss:$8 sps:$4 sm:$0xff]  }
 0x15b   :  { %1867 = vmatprep.subr.bf16.mxu0 %v6126_v31  ;;  %2031 = vmatprep.subr.bf16.mxu1 %v6129_v32  ;;  %v6219_v31 = vld [vmem:[#allocation11 + $0x90] ss:$8 sps:$4 sm:$0xff]   ;;  %v6224_v32 = vld [vmem:[#allocation11 + $0xa4] ss:$8 sps:$4 sm:$0xff]  }
 0x15e   :  { %1868 = vmatpush1.bf16.msra.mxu0 %v6124_v33  ;;  %2032 = vmatpush1.bf16.msra.mxu1 %v6127_v34  ;;  %v6222_v33 = vld [vmem:[#allocation11 + $0xa0] ss:$8 sps:$4 sm:$0xff]   ;;  %v6227_v34 = vld [vmem:[#allocation11 + $0xb4] ss:$8 sps:$4 sm:$0xff]  }
 0x15f   :  { %1869 = vmatprep.subr.bf16.mxu0 %v6132_v35  ;;  %2033 = vmatprep.subr.bf16.mxu1 %v6135_v36  ;;  %v6225_v35 = vld [vmem:[#allocation11 + $0xb0] ss:$8 sps:$4 sm:$0xff]   ;;  %v6230_v36 = vld [vmem:[#allocation11 + $0xc4] ss:$8 sps:$4 sm:$0xff]  }
 0x162   :  { %1870 = vmatpush1.bf16.msra.mxu0 %v6130_v37  ;;  %2034 = vmatpush1.bf16.msra.mxu1 %v6133_v38  ;;  %v6228_v37 = vld [vmem:[#allocation11 + $0xc0] ss:$8 sps:$4 sm:$0xff]   ;;  %v6233_v38 = vld [vmem:[#allocation11 + $0xd4] ss:$8 sps:$4 sm:$0xff]  }
 0x163   :  { %1871 = vmatprep.subr.bf16.mxu0 %v6138_v39  ;;  %2035 = vmatprep.subr.bf16.mxu1 %v6141_v40  ;;  %v6231_v39 = vld [vmem:[#allocation11 + $0xd0] ss:$8 sps:$4 sm:$0xff]   ;;  %v6236_v40 = vld [vmem:[#allocation11 + $0xe4] ss:$8 sps:$4 sm:$0xff]  }
 0x166   :  { %1872 = vmatpush1.bf16.msra.mxu0 %v6136_v41  ;;  %2036 = vmatpush1.bf16.msra.mxu1 %v6139_v42  ;;  %v6234_v41 = vld [vmem:[#allocation11 + $0xe0] ss:$8 sps:$4 sm:$0xff]   ;;  %v6239_v42 = vld [vmem:[#allocation11 + $0xf4] ss:$8 sps:$4 sm:$0xff]  }
 0x167   :  { %1873 = vmatprep.subr.bf16.mxu0 %v6144_v43  ;;  %2037 = vmatprep.subr.bf16.mxu1 %v6147_v44  ;;  %v6237_v43 = vld [vmem:[#allocation11 + $0xf0] ss:$8 sps:$4 sm:$0xff]   ;;  %v6242_v44 = vld [vmem:[#allocation11 + $0x104] ss:$8 sps:$4 sm:$0xff]  }
 0x16a   :  { %1874 = vmatpush1.bf16.msra.mxu0 %v6142_v45  ;;  %2038 = vmatpush1.bf16.msra.mxu1 %v6145_v46  ;;  %v6288_v45 = vld [vmem:[#allocation12] ss:$16 sps:$4 sm:$0xff]   ;;  %v6290_v46 = vld [vmem:[#allocation12 + $0x4] ss:$16 sps:$4 sm:$0xff]  }
 0x16b   :  { %1875 = vmatprep.subr.bf16.mxu0 %v6150_v47  ;;  %2039 = vmatprep.subr.bf16.mxu1 %v6153_v48  ;;  %v6293_v47 = vld [vmem:[#allocation12 + $0x24] ss:$16 sps:$4 sm:$0xff]   ;;  %v406_v48 = vlaneseq }
 0x16e   :  { %1876 = vmatpush1.bf16.msra.mxu0 %v6148_v49  ;;  %2040 = vmatpush1.bf16.msra.mxu1 %v6151_v50  ;;  %v6291_v49 = vld [vmem:[#allocation12 + $0x20] ss:$16 sps:$4 sm:$0xff]   ;;  %v6793_v50 = vshrl.u32 %v406_v48, 7 }
 0x16f   :  { %1877 = vmatprep.subr.bf16.mxu0 %v6156_v51  ;;  %2041 = vmatprep.subr.bf16.mxu1 %v6159_v52 }
 0x170   :  { %v6796_v51 = vsub.s32 0, %v6793_v50  ;;  %v6799_v52 = vsub.s32 2, %v6793_v50 }
 0x172   :  { %1878 = vmatpush1.bf16.msra.mxu0 %v6154_v53  ;;  %2042 = vmatpush1.bf16.msra.mxu1 %v6157_v54  ;;  %v404_v53 = vld [vmem:[%s7017_s3] sm:$0xf]  ;;  %v6805_v54 = vsub.s32 1, %v6793_v50 }
 0x173   :  { %1879 = vmatprep.subr.bf16.mxu0 %v6162_v55  ;;  %2043 = vmatprep.subr.bf16.mxu1 %v6165_v56  ;;  %v6808_v55 = vsub.s32 3, %v6793_v50  ;;  %v409_v56 = vrot.slane %v404_v53, %v6796_v51 }
 0x176   :  { %1880 = vmatpush1.bf16.msra.mxu0 %v6160_v57  ;;  %2044 = vmatpush1.bf16.msra.mxu1 %v6163_v58  ;;  %v417_v57 = vrot.slane %v404_v53, %v6799_v52  ;;  %v413_v58 = vrot.slane %v404_v53, %v6805_v54 }
 0x177   :  { %1881 = vmatprep.subr.bf16.mxu0 %v6168_v59  ;;  %2045 = vmatprep.subr.bf16.mxu1 %v6171_v60  ;;  %v421_v59 = vrot.slane %v404_v53, %v6808_v55 }
 0x17a   :  { %1882 = vmatpush1.bf16.msra.mxu0 %v6166_v61  ;;  %2046 = vmatpush1.bf16.msra.mxu1 %v6169_v62 }
 0x17b   :  { %1883 = vmatprep.subr.bf16.mxu0 %v6174_v63  ;;  %2047 = vmatprep.subr.bf16.mxu1 %v6177_v0 }
 0x17e   :  { %1884 = vmatpush1.bf16.msra.mxu0 %v6172_v1  ;;  %2048 = vmatpush1.bf16.msra.mxu1 %v6175_v2 }
 0x17f   :  { %1885 = vmatprep.subr.bf16.mxu0 %v6180_v3  ;;  %2049 = vmatprep.subr.bf16.mxu1 %v6183_v4 }
 0x182   :  { %1886 = vmatpush1.bf16.msra.mxu0 %v6178_v5  ;;  %2050 = vmatpush1.bf16.msra.mxu1 %v6181_v6 }
 0x183   :  { %1887 = vmatprep.subr.bf16.mxu0 %v6186_v7  ;;  %2051 = vmatprep.subr.bf16.mxu1 %v6189_v8 }
 0x186   :  { %1888 = vmatpush1.bf16.msra.mxu0 %v6184_v9  ;;  %2052 = vmatpush1.bf16.msra.mxu1 %v6187_v12 }
 0x187   :  { %2602 = vmatprep.subr.bf16.mxu0 %v6194_v13  ;;  %2922 = vmatprep.subr.bf16.mxu1 %v6290_v46 }
 0x189   :  { %1890 = vmatmul.mubr.bf16.vlgmr.msra.gmra.mrb[0].mxu0 %v5113_v14  ;;  %2054 = vmatmul.mubr.bf16.vlgmr.msra.gmra.mrb[0].mxu1 %v5113_v14 }
 0x18a   :  { %2603 = vmatpush1.bf16.msra.mxu0 %v6192_v15  ;;  %2923 = vmatpush1.bf16.msra.mxu1 %v6288_v45 }
 0x18b   :  { %2604 = vmatprep.subr.bf16.mxu0 %v6197_v16  ;;  %2924 = vmatprep.subr.bf16.mxu1 %v6293_v47 }
 0x18e   :  { %2605 = vmatpush1.bf16.msra.mxu0 %v6195_v17  ;;  %2925 = vmatpush1.bf16.msra.mxu1 %v6291_v49 }
 0x18f   :  { %2606 = vmatprep.subr.bf16.mxu0 %v6200_v18 }
 0x192   :  { %2607 = vmatpush1.bf16.msra.mxu0 %v6198_v19 }
 0x193   :  { %2608 = vmatprep.subr.bf16.mxu0 %v6203_v20 }
 0x196   :  { %2609 = vmatpush1.bf16.msra.mxu0 %v6201_v21 }
 0x197   :  { %2610 = vmatprep.subr.bf16.mxu0 %v6206_v11 }
 0x19a   :  { %2611 = vmatpush1.bf16.msra.mxu0 %v6204_v10 }
 0x19b   :  { %2612 = vmatprep.subr.bf16.mxu0 %v6209_v22 }
 0x19e   :  { %2613 = vmatpush1.bf16.msra.mxu0 %v6207_v23 }
 0x19f   :  { %2614 = vmatprep.subr.bf16.mxu0 %v6212_v24 }
 0x1a2   :  { %2615 = vmatpush1.bf16.msra.mxu0 %v6210_v25 }
 0x1a3   :  { %2616 = vmatprep.subr.bf16.mxu0 %v6215_v26 }
 0x1a6   :  { %2617 = vmatpush1.bf16.msra.mxu0 %v6213_v27 }
 0x1a7   :  { %2618 = vmatprep.subr.bf16.mxu0 %v6218_v28 }
 0x1aa   :  { %2619 = vmatpush1.bf16.msra.mxu0 %v6216_v29 }
 0x1ab   :  { %2620 = vmatprep.subr.bf16.mxu0 %v6221_v30 }
 0x1ae   :  { %2621 = vmatpush1.bf16.msra.mxu0 %v6219_v31 }
 0x1af   :  { %2622 = vmatprep.subr.bf16.mxu0 %v6224_v32 }
 0x1b2   :  { %2623 = vmatpush1.bf16.msra.mxu0 %v6222_v33 }
 0x1b3   :  { %2624 = vmatprep.subr.bf16.mxu0 %v6227_v34 }
 0x1b6   :  { %2625 = vmatpush1.bf16.msra.mxu0 %v6225_v35 }
 0x1b7   :  { %2626 = vmatprep.subr.bf16.mxu0 %v6230_v36 }
 0x1ba   :  { %2627 = vmatpush1.bf16.msra.mxu0 %v6228_v37 }
 0x1bb   :  { %2628 = vmatprep.subr.bf16.mxu0 %v6233_v38 }
 0x1be   :  { %2629 = vmatpush1.bf16.msra.mxu0 %v6231_v39 }
 0x1bf   :  { %2630 = vmatprep.subr.bf16.mxu0 %v6236_v40 }
 0x1c2   :  { %2631 = vmatpush1.bf16.msra.mxu0 %v6234_v41 }
 0x1c3   :  { %2632 = vmatprep.subr.bf16.mxu0 %v6239_v42 }
 0x1c6   :  { %2633 = vmatpush1.bf16.msra.mxu0 %v6237_v43 }
 0x1c7   :  { %2643 = vmatprep.subr.bf16.mxu0 %v6242_v44 }
 0x25c   :  { %v1891_v60 = vpop.f32.mrb[0].mxu0  ;;  %v2055_v61 = vpop.f32.mrb[0].mxu1 }
 0x25d   :  { %v6814_v62 = vadd.f32 %v1891_v60, %v409_v56  ;;  %v6816_v63 = vadd.f32 %v2055_v61, %v417_v57  ;;  %v1893_v0 = vpop.f32.mrb[1].mxu0  ;;  %v2057_v1 = vpop.f32.mrb[1].mxu1 }
 0x25e   :  { %v6818_v2 = vadd.f32 %v1893_v0, %v413_v58  ;;  %v6820_v3 = vadd.f32 %v2057_v1, %v421_v59  ;;  %v1895_v4 = vpop.f32.mrb[2].mxu0  ;;  %v2059_v5 = vpop.f32.mrb[2].mxu1 }
 0x25f   :  { %v2062_v6 = vrot.slane %v6814_v62, 4  ;;  %v2086_v7 = vmul.f32 %v6814_v62, %v6814_v62  ;;  %v2074_v8 = vrot.slane %v6816_v63, 4  ;;  %v2088_v9 = vmul.f32 %v6816_v63, %v6816_v63  ;;  %v1896_v12 = vpop.f32.mrb[3].mxu0  ;;  %v2060_v13 = vpop.f32.mrb[3].mxu1 }
 0x260   :  { %v2068_v14 = vrot.slane %v6818_v2, 4  ;;  %v2087_v15 = vmul.f32 %v6818_v2, %v6818_v2  ;;  %v2080_v16 = vrot.slane %v6820_v3, 4  ;;  %v2089_v17 = vmul.f32 %v6820_v3, %v6820_v3 }
 0x261   :  { %v2063_v18 = vadd.f32 %v6814_v62, %v2062_v6  ;;  %v2090_v19 = vrot.slane %v2086_v7, 4  ;;  %v2075_v20 = vadd.f32 %v6816_v63, %v2074_v8  ;;  %v2102_v21 = vrot.slane %v2088_v9, 4 }
 0x262   :  { %v2069_v11 = vadd.f32 %v6818_v2, %v2068_v14  ;;  %v2096_v10 = vrot.slane %v2087_v15, 4  ;;  %v2081_v22 = vadd.f32 %v6820_v3, %v2080_v16  ;;  %v2108_v23 = vrot.slane %v2089_v17, 4 }
 0x263   :  { %v2064_v24 = vrot.slane %v2063_v18, 2  ;;  %v2091_v25 = vadd.f32 %v2090_v19, %v2086_v7  ;;  %v2076_v26 = vrot.slane %v2075_v20, 2  ;;  %v2103_v27 = vadd.f32 %v2102_v21, %v2088_v9 }
 0x264   :  { %v2070_v28 = vrot.slane %v2069_v11, 2  ;;  %v2097_v29 = vadd.f32 %v2096_v10, %v2087_v15  ;;  %v2082_v30 = vrot.slane %v2081_v22, 2  ;;  %v2109_v31 = vadd.f32 %v2108_v23, %v2089_v17 }
 0x265   :  { %v2065_v32 = vadd.f32 %v2064_v24, %v2063_v18  ;;  %v2092_v33 = vrot.slane %v2091_v25, 2  ;;  %v2077_v34 = vadd.f32 %v2076_v26, %v2075_v20  ;;  %v2104_v35 = vrot.slane %v2103_v27, 2  ;;  %v2172_v26 = vld [vmem:[%s7019_s5] sm:$0xf] }
 0x266   :  { %v2071_v36 = vadd.f32 %v2070_v28, %v2069_v11  ;;  %v2098_v37 = vrot.slane %v2097_v29, 2  ;;  %v2083_v38 = vadd.f32 %v2082_v30, %v2081_v22  ;;  %v2110_v39 = vrot.slane %v2109_v31, 2 }
 0x267   :  { %v2066_v40 = vrot.slane %v2065_v32, 1  ;;  %v2093_v41 = vadd.f32 %v2092_v33, %v2091_v25  ;;  %v2078_v42 = vrot.slane %v2077_v34, 1  ;;  %v2105_v43 = vadd.f32 %v2104_v35, %v2103_v27  ;;  %v2146_v25 = vld [vmem:[#allocation9] sm:$0xf] }
 0x268   :  { %v2072_v44 = vrot.slane %v2071_v36, 1  ;;  %v2099_v45 = vadd.f32 %v2098_v37, %v2097_v29  ;;  %v2084_v46 = vrot.slane %v2083_v38, 1  ;;  %v2111_v47 = vadd.f32 %v2110_v39, %v2109_v31 }
 0x269   :  { %v2067_v48 = vadd.f32 %v2066_v40, %v2065_v32  ;;  %v2094_v49 = vrot.slane %v2093_v41, 1  ;;  %v2079_v53 = vadd.f32 %v2078_v42, %v2077_v34  ;;  %v2106_v56 = vrot.slane %v2105_v43, 1 }
 0x26a   :  { %v2073_v57 = vadd.f32 %v2072_v44, %v2071_v36  ;;  %v2100_v58 = vrot.slane %v2099_v45, 1  ;;  %v2085_v59 = vadd.f32 %v2084_v46, %v2083_v38  ;;  %v2112_v60 = vrot.slane %v2111_v47, 1 }
 0x26b   :  { %v2095_v61 = vadd.f32 %v2094_v49, %v2093_v41  ;;  %v2114_v0 = vmul.f32 0.125, %v2067_v48  ;;  %v2107_v1 = vadd.f32 %v2106_v56, %v2105_v43  ;;  %v2116_v4 = vmul.f32 0.125, %v2079_v53 }
 0x26c   :  { %v2101_v5 = vadd.f32 %v2100_v58, %v2099_v45  ;;  %v2115_v6 = vmul.f32 0.125, %v2073_v57  ;;  %v2113_v7 = vadd.f32 %v2112_v60, %v2111_v47  ;;  %v2117_v8 = vmul.f32 0.125, %v2085_v59  ;;  %v6240_v60 = vld [vmem:[#allocation11 + $0x100] ss:$8 sps:$4 sm:$0xff]  }
 0x26d   :  { %v2118_v9 = vmul.f32 0.125, %v2095_v61  ;;  %v2122_v12 = vmul.f32 %v2114_v0, %v2114_v0  ;;  %v2120_v13 = vmul.f32 0.125, %v2107_v1  ;;  %v2124_v14 = vmul.f32 %v2116_v4, %v2116_v4 }
 0x26e   :  { %v2119_v15 = vmul.f32 0.125, %v2101_v5  ;;  %v2123_v16 = vmul.f32 %v2115_v6, %v2115_v6  ;;  %v2121_v18 = vmul.f32 0.125, %v2113_v7  ;;  %v2125_v19 = vmul.f32 %v2117_v8, %v2117_v8  ;;  %v6248_v5 = vld [vmem:[#allocation11 + $0x124] ss:$8 sps:$4 sm:$0xff]   ;;  %v6251_v7 = vld [vmem:[#allocation11 + $0x134] ss:$8 sps:$4 sm:$0xff]  }
 0x26f   :  { %v2126_v17 = vsub.f32 %v2118_v9, %v2122_v12  ;;  %v2128_v20 = vsub.f32 %v2120_v13, %v2124_v14  ;;  %v2130_v27 = vsub.f32 %v6814_v62, %v2114_v0  ;;  %v2151_v28 = vrot.slane %v2146_v25, %v6796_v51  ;;  %v6245_v0 = vld [vmem:[#allocation11 + $0x114] ss:$8 sps:$4 sm:$0xff]   ;;  %v6254_v9 = vld [vmem:[#allocation11 + $0x144] ss:$8 sps:$4 sm:$0xff]   ;;  %v6252_v12 = vld [vmem:[#allocation11 + $0x140] ss:$8 sps:$4 sm:$0xff]  }
 0x270   :  { %v2127_v21 = vsub.f32 %v2119_v15, %v2123_v16  ;;  %v2129_v10 = vsub.f32 %v2121_v18, %v2125_v19  ;;  %v2132_v30 = vsub.f32 %v6816_v63, %v2116_v4  ;;  %v2159_v31 = vrot.slane %v2146_v25, %v6799_v52  ;;  %v6243_v4 = vld [vmem:[#allocation11 + $0x110] ss:$8 sps:$4 sm:$0xff]   ;;  %v6257_v13 = vld [vmem:[#allocation11 + $0x154] ss:$8 sps:$4 sm:$0xff]   ;;  %v6260_v15 = vld [vmem:[#allocation11 + $0x164] ss:$8 sps:$4 sm:$0xff]  }
 0x271   :  { %v2134_v11 = vadd.f32 1e-05, %v2126_v17  ;;  %v2136_v22 = vadd.f32 1e-05, %v2128_v20  ;;  %v2131_v34 = vsub.f32 %v6818_v2, %v2115_v6  ;;  %v2155_v35 = vrot.slane %v2146_v25, %v6805_v54  ;;  %v6246_v6 = vld [vmem:[#allocation11 + $0x120] ss:$8 sps:$4 sm:$0xff]  }
 0x272   :  { %v2135_v23 = vadd.f32 1e-05, %v2127_v21  ;;  %v2137_v24 = vadd.f32 1e-05, %v2129_v10  ;;  %v2177_v36 = vrot.slane %v2172_v26, %v6796_v51  ;;  %v2133_v39 = vsub.f32 %v6820_v3, %v2117_v8  ;;  %v6249_v8 = vld [vmem:[#allocation11 + $0x130] ss:$8 sps:$4 sm:$0xff]  }
 0x273   :  { %6336 = vrsqrt.f32 %v2134_v11  ;;  %v2163_v62 = vrot.slane %v2146_v25, %v6808_v55  ;;  %v2185_v40 = vrot.slane %v2172_v26, %v6799_v52  ;;  %v2181_v42 = vrot.slane %v2172_v26, %v6805_v54  ;;  %v6255_v14 = vld [vmem:[#allocation11 + $0x150] ss:$8 sps:$4 sm:$0xff]   ;;  %v6258_v16 = vld [vmem:[#allocation11 + $0x160] ss:$8 sps:$4 sm:$0xff]   ;;  %v6263_v17 = vld [vmem:[#allocation11 + $0x174] ss:$8 sps:$4 sm:$0xff]  }
 0x274   :  { %6338 = vrsqrt.f32 %v2136_v22  ;;  %v2189_v2 = vrot.slane %v2172_v26, %v6808_v55  ;;  %v6261_v18 = vld [vmem:[#allocation11 + $0x170] ss:$8 sps:$4 sm:$0xff]   ;;  %v6266_v19 = vld [vmem:[#allocation11 + $0x184] ss:$8 sps:$4 sm:$0xff]   ;;  %v6264_v20 = vld [vmem:[#allocation11 + $0x180] ss:$8 sps:$4 sm:$0xff]  }
 0x275   :  { %6340 = vrsqrt.f32 %v2135_v23  ;;  %v6269_v21 = vld [vmem:[#allocation11 + $0x194] ss:$8 sps:$4 sm:$0xff]   ;;  %v6267_v11 = vld [vmem:[#allocation11 + $0x190] ss:$8 sps:$4 sm:$0xff]   ;;  %v6272_v10 = vld [vmem:[#allocation11 + $0x1a4] ss:$8 sps:$4 sm:$0xff]  }
 0x276   :  { %6342 = vrsqrt.f32 %v2137_v24  ;;  %v6270_v22 = vld [vmem:[#allocation11 + $0x1a0] ss:$8 sps:$4 sm:$0xff]   ;;  %v6275_v23 = vld [vmem:[#allocation11 + $0x1b4] ss:$8 sps:$4 sm:$0xff]   ;;  %v6273_v24 = vld [vmem:[#allocation11 + $0x1b0] ss:$8 sps:$4 sm:$0xff]  }
 0x277   :  { %v6278_v25 = vld [vmem:[#allocation11 + $0x1c4] ss:$8 sps:$4 sm:$0xff]   ;;  %v6276_v26 = vld [vmem:[#allocation11 + $0x1c0] ss:$8 sps:$4 sm:$0xff]  }
 0x27d   :  { %v6337_v29 = vpop.eup %6336 }
 0x27e   :  { %v6339_v32 = vpop.eup %6338  ;;  %v2142_v33 = vmul.f32 %v6337_v29, %v2130_v27  ;;  %v6281_v27 = vld [vmem:[#allocation11 + $0x1d4] ss:$8 sps:$4 sm:$0xff]   ;;  %v6284_v29 = vld [vmem:[#allocation11 + $0x1e4] ss:$8 sps:$4 sm:$0xff]  }
 0x27f   :  { %v6341_v37 = vpop.eup %6340  ;;  %v2144_v38 = vmul.f32 %v6339_v32, %v2132_v30  ;;  %v6282_v30 = vld [vmem:[#allocation11 + $0x1e0] ss:$8 sps:$4 sm:$0xff]   ;;  %v6285_v32 = vld [vmem:[#allocation11 + $0x1f0] ss:$8 sps:$4 sm:$0xff]  }
 0x280   :  { %v6343_v41 = vpop.eup %6342  ;;  %v2143_v63 = vmul.f32 %v6341_v37, %v2131_v34  ;;  %v2168_v43 = vmul.f32 %v2151_v28, %v2142_v33  ;;  %v6279_v28 = vld [vmem:[#allocation11 + $0x1d0] ss:$8 sps:$4 sm:$0xff]   ;;  %v6299_v37 = vld [vmem:[#allocation12 + $0x64] ss:$16 sps:$4 sm:$0xff]  }
 0x281   :  { %v2145_v44 = vmul.f32 %v6343_v41, %v2133_v39  ;;  %v2170_v45 = vmul.f32 %v2159_v31, %v2144_v38  ;;  %v6287_v31 = vld [vmem:[#allocation11 + $0x1f4] ss:$8 sps:$4 sm:$0xff]   ;;  %v6297_v38 = vld [vmem:[#allocation12 + $0x60] ss:$16 sps:$4 sm:$0xff]  }
 0x282   :  { %v2169_v46 = vmul.f32 %v2155_v35, %v2143_v63  ;;  %v2194_v47 = vadd.f32 %v2177_v36, %v2168_v43  ;;  %v6296_v35 = vld [vmem:[#allocation12 + $0x44] ss:$16 sps:$4 sm:$0xff]   ;;  %v6294_v36 = vld [vmem:[#allocation12 + $0x40] ss:$16 sps:$4 sm:$0xff]  }
 0x283   :  { %v2171_v48 = vmul.f32 %v2163_v62, %v2145_v44  ;;  %v6853_v49 = vadd.f32 %v2185_v40, %v2170_v45  ;;  %2926 = vmatprep.subr.bf16.mxu1 %v6296_v35  ;;  %v6302_v39 = vld [vmem:[#allocation12 + $0x84] ss:$16 sps:$4 sm:$0xff]   ;;  %v6300_v62 = vld [vmem:[#allocation12 + $0x80] ss:$16 sps:$4 sm:$0xff]   ;;  %v6589_v45 = vmov 0   ;;  %v3161_v35 = vld [vmem:[#allocation14 + $0x68] sm:$0xff] }
 0x284   :  { %v2195_v53 = vadd.f32 %v2181_v42, %v2169_v46  ;;  %v2198_v3 = vmax.f32 %v2194_v47, 0.0  ;;  %2927 = vmatpush1.bf16.msra.mxu1 %v6294_v36  ;;  %v6305_v40 = vld [vmem:[#allocation12 + $0xa4] ss:$16 sps:$4 sm:$0xff]   ;;  %v6303_v41 = vld [vmem:[#allocation12 + $0xa0] ss:$16 sps:$4 sm:$0xff]   ;;  %2954 = vmatprep.mubr.bf16.mxu1 %v6589_v45 }
 0x285   :  { %v2197_v56 = vadd.f32 %v2189_v2, %v2171_v48  ;;  %v2200_v33 = vmax.f32 %v6853_v49, 0.0  ;;  %2928 = vmatprep.subr.bf16.mxu1 %v6299_v37  ;;  %v6308_v63 = vld [vmem:[#allocation12 + $0xc4] ss:$16 sps:$4 sm:$0xff]   ;;  %v6306_v42 = vld [vmem:[#allocation12 + $0xc0] ss:$16 sps:$4 sm:$0xff]  }
 0x286   :  { %v2199_v57 = vmax.f32 %v2195_v53, 0.0  ;;  %v2202_v61 = vpack.c.bf16 %v2198_v3, %v2198_v3  ;;  %v6311_v43 = vld [vmem:[#allocation12 + $0xe4] ss:$16 sps:$4 sm:$0xff]   ;;  %v6309_v44 = vld [vmem:[#allocation12 + $0xe0] ss:$16 sps:$4 sm:$0xff]  }
 0x287   :  { %v2201_v58 = vmax.f32 %v2197_v56, 0.0  ;;  %v2204_v34 = vpack.c.bf16 %v2200_v33, %v2200_v33  ;;  %v6314_v2 = vld [vmem:[#allocation12 + $0xc] ss:$16 sps:$4 sm:$0xff]   ;;  %v2270_v46 = vld [vmem:[%s7021_s7] sm:$0x3]  ;;  %v3156_v33 = vld [vmem:[#allocation14 + $0x40] sm:$0xff] }
 0x288   :  { %v2203_v59 = vpack.c.bf16 %v2199_v57, %v2199_v57  ;;  %2929 = vmatpush1.bf16.msra.mxu1 %v6297_v38  ;;  %v2275_v47 = vrot.slane %v2270_v46, %v6796_v51  ;;  %v2279_v48 = vrot.slane %v2270_v46, %v6805_v54  ;;  %v3160_v36 = vld [vmem:[#allocation14 + $0x60] sm:$0xff]  ;;  %v3165_v38 = vld [vmem:[#allocation14 + $0x88] sm:$0xff] }
 0x289   :  { %v2205_v1 = vpack.c.bf16 %v2201_v58, %v2201_v58  ;;  %2930 = vmatprep.subr.bf16.mxu1 %v6302_v39  ;;  %v3169_v39 = vld [vmem:[#allocation14 + $0xa8] sm:$0xff] }
 0x28a   :  { %2634 = vmatprep.mubr.bf16.mxu0 %v2203_v59 }
 0x28b   :  { %2635 = vmatmul.mubr.bf16.vlgmr.msra.gmra.mrb[4].mxu0 %v2202_v61 }
 0x28c   :  { %2644 = vmatpush1.bf16.msra.mxu0 %v6240_v60  ;;  %2675 = vmatprep.mubr.bf16.mxu0 %v2205_v1 }
 0x28d   :  { %2645 = vmatprep.subr.bf16.mxu0 %v6245_v0  ;;  %2931 = vmatpush1.bf16.msra.mxu1 %v6300_v62 }
 0x28e   :  { %2932 = vmatprep.subr.bf16.mxu1 %v6305_v40 }
 0x290   :  { %2646 = vmatpush1.bf16.msra.mxu0 %v6243_v4  ;;  %v147_v4 = vld [vmem:[#allocation6] sm:$0xff] }
 0x291   :  { %2647 = vmatprep.subr.bf16.mxu0 %v6248_v5  ;;  %2933 = vmatpush1.bf16.msra.mxu1 %v6303_v41  ;;  %v5476_v41 = vcombine.high %v3156_v33, %v3160_v36 }
 0x292   :  { %2934 = vmatprep.subr.bf16.mxu1 %v6308_v63  ;;  %v5486_v63 = vcombine.high %v3165_v38, %v3169_v39 }
 0x294   :  { %2648 = vmatpush1.bf16.msra.mxu0 %v6246_v6 }
 0x295   :  { %2649 = vmatprep.subr.bf16.mxu0 %v6251_v7  ;;  %2935 = vmatpush1.bf16.msra.mxu1 %v6306_v42  ;;  %v3164_v42 = vld [vmem:[#allocation14 + $0x80] sm:$0xff] }
 0x296   :  { %2936 = vmatprep.subr.bf16.mxu1 %v6311_v43  ;;  %v3168_v43 = vld [vmem:[#allocation14 + $0xa0] sm:$0xff] }
 0x297   :  { %v5483_v46 = vcombine.low %v3164_v42, %v3168_v43 }
 0x298   :  { %2650 = vmatpush1.bf16.msra.mxu0 %v6249_v8 }
 0x299   :  { %2651 = vmatprep.subr.bf16.mxu0 %v6254_v9  ;;  %2937 = vmatpush1.bf16.msra.mxu1 %v6309_v44  ;;  %v5475_v44 = vcombine.low %v3156_v33, %v3160_v36  ;;  %v3213_v33 = vld [vmem:[#allocation14 + $0x208] sm:$0xff] }
 0x29a   :  { %2963 = vmatprep.subr.bf16.mxu1 %v6314_v2  ;;  %v5485_v2 = vcombine.low %v3165_v38, %v3169_v39  ;;  %v3220_v39 = vld [vmem:[#allocation14 + $0x240] sm:$0xff] }
 0x29c   :  { %2652 = vmatpush1.bf16.msra.mxu0 %v6252_v12  ;;  %v6312_v12 = vld [vmem:[#allocation12 + $0x8] ss:$16 sps:$4 sm:$0xff]  }
 0x29d   :  { %2653 = vmatprep.subr.bf16.mxu0 %v6257_v13 }
 0x2a0   :  { %2654 = vmatpush1.bf16.msra.mxu0 %v6255_v14  ;;  %v6317_v14 = vld [vmem:[#allocation12 + $0x2c] ss:$16 sps:$4 sm:$0xff]  }
 0x2a1   :  { %2655 = vmatprep.subr.bf16.mxu0 %v6260_v15  ;;  %v6315_v15 = vld [vmem:[#allocation12 + $0x28] ss:$16 sps:$4 sm:$0xff]  }
 0x2a4   :  { %2656 = vmatpush1.bf16.msra.mxu0 %v6258_v16  ;;  %v6320_v16 = vld [vmem:[#allocation12 + $0x4c] ss:$16 sps:$4 sm:$0xff]  }
 0x2a5   :  { %2657 = vmatprep.subr.bf16.mxu0 %v6263_v17  ;;  %v6318_v17 = vld [vmem:[#allocation12 + $0x48] ss:$16 sps:$4 sm:$0xff]  }
 0x2a8   :  { %2658 = vmatpush1.bf16.msra.mxu0 %v6261_v18  ;;  %v6323_v18 = vld [vmem:[#allocation12 + $0x6c] ss:$16 sps:$4 sm:$0xff]  }
 0x2a9   :  { %2659 = vmatprep.subr.bf16.mxu0 %v6266_v19  ;;  %v6321_v19 = vld [vmem:[#allocation12 + $0x68] ss:$16 sps:$4 sm:$0xff]  }
 0x2ac   :  { %2660 = vmatpush1.bf16.msra.mxu0 %v6264_v20  ;;  %v6326_v20 = vld [vmem:[#allocation12 + $0x8c] ss:$16 sps:$4 sm:$0xff]  }
 0x2ad   :  { %2661 = vmatprep.subr.bf16.mxu0 %v6269_v21  ;;  %v6324_v21 = vld [vmem:[#allocation12 + $0x88] ss:$16 sps:$4 sm:$0xff]  }
 0x2b0   :  { %2662 = vmatpush1.bf16.msra.mxu0 %v6267_v11  ;;  %v6329_v11 = vld [vmem:[#allocation12 + $0xac] ss:$16 sps:$4 sm:$0xff]  }
 0x2b1   :  { %2663 = vmatprep.subr.bf16.mxu0 %v6272_v10  ;;  %v6327_v10 = vld [vmem:[#allocation12 + $0xa8] ss:$16 sps:$4 sm:$0xff]  }
 0x2b4   :  { %2664 = vmatpush1.bf16.msra.mxu0 %v6270_v22  ;;  %v6332_v22 = vld [vmem:[#allocation12 + $0xcc] ss:$16 sps:$4 sm:$0xff]  }
 0x2b5   :  { %2665 = vmatprep.subr.bf16.mxu0 %v6275_v23  ;;  %v6330_v23 = vld [vmem:[#allocation12 + $0xc8] ss:$16 sps:$4 sm:$0xff]  }
 0x2b8   :  { %2666 = vmatpush1.bf16.msra.mxu0 %v6273_v24  ;;  %v6335_v24 = vld [vmem:[#allocation12 + $0xec] ss:$16 sps:$4 sm:$0xff]  }
 0x2b9   :  { %2667 = vmatprep.subr.bf16.mxu0 %v6278_v25  ;;  %v3148_v25 = vld [vmem:[#allocation14] sm:$0xff] }
 0x2bc   :  { %2668 = vmatpush1.bf16.msra.mxu0 %v6276_v26  ;;  %v3152_v26 = vld [vmem:[#allocation14 + $0x20] sm:$0xff] }
 0x2bd   :  { %2669 = vmatprep.subr.bf16.mxu0 %v6281_v27  ;;  %v3149_v27 = vld [vmem:[#allocation14 + $0x8] sm:$0xff]  ;;  %v5467_v62 = vcombine.low %v3148_v25, %v3152_v26 }
 0x2c0   :  { %2670 = vmatpush1.bf16.msra.mxu0 %v6279_v28  ;;  %v6333_v28 = vld [vmem:[#allocation12 + $0xe8] ss:$16 sps:$4 sm:$0xff]  }
 0x2c1   :  { %2671 = vmatprep.subr.bf16.mxu0 %v6284_v29  ;;  %v3153_v29 = vld [vmem:[#allocation14 + $0x28] sm:$0xff] }
 0x2c4   :  { %2672 = vmatpush1.bf16.msra.mxu0 %v6282_v30  ;;  %v5468_v30 = vcombine.high %v3148_v25, %v3152_v26  ;;  %v3205_v25 = vld [vmem:[#allocation14 + $0x1c8] sm:$0xff] }
 0x2c5   :  { %2673 = vmatprep.subr.bf16.mxu0 %v6287_v31  ;;  %v5469_v31 = vcombine.low %v3149_v27, %v3153_v29 }
 0x2c8   :  { %2674 = vmatpush1.bf16.msra.mxu0 %v6285_v32  ;;  %v5470_v32 = vcombine.high %v3149_v27, %v3153_v29  ;;  %v3209_v27 = vld [vmem:[#allocation14 + $0x1e8] sm:$0xff] }
 0x2c9   :  { %v5525_v29 = vcombine.low %v3205_v25, %v3209_v27 }
 0x2ca   :  { %4808 = vmatprep.subr.bf16.mxu0 %v5470_v32  ;;  %v3216_v32 = vld [vmem:[#allocation14 + $0x220] sm:$0xff] }
 0x2cb   :  { %2676 = vmatmul.mubr.bf16.vlgmr.msra.gmra.mrb[4].mxu0 %v2204_v34  ;;  %v3157_v34 = vld [vmem:[#allocation14 + $0x48] sm:$0xff] }
 0x2cc   :  { %v5478_v37 = vcombine.high %v3157_v34, %v3161_v35  ;;  %4809 = vmatpush1.bf16.msra.mxu0 %v5469_v31  ;;  %v5477_v40 = vcombine.low %v3157_v34, %v3161_v35  ;;  %v3212_v31 = vld [vmem:[#allocation14 + $0x200] sm:$0xff]  ;;  %v3217_v35 = vld [vmem:[#allocation14 + $0x228] sm:$0xff] }
 0x2cd   :  { %v5532_v34 = vcombine.high %v3212_v31, %v3216_v32  ;;  %v5531_v36 = vcombine.low %v3212_v31, %v3216_v32  ;;  %v5534_v38 = vcombine.high %v3213_v33, %v3217_v35  ;;  %v3273_v32 = vld [vmem:[#allocation14 + $0x3e8] sm:$0xff] }
 0x2ce   :  { %4810 = vmatprep.subr.bf16.mxu0 %v5478_v37  ;;  %v5533_v37 = vcombine.low %v3213_v33, %v3217_v35 }
 0x2d0   :  { %4811 = vmatpush1.bf16.msra.mxu0 %v5477_v40  ;;  %v3221_v40 = vld [vmem:[#allocation14 + $0x248] sm:$0xff] }
 0x2d1   :  { %4812 = vmatprep.subr.bf16.mxu0 %v5486_v63  ;;  %v3225_v63 = vld [vmem:[#allocation14 + $0x268] sm:$0xff] }
 0x2d4   :  { %4813 = vmatpush1.bf16.msra.mxu0 %v5485_v2  ;;  %v3228_v2 = vld [vmem:[#allocation14 + $0x280] sm:$0xff] }
 0x39e   :  { %v2677_v49 = vpop.f32.mrb[4].mxu0 }
 0x39f   :  { %v5727_v53 = vadd.f32 %v2677_v49, %v2275_v47  ;;  %v2679_v3 = vpop.f32.mrb[5].mxu0  ;;  %v3172_v47 = vld [vmem:[#allocation14 + $0xc0] sm:$0xff]  ;;  %v3173_v49 = vld [vmem:[#allocation14 + $0xc8] sm:$0xff] }
 0x3a0   :  { %v5728_v56 = vadd.f32 %v2679_v3, %v2279_v48  ;;  %v2681_v57 = vpop.f32.mrb[6].mxu0  ;;  %v3176_v48 = vld [vmem:[#allocation14 + $0xe0] sm:$0xff] }
 0x3a1   :  { %v2691_v58 = vmul.f32 %v5727_v53, %v5727_v53  ;;  %v2682_v59 = vpop.f32.mrb[7].mxu0  ;;  %v5492_v3 = vcombine.high %v3172_v47, %v3176_v48  ;;  %v3180_v57 = vld [vmem:[#allocation14 + $0x100] sm:$0xff] }
 0x3a2   :  { %v2684_v60 = vmul.f32 0.5, %v5728_v56  ;;  %v2690_v61 = vadd.f32 1.0, %v5728_v56  ;;  %v3177_v56 = vld [vmem:[#allocation14 + $0xe8] sm:$0xff] }
 0x3a3   :  { %v5493_v59 = vcombine.low %v3173_v49, %v3177_v56 }
 0x3a4   :  { %v2685_v0 = vmul.f32 1.442695, %v2684_v60  ;;  %v2692_v1 = vsub.f32 %v2690_v61, %v2691_v58  ;;  %v3184_v58 = vld [vmem:[#allocation14 + $0x120] sm:$0xff]  ;;  %v5494_v60 = vcombine.high %v3173_v49, %v3177_v56 }
 0x3a5   :  { %v5500_v61 = vcombine.high %v3180_v57, %v3184_v58  ;;  %v3236_v56 = vld [vmem:[#allocation14 + $0x2c0] sm:$0xff] }
 0x3a6   :  { %6344 = vpow2.f32 %v2685_v0  ;;  %v3181_v0 = vld [vmem:[#allocation14 + $0x108] sm:$0xff]  ;;  %4814 = vmatprep.subr.bf16.mxu0 %v5494_v60 }
 0x3a7   :  { %4815 = vmatpush1.bf16.msra.mxu0 %v5493_v59  ;;  %v3241_v60 = vld [vmem:[#allocation14 + $0x2e8] sm:$0xff] }
 0x3b0   :  { %v6345_v5 = vpop.eup %6344 }
 0x3b1   :  { %v2693_v6 = vmul.f32 %v6345_v5, %v6345_v5  ;;  %v2687_v7 = vmul.f32 %v6345_v5, %v147_v4  ;;  %v5499_v5 = vcombine.low %v3180_v57, %v3184_v58  ;;  %v3240_v57 = vld [vmem:[#allocation14 + $0x2e0] sm:$0xff]  ;;  %v3237_v58 = vld [vmem:[#allocation14 + $0x2c8] sm:$0xff] }
 0x3b2   :  { %v5556_v59 = vcombine.high %v3236_v56, %v3240_v57 }
 0x3b3   :  { %v2694_v8 = vsub.f32 %v2692_v1, %v2693_v6  ;;  %v2688_v9 = vadd.f32 %v5727_v53, %v2687_v7  ;;  %v5491_v53 = vcombine.low %v3172_v47, %v3176_v48  ;;  %v3185_v1 = vld [vmem:[#allocation14 + $0x128] sm:$0xff]  ;;  %v3188_v7 = vld [vmem:[#allocation14 + $0x140] sm:$0xff] }
 0x3b4   :  { %v5502_v4 = vcombine.high %v3181_v0, %v3185_v1  ;;  %v5501_v6 = vcombine.low %v3181_v0, %v3185_v1  ;;  %v3233_v48 = vld [vmem:[#allocation14 + $0x2a8] sm:$0xff]  ;;  %v5557_v0 = vcombine.low %v3237_v58, %v3241_v60  ;;  %v5558_v1 = vcombine.high %v3237_v58, %v3241_v60 }
 0x3b5   :  { %2695 = vadd.xlane.f32.xlu0 %v2694_v8  ;;  %v2707_v13 = vpack.c.bf16 %v2688_v9, %v2688_v9  ;;  %2689 = vst [vmem:[#allocation16] sm:$0xff] %v2688_v9  ;;  %v3192_v8 = vld [vmem:[#allocation14 + $0x160] sm:$0xff]  ;;  %v3189_v9 = vld [vmem:[#allocation14 + $0x148] sm:$0xff] }
 0x3b6   :  { %4816 = vmatprep.subr.bf16.mxu0 %v5502_v4  ;;  %v3244_v4 = vld [vmem:[#allocation14 + $0x300] sm:$0xff] }
 0x3b7   :  { %2955 = vmatmul.mubr.bf16.vlgmr.msra.gmra.mrb[4].mxu1 %v2707_v13  ;;  %4817 = vmatpush1.bf16.msra.mxu0 %v5501_v6  ;;  %v3245_v6 = vld [vmem:[#allocation14 + $0x308] sm:$0xff] }
 0x3b8   :  { %2964 = vmatpush1.bf16.msra.mxu1 %v6312_v12  ;;  %2995 = vmatprep.mubr.bf16.mxu1 %v6589_v45  ;;  %v5484_v45 = vcombine.high %v3164_v42, %v3168_v43  ;;  %v5508_v12 = vcombine.high %v3188_v7, %v3192_v8  ;;  %v5541_v43 = vcombine.low %v3221_v40, %v3225_v63 }
 0x3b9   :  { %2965 = vmatprep.subr.bf16.mxu1 %v6317_v14  ;;  %v5507_v14 = vcombine.low %v3188_v7, %v3192_v8  ;;  %v3249_v8 = vld [vmem:[#allocation14 + $0x328] sm:$0xff] }
 0x3bc   :  { %2966 = vmatpush1.bf16.msra.mxu1 %v6315_v15 }
 0x3bd   :  { %2967 = vmatprep.subr.bf16.mxu1 %v6320_v16 }
 0x3c0   :  { %2968 = vmatpush1.bf16.msra.mxu1 %v6318_v17  ;;  %v3196_v17 = vld [vmem:[#allocation14 + $0x180] sm:$0xff] }
 0x3c1   :  { %2969 = vmatprep.subr.bf16.mxu1 %v6323_v18  ;;  %v3200_v18 = vld [vmem:[#allocation14 + $0x1a0] sm:$0xff] }
 0x3c4   :  { %2970 = vmatpush1.bf16.msra.mxu1 %v6321_v19  ;;  %v3197_v19 = vld [vmem:[#allocation14 + $0x188] sm:$0xff] }
 0x3c5   :  { %2971 = vmatprep.subr.bf16.mxu1 %v6326_v20  ;;  %v5516_v20 = vcombine.high %v3196_v17, %v3200_v18 }
 0x3c8   :  { %2972 = vmatpush1.bf16.msra.mxu1 %v6324_v21  ;;  %v3201_v21 = vld [vmem:[#allocation14 + $0x1a8] sm:$0xff] }
 0x3c9   :  { %2973 = vmatprep.subr.bf16.mxu1 %v6329_v11  ;;  %v5515_v11 = vcombine.low %v3196_v17, %v3200_v18  ;;  %v3257_v18 = vld [vmem:[#allocation14 + $0x368] sm:$0xff] }
 0x3cc   :  { %2974 = vmatpush1.bf16.msra.mxu1 %v6327_v10  ;;  %v5517_v10 = vcombine.low %v3197_v19, %v3201_v21 }
 0x3cd   :  { %2975 = vmatprep.subr.bf16.mxu1 %v6332_v22  ;;  %v5518_v22 = vcombine.high %v3197_v19, %v3201_v21 }
 0x3d0   :  { %2976 = vmatpush1.bf16.msra.mxu1 %v6330_v23  ;;  %v3204_v23 = vld [vmem:[#allocation14 + $0x1c0] sm:$0xff] }
 0x3d1   :  { %2977 = vmatprep.subr.bf16.mxu1 %v6335_v24  ;;  %v3208_v24 = vld [vmem:[#allocation14 + $0x1e0] sm:$0xff] }
 0x3d2   :  { %v5524_v26 = vcombine.high %v3204_v23, %v3208_v24 }
 0x3d4   :  { %2978 = vmatpush1.bf16.msra.mxu1 %v6333_v28  ;;  %v5523_v28 = vcombine.low %v3204_v23, %v3208_v24  ;;  %v3265_v24 = vld [vmem:[#allocation14 + $0x3a8] sm:$0xff] }
 0x3d5   :  { %4726 = vmatprep.subr.bf16.mxu1 %v5468_v30  ;;  %v5526_v30 = vcombine.high %v3205_v25, %v3209_v27 }
 0x3d7   :  { %2996 = vmatmul.mubr.bf16.vlgmr.msra.gmra.mrb[8].mxu1 %v2707_v13  ;;  %v3193_v13 = vld [vmem:[#allocation14 + $0x168] sm:$0xff] }
 0x3d8   :  { %4727 = vmatpush1.bf16.msra.mxu1 %v5467_v62  ;;  %v5509_v15 = vcombine.low %v3189_v9, %v3193_v13  ;;  %v5510_v16 = vcombine.high %v3189_v9, %v3193_v13  ;;  %v3224_v62 = vld [vmem:[#allocation14 + $0x260] sm:$0xff]  ;;  %v5566_v13 = vcombine.high %v3245_v6, %v3249_v8 }
 0x3d9   :  { %4728 = vmatprep.subr.bf16.mxu1 %v5476_v41  ;;  %v5540_v41 = vcombine.high %v3220_v39, %v3224_v62  ;;  %v5539_v42 = vcombine.low %v3220_v39, %v3224_v62  ;;  %v6869_v62 = vld [vmem:[#allocation14 + $0x428] sm:$0xff] }
 0x3da   :  { %4818 = vmatprep.subr.bf16.mxu0 %v5510_v16  ;;  %v3253_v16 = vld [vmem:[#allocation14 + $0x348] sm:$0xff] }
 0x3db   :  { %4819 = vmatpush1.bf16.msra.mxu0 %v5509_v15  ;;  %v3256_v15 = vld [vmem:[#allocation14 + $0x360] sm:$0xff]  ;;  %v5574_v21 = vcombine.high %v3253_v16, %v3257_v18 }
 0x3dc   :  { %4729 = vmatpush1.bf16.msra.mxu1 %v5475_v44  ;;  %4820 = vmatprep.subr.bf16.mxu0 %v5518_v22  ;;  %v5542_v44 = vcombine.high %v3221_v40, %v3225_v63  ;;  %v3261_v22 = vld [vmem:[#allocation14 + $0x388] sm:$0xff] }
 0x3dd   :  { %4730 = vmatprep.subr.bf16.mxu1 %v5484_v45  ;;  %v3232_v45 = vld [vmem:[#allocation14 + $0x2a0] sm:$0xff]  ;;  %v5582_v27 = vcombine.high %v3261_v22, %v3265_v24 }
 0x3de   :  { %v5548_v47 = vcombine.high %v3228_v2, %v3232_v45  ;;  %v5547_v49 = vcombine.low %v3228_v2, %v3232_v45 }
 0x3df   :  { %4821 = vmatpush1.bf16.msra.mxu0 %v5517_v10  ;;  %v3264_v10 = vld [vmem:[#allocation14 + $0x3a0] sm:$0xff] }
 0x3e0   :  { %4731 = vmatpush1.bf16.msra.mxu1 %v5483_v46  ;;  %4822 = vmatprep.subr.bf16.mxu0 %v5526_v30  ;;  %v3229_v46 = vld [vmem:[#allocation14 + $0x288] sm:$0xff] }
 0x3e1   :  { %4732 = vmatprep.subr.bf16.mxu1 %v5492_v3  ;;  %v5550_v3 = vcombine.high %v3229_v46, %v3233_v48  ;;  %v3269_v30 = vld [vmem:[#allocation14 + $0x3c8] sm:$0xff] }
 0x3e2   :  { %v5590_v35 = vcombine.high %v3269_v30, %v3273_v32 }
 0x3e3   :  { %4823 = vmatpush1.bf16.msra.mxu0 %v5525_v29  ;;  %v3272_v29 = vld [vmem:[#allocation14 + $0x3e0] sm:$0xff] }
 0x3e4   :  { %4733 = vmatpush1.bf16.msra.mxu1 %v5491_v53  ;;  %4824 = vmatprep.subr.bf16.mxu0 %v5534_v38  ;;  %v5549_v53 = vcombine.low %v3229_v46, %v3233_v48  ;;  %v6865_v38 = vld [vmem:[#allocation14 + $0x408] sm:$0xff]  ;;  %v2740_v48 = vld [vmem:[%s7023_s9] sm:$0xf] }
 0x3e5   :  { %4734 = vmatprep.subr.bf16.mxu1 %v5500_v61  ;;  %v5555_v61 = vcombine.low %v3236_v56, %v3240_v57  ;;  %v5598_v63 = vcombine.high %v6865_v38, %v6869_v62 }
 0x3e7   :  { %4825 = vmatpush1.bf16.msra.mxu0 %v5533_v37  ;;  %v6863_v37 = vld [vmem:[#allocation14 + $0x420] sm:$0xff] }
 0x3e8   :  { %4735 = vmatpush1.bf16.msra.mxu1 %v5499_v5  ;;  %4826 = vmatprep.subr.bf16.mxu0 %v5542_v44  ;;  %v3248_v5 = vld [vmem:[#allocation14 + $0x320] sm:$0xff] }
 0x3e9   :  { %4736 = vmatprep.subr.bf16.mxu1 %v5508_v12  ;;  %v5564_v7 = vcombine.high %v3244_v4, %v3248_v5  ;;  %v5563_v9 = vcombine.low %v3244_v4, %v3248_v5  ;;  %v5565_v12 = vcombine.low %v3245_v6, %v3249_v8 }
 0x3eb   :  { %4827 = vmatpush1.bf16.msra.mxu0 %v5541_v43 }
 0x3ec   :  { %4737 = vmatpush1.bf16.msra.mxu1 %v5507_v14  ;;  %4828 = vmatprep.subr.bf16.mxu0 %v5550_v3  ;;  %v3252_v14 = vld [vmem:[#allocation14 + $0x340] sm:$0xff] }
 0x3ed   :  { %4738 = vmatprep.subr.bf16.mxu1 %v5516_v20  ;;  %v5572_v17 = vcombine.high %v3252_v14, %v3256_v15  ;;  %v5571_v19 = vcombine.low %v3252_v14, %v3256_v15  ;;  %v5573_v20 = vcombine.low %v3253_v16, %v3257_v18 }
 0x3ef   :  { %4829 = vmatpush1.bf16.msra.mxu0 %v5549_v53  ;;  %v2749_v53 = vrot.slane %v2740_v48, %v6805_v54 }
 0x3f0   :  { %4739 = vmatpush1.bf16.msra.mxu1 %v5515_v11  ;;  %4830 = vmatprep.subr.bf16.mxu0 %v5558_v1  ;;  %v3260_v11 = vld [vmem:[#allocation14 + $0x380] sm:$0xff] }
 0x3f1   :  { %4740 = vmatprep.subr.bf16.mxu1 %v5524_v26  ;;  %v5580_v23 = vcombine.high %v3260_v11, %v3264_v10  ;;  %v5579_v25 = vcombine.low %v3260_v11, %v3264_v10  ;;  %v5581_v26 = vcombine.low %v3261_v22, %v3265_v24 }
 0x3f3   :  { %4831 = vmatpush1.bf16.msra.mxu0 %v5557_v0 }
 0x3f4   :  { %4741 = vmatpush1.bf16.msra.mxu1 %v5523_v28  ;;  %4832 = vmatprep.subr.bf16.mxu0 %v5566_v13  ;;  %v3268_v28 = vld [vmem:[#allocation14 + $0x3c0] sm:$0xff] }
 0x3f5   :  { %4742 = vmatprep.subr.bf16.mxu1 %v5532_v34  ;;  %v5588_v31 = vcombine.high %v3268_v28, %v3272_v29  ;;  %v5587_v33 = vcombine.low %v3268_v28, %v3272_v29  ;;  %v5589_v34 = vcombine.low %v3269_v30, %v3273_v32 }
 0x3f7   :  { %4833 = vmatpush1.bf16.msra.mxu0 %v5565_v12 }
 0x3f8   :  { %4743 = vmatpush1.bf16.msra.mxu1 %v5531_v36  ;;  %4834 = vmatprep.subr.bf16.mxu0 %v5574_v21  ;;  %v6861_v36 = vld [vmem:[#allocation14 + $0x400] sm:$0xff] }
 0x3f9   :  { %4744 = vmatprep.subr.bf16.mxu1 %v5540_v41  ;;  %v5596_v39 = vcombine.high %v6861_v36, %v6863_v37  ;;  %v5595_v40 = vcombine.low %v6861_v36, %v6863_v37  ;;  %v5597_v41 = vcombine.low %v6865_v38, %v6869_v62  ;;  %v3304_v36 = vld [vmem:[#allocation14 + $0x4e0] sm:$0xff]  ;;  %v3301_v37 = vld [vmem:[#allocation14 + $0x4c8] sm:$0xff] }
 0x3fb   :  { %4835 = vmatpush1.bf16.msra.mxu0 %v5573_v20 }
 0x3fc   :  { %4745 = vmatpush1.bf16.msra.mxu1 %v5539_v42  ;;  %4836 = vmatprep.subr.bf16.mxu0 %v5582_v27 }
 0x3fd   :  { %4746 = vmatprep.subr.bf16.mxu1 %v5548_v47 }
 0x3ff   :  { %4837 = vmatpush1.bf16.msra.mxu0 %v5581_v26 }
 0x400   :  { %4747 = vmatpush1.bf16.msra.mxu1 %v5547_v49  ;;  %4838 = vmatprep.subr.bf16.mxu0 %v5590_v35  ;;  %v2745_v49 = vrot.slane %v2740_v48, %v6796_v51 }
 0x401   :  { %4748 = vmatprep.subr.bf16.mxu1 %v5556_v59 }
 0x403   :  { %4839 = vmatpush1.bf16.msra.mxu0 %v5589_v34 }
 0x404   :  { %4749 = vmatpush1.bf16.msra.mxu1 %v5555_v61  ;;  %4849 = vmatprep.subr.bf16.mxu0 %v5598_v63  ;;  %v2753_v63 = vrot.slane %v2740_v48, %v6799_v52 }
 0x405   :  { %4750 = vmatprep.subr.bf16.mxu1 %v5564_v7 }
 0x408   :  { %4751 = vmatpush1.bf16.msra.mxu1 %v5563_v9 }
 0x409   :  { %4752 = vmatprep.subr.bf16.mxu1 %v5572_v17 }
 0x40c   :  { %4753 = vmatpush1.bf16.msra.mxu1 %v5571_v19 }
 0x40d   :  { %4754 = vmatprep.subr.bf16.mxu1 %v5580_v23 }
 0x410   :  { %4755 = vmatpush1.bf16.msra.mxu1 %v5579_v25 }
 0x411   :  { %4756 = vmatprep.subr.bf16.mxu1 %v5588_v31 }
 0x414   :  { %4757 = vmatpush1.bf16.msra.mxu1 %v5587_v33 }
 0x415   :  { %4767 = vmatprep.subr.bf16.mxu1 %v5596_v39 }
 0x442   :  { %v2696_v42 = vpop.xlane.xlu0 %2695 }
 0x443   :  { %v2697_v43 = vrot.slane %v2696_v42, 4 }
 0x445   :  { %v2698_v44 = vadd.f32 %v2697_v43, %v2696_v42  ;;  %v6886_v42 = vld [vmem:[%s7024_s10] sm:$0xf]  ;;  %v2757_v43 = vrot.slane %v2740_v48, %v6808_v55 }
 0x447   :  { %v2699_v2 = vrot.slane %v2698_v44, 2 }
 0x449   :  { %v2700_v45 = vadd.f32 %v2699_v2, %v2698_v44  ;;  %v6892_v44 = vld [vmem:[%s7025_s11] sm:$0xf] }
 0x44b   :  { %v2701_v46 = vrot.slane %v2700_v45, 1 }
 0x44d   :  { %v2702_v47 = vadd.f32 %v2701_v46, %v2700_v45  ;;  %v3093_v46 = vrot.slane %v6886_v42, %v6796_v51 }
 0x44f   :  { %5781 = vpush %v2702_v47 }
 0x480   :  { %s5782_s7 = spop %5781 }
 0x481   :  { %s2704_s24 = smul.f32 -0.5, %s5782_s7 }
 0x483   :  { %2706 = sst [smem:[#allocation18]] %s2704_s24 }
 0x48a   :  { %v2956_v3 = vpop.f32.mrb[4].mxu1 }
 0x48b   :  { %v2957_v56 = vadd.f32 %v2956_v3, %v2745_v49  ;;  %v2958_v57 = vpop.f32.mrb[5].mxu1 }
 0x48c   :  { %v2959_v58 = vadd.f32 %v2958_v57, %v2749_v53  ;;  %v2960_v59 = vpop.f32.mrb[6].mxu1  ;;  %v3097_v57 = vrot.slane %v6886_v42, %v6805_v54 }
 0x48d   :  { %v3004_v60 = vrot.slane %v2957_v56, 4  ;;  %v3028_v61 = vmul.f32 %v2957_v56, %v2957_v56  ;;  %v2961_v0 = vpop.f32.mrb[7].mxu1 }
 0x48e   :  { %v3010_v1 = vrot.slane %v2959_v58, 4  ;;  %v3029_v4 = vmul.f32 %v2959_v58, %v2959_v58 }
 0x48f   :  { %v3005_v5 = vadd.f32 %v3004_v60, %v2957_v56  ;;  %v3032_v6 = vrot.slane %v3028_v61, 4 }
 0x490   :  { %v3011_v7 = vadd.f32 %v3010_v1, %v2959_v58  ;;  %v3038_v8 = vrot.slane %v3029_v4, 4 }
 0x491   :  { %v3006_v9 = vrot.slane %v3005_v5, 2  ;;  %v3033_v12 = vadd.f32 %v3032_v6, %v3028_v61 }
 0x492   :  { %v3012_v13 = vrot.slane %v3011_v7, 2  ;;  %v3039_v14 = vadd.f32 %v3038_v8, %v3029_v4 }
 0x493   :  { %v3007_v15 = vadd.f32 %v3006_v9, %v3005_v5  ;;  %v3034_v16 = vrot.slane %v3033_v12, 2  ;;  %v3123_v5 = vrot.slane %v6892_v44, %v6805_v54 }
 0x494   :  { %v3013_v17 = vadd.f32 %v3012_v13, %v3011_v7  ;;  %v3040_v18 = vrot.slane %v3039_v14, 2 }
 0x495   :  { %v3008_v19 = vrot.slane %v3007_v15, 1  ;;  %v3035_v20 = vadd.f32 %v3034_v16, %v3033_v12 }
 0x496   :  { %v3014_v21 = vrot.slane %v3013_v17, 1  ;;  %v3041_v11 = vadd.f32 %v3040_v18, %v3039_v14 }
 0x497   :  { %v3009_v10 = vadd.f32 %v3008_v19, %v3007_v15  ;;  %v3036_v22 = vrot.slane %v3035_v20, 1 }
 0x498   :  { %v3015_v23 = vadd.f32 %v3014_v21, %v3013_v17  ;;  %v3042_v24 = vrot.slane %v3041_v11, 1 }
 0x499   :  { %v3037_v25 = vadd.f32 %v3036_v22, %v3035_v20  ;;  %v3056_v26 = vmul.f32 0.125, %v3009_v10  ;;  %v3284_v10 = vld [vmem:[#allocation14 + $0x440] sm:$0xff] }
 0x49a   :  { %v3043_v27 = vadd.f32 %v3042_v24, %v3041_v11  ;;  %v3057_v28 = vmul.f32 0.125, %v3015_v23  ;;  %v3288_v22 = vld [vmem:[#allocation14 + $0x460] sm:$0xff] }
 0x49b   :  { %v3060_v29 = vmul.f32 0.125, %v3037_v25  ;;  %v3064_v30 = vmul.f32 %v3056_v26, %v3056_v26  ;;  %v3072_v2 = vsub.f32 %v2957_v56, %v3056_v26  ;;  %v3119_v56 = vrot.slane %v6892_v44, %v6796_v51  ;;  %v3285_v26 = vld [vmem:[#allocation14 + $0x448] sm:$0xff] }
 0x49c   :  { %v3061_v31 = vmul.f32 0.125, %v3043_v27  ;;  %v3065_v32 = vmul.f32 %v3057_v28, %v3057_v28  ;;  %v3073_v49 = vsub.f32 %v2959_v58, %v3057_v28  ;;  %v3289_v27 = vld [vmem:[#allocation14 + $0x468] sm:$0xff] }
 0x49d   :  { %v3068_v33 = vsub.f32 %v3060_v29, %v3064_v30 }
 0x49e   :  { %v3069_v34 = vsub.f32 %v3061_v31, %v3065_v32 }
 0x49f   :  { %v3076_v35 = vadd.f32 1e-05, %v3068_v33  ;;  %v5604_v33 = vcombine.high %v3284_v10, %v3288_v22 }
 0x4a0   :  { %v3077_v39 = vadd.f32 1e-05, %v3069_v34 }
 0x4a1   :  { %6346 = vrsqrt.f32 %v3076_v35 }
 0x4a2   :  { %6348 = vrsqrt.f32 %v3077_v39 }
 0x4aa   :  { %v2997_v45 = vpop.f32.mrb[8].mxu1 }
 0x4ab   :  { %v6347_v47 = vpop.eup %6346  ;;  %v6896_v53 = vadd.f32 %v2997_v45, %v2753_v63  ;;  %v2999_v3 = vpop.f32.mrb[9].mxu1  ;;  %v5606_v63 = vcombine.high %v3285_v26, %v3289_v27 }
 0x4ac   :  { %v6349_v59 = vpop.eup %6348  ;;  %v3084_v48 = vmul.f32 %v6347_v47, %v3072_v2  ;;  %v6900_v60 = vadd.f32 %v2999_v3, %v2757_v43  ;;  %v3001_v61 = vpop.f32.mrb[10].mxu1  ;;  %v3292_v43 = vld [vmem:[#allocation14 + $0x480] sm:$0xff]  ;;  %v3293_v47 = vld [vmem:[#allocation14 + $0x488] sm:$0xff] }
 0x4ad   :  { %v3085_v0 = vmul.f32 %v6349_v59, %v3073_v49  ;;  %v3016_v1 = vrot.slane %v6896_v53, 4  ;;  %v3030_v58 = vmul.f32 %v6896_v53, %v6896_v53  ;;  %v3002_v4 = vpop.f32.mrb[11].mxu1  ;;  %v3297_v49 = vld [vmem:[#allocation14 + $0x4a8] sm:$0xff]  ;;  %v5603_v61 = vcombine.low %v3284_v10, %v3288_v22 }
 0x4ae   :  { %v3022_v6 = vrot.slane %v6900_v60, 4  ;;  %v3031_v7 = vmul.f32 %v6900_v60, %v6900_v60  ;;  %v3110_v8 = vmul.f32 %v3093_v46, %v3084_v48  ;;  %v3296_v46 = vld [vmem:[#allocation14 + $0x4a0] sm:$0xff]  ;;  %v5614_v4 = vcombine.high %v3293_v47, %v3297_v49 }
 0x4af   :  { %v3017_v9 = vadd.f32 %v3016_v1, %v6896_v53  ;;  %v3044_v12 = vrot.slane %v3030_v58, 4  ;;  %v3111_v13 = vmul.f32 %v3097_v57, %v3085_v0 }
 0x4b0   :  { %v3023_v14 = vadd.f32 %v3022_v6, %v6900_v60  ;;  %v3050_v15 = vrot.slane %v3031_v7, 4  ;;  %v3136_v16 = vadd.f32 %v3119_v56, %v3110_v8  ;;  %v5605_v56 = vcombine.low %v3285_v26, %v3289_v27  ;;  %v3321_v26 = vld [vmem:[#allocation14 + $0x568] sm:$0xff] }
 0x4b1   :  { %v3018_v17 = vrot.slane %v3017_v9, 2  ;;  %v3045_v18 = vadd.f32 %v3044_v12, %v3030_v58  ;;  %v3137_v19 = vadd.f32 %v3123_v5, %v3111_v13  ;;  %v5612_v58 = vcombine.high %v3292_v43, %v3296_v46  ;;  %v3300_v5 = vld [vmem:[#allocation14 + $0x4c0] sm:$0xff] }
 0x4b2   :  { %v3024_v20 = vrot.slane %v3023_v14, 2  ;;  %v3051_v21 = vadd.f32 %v3050_v15, %v3031_v7  ;;  %v3140_v11 = vmax.f32 %v3136_v16, 0.0  ;;  %v5620_v13 = vcombine.high %v3300_v5, %v3304_v36  ;;  %v3308_v15 = vld [vmem:[#allocation14 + $0x500] sm:$0xff] }
 0x4b3   :  { %v3019_v23 = vadd.f32 %v3018_v17, %v3017_v9  ;;  %v3046_v24 = vrot.slane %v3045_v18, 2  ;;  %v3141_v25 = vmax.f32 %v3137_v19, 0.0  ;;  %v5613_v9 = vcombine.low %v3293_v47, %v3297_v49  ;;  %v3312_v17 = vld [vmem:[#allocation14 + $0x520] sm:$0xff]  ;;  %v3313_v19 = vld [vmem:[#allocation14 + $0x528] sm:$0xff] }
 0x4b4   :  { %v3025_v28 = vadd.f32 %v3024_v20, %v3023_v14  ;;  %v3052_v29 = vrot.slane %v3051_v21, 2  ;;  %v6916_v39 = vpack.c.bf16 %v3140_v11, %v3140_v11  ;;  %v5628_v10 = vcombine.high %v3308_v15, %v3312_v17  ;;  %v3332_v49 = vld [vmem:[#allocation14 + $0x5c0] sm:$0xff] }
 0x4b5   :  { %v3020_v30 = vrot.slane %v3019_v23, 1  ;;  %v3047_v31 = vadd.f32 %v3046_v24, %v3045_v18  ;;  %v6914_v32 = vpack.c.bf16 %v3141_v25, %v3141_v25  ;;  %v3309_v18 = vld [vmem:[#allocation14 + $0x508] sm:$0xff]  ;;  %v3320_v24 = vld [vmem:[#allocation14 + $0x560] sm:$0xff]  ;;  %v5627_v27 = vcombine.low %v3308_v15, %v3312_v17 }
 0x4b6   :  { %v3026_v34 = vrot.slane %v3025_v28, 1  ;;  %v3053_v35 = vadd.f32 %v3052_v29, %v3051_v21  ;;  %v5619_v21 = vcombine.low %v3300_v5, %v3304_v36  ;;  %v5630_v22 = vcombine.high %v3309_v18, %v3313_v19  ;;  %v3317_v25 = vld [vmem:[#allocation14 + $0x548] sm:$0xff]  ;;  %v3340_v36 = vld [vmem:[#allocation14 + $0x600] sm:$0xff] }
 0x4b7   :  { %v3021_v2 = vadd.f32 %v3020_v30, %v3019_v23  ;;  %v3048_v45 = vrot.slane %v3047_v31, 1  ;;  %4758 = vmatprep.mubr.bf16.mxu1 %v6914_v32  ;;  %4840 = vmatprep.mubr.bf16.mxu0 %v6914_v32  ;;  %v3316_v23 = vld [vmem:[#allocation14 + $0x540] sm:$0xff]  ;;  %v5638_v30 = vcombine.high %v3317_v25, %v3321_v26  ;;  %v3349_v17 = vld [vmem:[#allocation14 + $0x648] sm:$0xff] }
 0x4b8   :  { %v3027_v3 = vadd.f32 %v3026_v34, %v3025_v28  ;;  %v3054_v57 = vrot.slane %v3053_v35, 1  ;;  %4759 = vmatmul.mubr.bf16.vlgmr.msra.gmra.mrb[12].mxu1 %v6916_v39  ;;  %4841 = vmatmul.mubr.bf16.vlgmr.msra.gmra.mrb[8].mxu0 %v6916_v39  ;;  %v5629_v28 = vcombine.low %v3309_v18, %v3313_v19  ;;  %v5636_v29 = vcombine.high %v3316_v23, %v3320_v24  ;;  %v3325_v34 = vld [vmem:[#allocation14 + $0x588] sm:$0xff] }
 0x4b9   :  { %v3049_v59 = vadd.f32 %v3048_v45, %v3047_v31  ;;  %v6922_v48 = vmul.f32 0.125, %v3021_v2  ;;  %4768 = vmatpush1.bf16.msra.mxu1 %v5595_v40  ;;  %4850 = vmatpush1.bf16.msra.mxu0 %v5597_v41  ;;  %v3305_v40 = vld [vmem:[#allocation14 + $0x4e8] sm:$0xff]  ;;  %v5611_v41 = vcombine.low %v3292_v43, %v3296_v46  ;;  %v3324_v31 = vld [vmem:[#allocation14 + $0x580] sm:$0xff]  ;;  %v5637_v43 = vcombine.low %v3317_v25, %v3321_v26 }
 0x4ba   :  { %v3055_v0 = vadd.f32 %v3054_v57, %v3053_v35  ;;  %v6930_v1 = vmul.f32 0.125, %v3027_v3  ;;  %4769 = vmatprep.subr.bf16.mxu1 %v5604_v33  ;;  %4851 = vmatprep.subr.bf16.mxu0 %v5606_v63  ;;  %v5622_v14 = vcombine.high %v3301_v37, %v3305_v40  ;;  %v5621_v11 = vcombine.low %v3301_v37, %v3305_v40  ;;  %v3328_v33 = vld [vmem:[#allocation14 + $0x5a0] sm:$0xff]  ;;  %v3329_v35 = vld [vmem:[#allocation14 + $0x5a8] sm:$0xff] }
 0x4bb   :  { %v3062_v6 = vmul.f32 0.125, %v3049_v59  ;;  %v3066_v7 = vmul.f32 %v6922_v48, %v6922_v48  ;;  %v5635_v63 = vcombine.low %v3316_v23, %v3320_v24  ;;  %v3101_v2 = vrot.slane %v6886_v42, %v6799_v52  ;;  %v3336_v59 = vld [vmem:[#allocation14 + $0x5e0] sm:$0xff]  ;;  %v3353_v18 = vld [vmem:[#allocation14 + $0x668] sm:$0xff] }
 0x4bc   :  { %v3063_v8 = vmul.f32 0.125, %v3055_v0  ;;  %v3067_v38 = vmul.f32 %v6930_v1, %v6930_v1  ;;  %v3074_v45 = vsub.f32 %v6896_v53, %v6922_v48  ;;  %v5644_v46 = vcombine.high %v3324_v31, %v3328_v33  ;;  %v3344_v40 = vld [vmem:[#allocation14 + $0x620] sm:$0xff]  ;;  %v3357_v24 = vld [vmem:[#allocation14 + $0x688] sm:$0xff] }
 0x4bd   :  { %v3070_v62 = vsub.f32 %v3062_v6, %v3066_v7  ;;  %4770 = vmatpush1.bf16.msra.mxu1 %v5603_v61  ;;  %4852 = vmatpush1.bf16.msra.mxu0 %v5605_v56  ;;  %v5646_v47 = vcombine.high %v3325_v34, %v3329_v35  ;;  %v3075_v57 = vsub.f32 %v6900_v60, %v6930_v1  ;;  %v3333_v61 = vld [vmem:[#allocation14 + $0x5c8] sm:$0xff]  ;;  %v3360_v23 = vld [vmem:[#allocation14 + $0x6a0] sm:$0xff] }
 0x4be   :  { %v3071_v12 = vsub.f32 %v3063_v8, %v3067_v38  ;;  %4771 = vmatprep.subr.bf16.mxu1 %v5612_v58  ;;  %4853 = vmatprep.subr.bf16.mxu0 %v5614_v4  ;;  %v3337_v56 = vld [vmem:[#allocation14 + $0x5e8] sm:$0xff]  ;;  %v3105_v0 = vrot.slane %v6886_v42, %v6808_v55  ;;  %v5643_v5 = vcombine.low %v3324_v31, %v3328_v33  ;;  %v3368_v31 = vld [vmem:[#allocation14 + $0x6e0] sm:$0xff] }
 0x4bf   :  { %v3078_v16 = vadd.f32 1e-05, %v3070_v62  ;;  %v3127_v53 = vrot.slane %v6892_v44, %v6799_v52  ;;  %v5645_v6 = vcombine.low %v3325_v34, %v3329_v35  ;;  %v3131_v7 = vrot.slane %v6892_v44, %v6808_v55  ;;  %v3341_v8 = vld [vmem:[#allocation14 + $0x608] sm:$0xff] }
 0x4c0   :  { %v3079_v20 = vadd.f32 1e-05, %v3071_v12  ;;  %v5652_v60 = vcombine.high %v3332_v49, %v3336_v59  ;;  %v5654_v1 = vcombine.high %v3333_v61, %v3337_v56  ;;  %v3345_v38 = vld [vmem:[#allocation14 + $0x628] sm:$0xff]  ;;  %v5660_v44 = vcombine.high %v3340_v36, %v3344_v40 }
 0x4c1   :  { %6350 = vrsqrt.f32 %v3078_v16  ;;  %4772 = vmatpush1.bf16.msra.mxu1 %v5611_v41  ;;  %4854 = vmatpush1.bf16.msra.mxu0 %v5613_v9  ;;  %v5651_v41 = vcombine.low %v3332_v49, %v3336_v59  ;;  %v5653_v9 = vcombine.low %v3333_v61, %v3337_v56  ;;  %v3352_v16 = vld [vmem:[#allocation14 + $0x660] sm:$0xff]  ;;  %v3361_v25 = vld [vmem:[#allocation14 + $0x6a8] sm:$0xff] }
 0x4c2   :  { %6352 = vrsqrt.f32 %v3079_v20  ;;  %4773 = vmatprep.subr.bf16.mxu1 %v5620_v13  ;;  %4855 = vmatprep.subr.bf16.mxu0 %v5622_v14  ;;  %v5662_v13 = vcombine.high %v3341_v8, %v3345_v38  ;;  %v3348_v14 = vld [vmem:[#allocation14 + $0x640] sm:$0xff]  ;;  %v5659_v20 = vcombine.low %v3340_v36, %v3344_v40  ;;  %v3365_v33 = vld [vmem:[#allocation14 + $0x6c8] sm:$0xff] }
 0x4c3   :  { %v5667_v26 = vcombine.low %v3348_v14, %v3352_v16  ;;  %v3369_v34 = vld [vmem:[#allocation14 + $0x6e8] sm:$0xff]  ;;  %v3380_v56 = vld [vmem:[#allocation14 + $0x740] sm:$0xff] }
 0x4c4   :  { %v3377_v49 = vld [vmem:[#allocation14 + $0x728] sm:$0xff] }
 0x4c5   :  { %4774 = vmatpush1.bf16.msra.mxu1 %v5619_v21  ;;  %4856 = vmatpush1.bf16.msra.mxu0 %v5621_v11  ;;  %v5661_v21 = vcombine.low %v3341_v8, %v3345_v38  ;;  %v5668_v11 = vcombine.high %v3348_v14, %v3352_v16  ;;  %v3393_v36 = vld [vmem:[#allocation14 + $0x7a8] sm:$0xff]  ;;  %v3396_v38 = vld [vmem:[#allocation14 + $0x7c0] sm:$0xff]  ;;  %v3150_v16 = vld [vmem:[#allocation14 + $0x10] sm:$0xff] }
 0x4c6   :  { %4775 = vmatprep.subr.bf16.mxu1 %v5628_v10  ;;  %4857 = vmatprep.subr.bf16.mxu0 %v5630_v22  ;;  %v5670_v10 = vcombine.high %v3349_v17, %v3353_v18  ;;  %v3356_v22 = vld [vmem:[#allocation14 + $0x680] sm:$0xff] }
 0x4c7   :  { %v5675_v35 = vcombine.low %v3356_v22, %v3360_v23 }
 0x4c9   :  { %4776 = vmatpush1.bf16.msra.mxu1 %v5627_v27  ;;  %4858 = vmatpush1.bf16.msra.mxu0 %v5629_v28  ;;  %v5669_v27 = vcombine.low %v3349_v17, %v3353_v18  ;;  %v5676_v28 = vcombine.high %v3356_v22, %v3360_v23  ;;  %v3154_v17 = vld [vmem:[#allocation14 + $0x30] sm:$0xff]  ;;  %v3151_v18 = vld [vmem:[#allocation14 + $0x18] sm:$0xff] }
 0x4ca   :  { %4777 = vmatprep.subr.bf16.mxu1 %v5636_v29  ;;  %4859 = vmatprep.subr.bf16.mxu0 %v5638_v30  ;;  %v5678_v29 = vcombine.high %v3357_v24, %v3361_v25  ;;  %v3364_v30 = vld [vmem:[#allocation14 + $0x6c0] sm:$0xff]  ;;  %v5472_v22 = vcombine.high %v3150_v16, %v3154_v17 }
 0x4cb   :  { %v6351_v3 = vpop.eup %6350 }
 0x4cc   :  { %v6353_v58 = vpop.eup %6352  ;;  %v3086_v4 = vmul.f32 %v6351_v3, %v3074_v45  ;;  %v3372_v45 = vld [vmem:[#allocation14 + $0x700] sm:$0xff]  ;;  %v5683_v3 = vcombine.low %v3364_v30, %v3368_v31 }
 0x4cd   :  { %v3087_v48 = vmul.f32 %v6353_v58, %v3075_v57  ;;  %4778 = vmatpush1.bf16.msra.mxu1 %v5635_v63  ;;  %4860 = vmatpush1.bf16.msra.mxu0 %v5637_v43  ;;  %v5677_v63 = vcombine.low %v3357_v24, %v3361_v25  ;;  %v5684_v43 = vcombine.high %v3364_v30, %v3368_v31  ;;  %v3381_v58 = vld [vmem:[#allocation14 + $0x748] sm:$0xff]  ;;  %v3158_v24 = vld [vmem:[#allocation14 + $0x50] sm:$0xff] }
 0x4ce   :  { %4779 = vmatprep.subr.bf16.mxu1 %v5644_v46  ;;  %4861 = vmatprep.subr.bf16.mxu0 %v5646_v47  ;;  %v3112_v37 = vmul.f32 %v3101_v2, %v3086_v4  ;;  %v5686_v2 = vcombine.high %v3365_v33, %v3369_v34  ;;  %v3376_v46 = vld [vmem:[#allocation14 + $0x720] sm:$0xff]  ;;  %v3373_v47 = vld [vmem:[#allocation14 + $0x708] sm:$0xff]  ;;  %v5685_v57 = vcombine.low %v3365_v33, %v3369_v34  ;;  %v3162_v25 = vld [vmem:[#allocation14 + $0x70] sm:$0xff] }
 0x4cf   :  { %v3113_v42 = vmul.f32 %v3105_v0, %v3087_v48  ;;  %v5692_v59 = vcombine.high %v3372_v45, %v3376_v46  ;;  %v5694_v61 = vcombine.high %v3373_v47, %v3377_v49  ;;  %v3384_v0 = vld [vmem:[#allocation14 + $0x760] sm:$0xff]  ;;  %v3385_v4 = vld [vmem:[#allocation14 + $0x768] sm:$0xff]  ;;  %v5480_v31 = vcombine.high %v3158_v24, %v3162_v25  ;;  %v3166_v34 = vld [vmem:[#allocation14 + $0x90] sm:$0xff] }
 0x4d0   :  { %v6948_v62 = vadd.f32 %v3127_v53, %v3112_v37  ;;  %v5693_v53 = vcombine.low %v3373_v47, %v3377_v49  ;;  %v5700_v48 = vcombine.high %v3380_v56, %v3384_v0  ;;  %v5699_v37 = vcombine.low %v3380_v56, %v3384_v0  ;;  %v3174_v47 = vld [vmem:[#allocation14 + $0xd0] sm:$0xff] }
 0x4d1   :  { %4780 = vmatpush1.bf16.msra.mxu1 %v5643_v5  ;;  %4862 = vmatpush1.bf16.msra.mxu0 %v5645_v6  ;;  %v3139_v12 = vadd.f32 %v3131_v7, %v3113_v42  ;;  %v5691_v5 = vcombine.low %v3372_v45, %v3376_v46  ;;  %v5702_v6 = vcombine.high %v3381_v58, %v3385_v4  ;;  %v3388_v7 = vld [vmem:[#allocation14 + $0x780] sm:$0xff]  ;;  %v3178_v49 = vld [vmem:[#allocation14 + $0xf0] sm:$0xff] }
 0x4d2   :  { %4781 = vmatprep.subr.bf16.mxu1 %v5652_v60  ;;  %4863 = vmatprep.subr.bf16.mxu0 %v5654_v1  ;;  %v3392_v60 = vld [vmem:[#allocation14 + $0x7a0] sm:$0xff]  ;;  %v3389_v1 = vld [vmem:[#allocation14 + $0x788] sm:$0xff]  ;;  %v5701_v42 = vcombine.low %v3381_v58, %v3385_v4  ;;  %v5496_v56 = vcombine.high %v3174_v47, %v3178_v49  ;;  %v3182_v58 = vld [vmem:[#allocation14 + $0x110] sm:$0xff] }
 0x4d3   :  { %v3143_v15 = vmax.f32 %v3139_v12, 0.0  ;;  %v5708_v40 = vcombine.high %v3388_v7, %v3392_v60  ;;  %v5710_v8 = vcombine.high %v3389_v1, %v3393_v36  ;;  %v3401_v12 = vld [vmem:[#allocation14 + $0x7e8] sm:$0xff]  ;;  %v3186_v4 = vld [vmem:[#allocation14 + $0x130] sm:$0xff] }
 0x4d5   :  { %4782 = vmatpush1.bf16.msra.mxu1 %v5651_v41  ;;  %4864 = vmatpush1.bf16.msra.mxu0 %v5653_v9  ;;  %v6950_v19 = vpack.c.bf16 %v3143_v15, %v3143_v15  ;;  %v3400_v41 = vld [vmem:[#allocation14 + $0x7e0] sm:$0xff]  ;;  %v3397_v9 = vld [vmem:[#allocation14 + $0x7c8] sm:$0xff] }
 0x4d6   :  { %4783 = vmatprep.subr.bf16.mxu1 %v5660_v44  ;;  %4865 = vmatprep.subr.bf16.mxu0 %v5662_v13  ;;  %v5707_v44 = vcombine.low %v3388_v7, %v3392_v60  ;;  %v5709_v13 = vcombine.low %v3389_v1, %v3393_v36  ;;  %v5716_v14 = vcombine.high %v3396_v38, %v3400_v41  ;;  %v3190_v60 = vld [vmem:[#allocation14 + $0x150] sm:$0xff]  ;;  %v3191_v36 = vld [vmem:[#allocation14 + $0x158] sm:$0xff] }
 0x4d7   :  { %4799 = vmatprep.mubr.bf16.mxu1 %v6950_v19  ;;  %4881 = vmatprep.mubr.bf16.mxu0 %v6950_v19  ;;  %v5718_v15 = vcombine.high %v3397_v9, %v3401_v12  ;;  %v3194_v1 = vld [vmem:[#allocation14 + $0x170] sm:$0xff] }
 0x4d9   :  { %4784 = vmatpush1.bf16.msra.mxu1 %v5659_v20  ;;  %4866 = vmatpush1.bf16.msra.mxu0 %v5661_v21  ;;  %v3155_v20 = vld [vmem:[#allocation14 + $0x38] sm:$0xff]  ;;  %v5715_v21 = vcombine.low %v3396_v38, %v3400_v41  ;;  %v3198_v41 = vld [vmem:[#allocation14 + $0x190] sm:$0xff] }
 0x4da   :  { %4785 = vmatprep.subr.bf16.mxu1 %v5668_v11  ;;  %4867 = vmatprep.subr.bf16.mxu0 %v5670_v10  ;;  %v5717_v11 = vcombine.low %v3397_v9, %v3401_v12  ;;  %v3142_v10 = vmax.f32 %v6948_v62, 0.0  ;;  %v5474_v23 = vcombine.high %v3151_v18, %v3155_v20  ;;  %v5473_v30 = vcombine.low %v3151_v18, %v3155_v20  ;;  %v3167_v62 = vld [vmem:[#allocation14 + $0x98] sm:$0xff]  ;;  %v3202_v9 = vld [vmem:[#allocation14 + $0x1b0] sm:$0xff] }
 0x4db   :  { %v3199_v12 = vld [vmem:[#allocation14 + $0x198] sm:$0xff]  ;;  %v3210_v18 = vld [vmem:[#allocation14 + $0x1f0] sm:$0xff] }
 0x4dc   :  { %v3207_v20 = vld [vmem:[#allocation14 + $0x1d8] sm:$0xff] }
 0x4dd   :  { %4786 = vmatpush1.bf16.msra.mxu1 %v5667_v26  ;;  %4868 = vmatpush1.bf16.msra.mxu0 %v5669_v27  ;;  %v3159_v26 = vld [vmem:[#allocation14 + $0x58] sm:$0xff] }
 0x4de   :  { %4787 = vmatprep.subr.bf16.mxu1 %v5676_v28  ;;  %4869 = vmatprep.subr.bf16.mxu0 %v5678_v29  ;;  %v3163_v27 = vld [vmem:[#allocation14 + $0x78] sm:$0xff]  ;;  %v5471_v28 = vcombine.low %v3150_v16, %v3154_v17  ;;  %v6955_v29 = vpack.c.bf16 %v3142_v10, %v3142_v10  ;;  %v3206_v17 = vld [vmem:[#allocation14 + $0x1d0] sm:$0xff] }
 0x4df   :  { %v5482_v33 = vcombine.high %v3159_v26, %v3163_v27 }
 0x4e1   :  { %4788 = vmatpush1.bf16.msra.mxu1 %v5675_v35  ;;  %4870 = vmatpush1.bf16.msra.mxu0 %v5677_v63  ;;  %v3170_v35 = vld [vmem:[#allocation14 + $0xb0] sm:$0xff]  ;;  %v3171_v63 = vld [vmem:[#allocation14 + $0xb8] sm:$0xff] }
 0x4e2   :  { %4789 = vmatprep.subr.bf16.mxu1 %v5684_v43  ;;  %4871 = vmatprep.subr.bf16.mxu0 %v5686_v2  ;;  %v5479_v43 = vcombine.low %v3158_v24, %v3162_v25  ;;  %v5481_v2 = vcombine.low %v3159_v26, %v3163_v27  ;;  %v5488_v45 = vcombine.high %v3166_v34, %v3170_v35  ;;  %v3214_v24 = vld [vmem:[#allocation14 + $0x210] sm:$0xff]  ;;  %v3215_v26 = vld [vmem:[#allocation14 + $0x218] sm:$0xff] }
 0x4e3   :  { %v5490_v46 = vcombine.high %v3167_v62, %v3171_v63  ;;  %v3218_v25 = vld [vmem:[#allocation14 + $0x230] sm:$0xff]  ;;  %v3219_v27 = vld [vmem:[#allocation14 + $0x238] sm:$0xff] }
 0x4e5   :  { %4790 = vmatpush1.bf16.msra.mxu1 %v5683_v3  ;;  %4872 = vmatpush1.bf16.msra.mxu0 %v5685_v57  ;;  %v3175_v3 = vld [vmem:[#allocation14 + $0xd8] sm:$0xff] }
 0x4e6   :  { %4791 = vmatprep.subr.bf16.mxu1 %v5692_v59  ;;  %4873 = vmatprep.subr.bf16.mxu0 %v5694_v61  ;;  %v3179_v57 = vld [vmem:[#allocation14 + $0xf8] sm:$0xff]  ;;  %v5487_v59 = vcombine.low %v3166_v34, %v3170_v35  ;;  %v5489_v61 = vcombine.low %v3167_v62, %v3171_v63  ;;  %v3222_v34 = vld [vmem:[#allocation14 + $0x250] sm:$0xff] }
 0x4e7   :  { %v5498_v0 = vcombine.high %v3175_v3, %v3179_v57  ;;  %v3226_v35 = vld [vmem:[#allocation14 + $0x270] sm:$0xff]  ;;  %v3223_v62 = vld [vmem:[#allocation14 + $0x258] sm:$0xff] }
 0x4e8   :  { %v3227_v63 = vld [vmem:[#allocation14 + $0x278] sm:$0xff] }
 0x4e9   :  { %4792 = vmatpush1.bf16.msra.mxu1 %v5691_v5  ;;  %4874 = vmatpush1.bf16.msra.mxu0 %v5693_v53  ;;  %v3187_v5 = vld [vmem:[#allocation14 + $0x138] sm:$0xff]  ;;  %v5495_v53 = vcombine.low %v3174_v47, %v3178_v49  ;;  %v3230_v47 = vld [vmem:[#allocation14 + $0x290] sm:$0xff] }
 0x4ea   :  { %4793 = vmatprep.subr.bf16.mxu1 %v5700_v48  ;;  %4875 = vmatprep.subr.bf16.mxu0 %v5702_v6  ;;  %v5497_v48 = vcombine.low %v3175_v3, %v3179_v57  ;;  %v5504_v6 = vcombine.high %v3182_v58, %v3186_v4  ;;  %v3234_v49 = vld [vmem:[#allocation14 + $0x2b0] sm:$0xff]  ;;  %v3231_v3 = vld [vmem:[#allocation14 + $0x298] sm:$0xff] }
 0x4eb   :  { %v3235_v57 = vld [vmem:[#allocation14 + $0x2b8] sm:$0xff] }
 0x4ed   :  { %4794 = vmatpush1.bf16.msra.mxu1 %v5699_v37  ;;  %4876 = vmatpush1.bf16.msra.mxu0 %v5701_v42  ;;  %v3195_v37 = vld [vmem:[#allocation14 + $0x178] sm:$0xff]  ;;  %v5503_v42 = vcombine.low %v3182_v58, %v3186_v4  ;;  %v3238_v58 = vld [vmem:[#allocation14 + $0x2d0] sm:$0xff] }
 0x4ee   :  { %4795 = vmatprep.subr.bf16.mxu1 %v5708_v40  ;;  %4877 = vmatprep.subr.bf16.mxu0 %v5710_v8  ;;  %v5512_v8 = vcombine.high %v3190_v60, %v3194_v1  ;;  %v5514_v38 = vcombine.high %v3191_v36, %v3195_v37  ;;  %v3242_v4 = vld [vmem:[#allocation14 + $0x2f0] sm:$0xff] }
 0x4f1   :  { %4796 = vmatpush1.bf16.msra.mxu1 %v5707_v44  ;;  %4878 = vmatpush1.bf16.msra.mxu0 %v5709_v13  ;;  %v3203_v44 = vld [vmem:[#allocation14 + $0x1b8] sm:$0xff]  ;;  %v5511_v13 = vcombine.low %v3190_v60, %v3194_v1  ;;  %v3246_v60 = vld [vmem:[#allocation14 + $0x310] sm:$0xff] }
 0x4f2   :  { %4797 = vmatprep.subr.bf16.mxu1 %v5716_v14  ;;  %4879 = vmatprep.subr.bf16.mxu0 %v5718_v15  ;;  %v5513_v14 = vcombine.low %v3191_v36, %v3195_v37  ;;  %v5520_v15 = vcombine.high %v3198_v41, %v3202_v9  ;;  %v5522_v16 = vcombine.high %v3199_v12, %v3203_v44  ;;  %v3250_v1 = vld [vmem:[#allocation14 + $0x330] sm:$0xff]  ;;  %v3247_v36 = vld [vmem:[#allocation14 + $0x318] sm:$0xff] }
 0x4f3   :  { %v5521_v10 = vcombine.low %v3199_v12, %v3203_v44  ;;  %v3251_v37 = vld [vmem:[#allocation14 + $0x338] sm:$0xff] }
 0x4f4   :  { %v3255_v12 = vld [vmem:[#allocation14 + $0x358] sm:$0xff] }
 0x4f5   :  { %4798 = vmatpush1.bf16.msra.mxu1 %v5715_v21  ;;  %4880 = vmatpush1.bf16.msra.mxu0 %v5717_v11  ;;  %v3211_v21 = vld [vmem:[#allocation14 + $0x1f8] sm:$0xff]  ;;  %v5519_v11 = vcombine.low %v3198_v41, %v3202_v9  ;;  %v3254_v41 = vld [vmem:[#allocation14 + $0x350] sm:$0xff] }
 0x4f6   :  { %4890 = vmatprep.subr.bf16.mxu1 %v5472_v22  ;;  %4972 = vmatprep.subr.bf16.mxu0 %v5474_v23  ;;  %v5528_v22 = vcombine.high %v3206_v17, %v3210_v18  ;;  %v5530_v23 = vcombine.high %v3207_v20, %v3211_v21  ;;  %v3258_v9 = vld [vmem:[#allocation14 + $0x370] sm:$0xff]  ;;  %v3259_v44 = vld [vmem:[#allocation14 + $0x378] sm:$0xff] }
 0x4f8   :  { %4800 = vmatmul.mubr.bf16.vlgmr.msra.gmra.mrb[12].mxu1 %v6955_v29  ;;  %4882 = vmatmul.mubr.bf16.vlgmr.msra.gmra.mrb[8].mxu0 %v6955_v29 }
 0x4f9   :  { %4891 = vmatpush1.bf16.msra.mxu1 %v5471_v28  ;;  %4922 = vmatprep.mubr.bf16.mxu1 %v6914_v32  ;;  %v5527_v28 = vcombine.low %v3206_v17, %v3210_v18  ;;  %v3262_v17 = vld [vmem:[#allocation14 + $0x390] sm:$0xff] }
 0x4fa   :  { %4973 = vmatpush1.bf16.msra.mxu0 %v5473_v30  ;;  %5004 = vmatprep.mubr.bf16.mxu0 %v6914_v32  ;;  %v3183_v32 = vld [vmem:[#allocation14 + $0x118] sm:$0xff]  ;;  %v5529_v30 = vcombine.low %v3207_v20, %v3211_v21  ;;  %v3266_v18 = vld [vmem:[#allocation14 + $0x3b0] sm:$0xff] }
 0x4fb   :  { %4892 = vmatprep.subr.bf16.mxu1 %v5480_v31  ;;  %4974 = vmatprep.subr.bf16.mxu0 %v5482_v33  ;;  %v5506_v7 = vcombine.high %v3183_v32, %v3187_v5  ;;  %v5505_v40 = vcombine.low %v3183_v32, %v3187_v5  ;;  %v5536_v31 = vcombine.high %v3214_v24, %v3218_v25  ;;  %v3239_v32 = vld [vmem:[#allocation14 + $0x2d8] sm:$0xff] }
 0x4fc   :  { %v5538_v33 = vcombine.high %v3215_v26, %v3219_v27  ;;  %v3243_v5 = vld [vmem:[#allocation14 + $0x2f8] sm:$0xff] }
 0x4fd   :  { %4893 = vmatpush1.bf16.msra.mxu1 %v5479_v43  ;;  %v5535_v43 = vcombine.low %v3214_v24, %v3218_v25  ;;  %v3263_v20 = vld [vmem:[#allocation14 + $0x398] sm:$0xff]  ;;  %v3270_v24 = vld [vmem:[#allocation14 + $0x3d0] sm:$0xff] }
 0x4fe   :  { %4975 = vmatpush1.bf16.msra.mxu0 %v5481_v2  ;;  %4894 = vmatprep.subr.bf16.mxu1 %v5488_v45  ;;  %v5537_v2 = vcombine.low %v3215_v26, %v3219_v27  ;;  %v5544_v45 = vcombine.high %v3222_v34, %v3226_v35  ;;  %v3267_v21 = vld [vmem:[#allocation14 + $0x3b8] sm:$0xff]  ;;  %v3274_v25 = vld [vmem:[#allocation14 + $0x3f0] sm:$0xff] }
 0x4ff   :  { %4976 = vmatprep.subr.bf16.mxu0 %v5490_v46  ;;  %v5546_v46 = vcombine.high %v3223_v62, %v3227_v63  ;;  %v3271_v26 = vld [vmem:[#allocation14 + $0x3d8] sm:$0xff] }
 0x500   :  { %v3275_v27 = vld [vmem:[#allocation14 + $0x3f8] sm:$0xff] }
 0x501   :  { %4895 = vmatpush1.bf16.msra.mxu1 %v5487_v59  ;;  %v5543_v59 = vcombine.low %v3222_v34, %v3226_v35  ;;  %v3278_v34 = vld [vmem:[#allocation14 + $0x410] sm:$0xff] }
 0x502   :  { %4977 = vmatpush1.bf16.msra.mxu0 %v5489_v61  ;;  %4896 = vmatprep.subr.bf16.mxu1 %v5496_v56  ;;  %v5545_v61 = vcombine.low %v3223_v62, %v3227_v63  ;;  %v5552_v56 = vcombine.high %v3230_v47, %v3234_v49  ;;  %v3282_v35 = vld [vmem:[#allocation14 + $0x430] sm:$0xff]  ;;  %v3279_v62 = vld [vmem:[#allocation14 + $0x418] sm:$0xff] }
 0x503   :  { %4978 = vmatprep.subr.bf16.mxu0 %v5498_v0  ;;  %v5554_v0 = vcombine.high %v3231_v3, %v3235_v57  ;;  %v3283_v63 = vld [vmem:[#allocation14 + $0x438] sm:$0xff] }
 0x505   :  { %4897 = vmatpush1.bf16.msra.mxu1 %v5495_v53  ;;  %v5551_v53 = vcombine.low %v3230_v47, %v3234_v49  ;;  %v3286_v47 = vld [vmem:[#allocation14 + $0x450] sm:$0xff] }
 0x506   :  { %4979 = vmatpush1.bf16.msra.mxu0 %v5497_v48  ;;  %4898 = vmatprep.subr.bf16.mxu1 %v5504_v6  ;;  %v5553_v48 = vcombine.low %v3231_v3, %v3235_v57  ;;  %v5560_v6 = vcombine.high %v3238_v58, %v3242_v4  ;;  %v3290_v49 = vld [vmem:[#allocation14 + $0x470] sm:$0xff]  ;;  %v5599_v3 = vcombine.low %v3278_v34, %v3282_v35  ;;  %v3287_v57 = vld [vmem:[#allocation14 + $0x458] sm:$0xff] }
 0x507   :  { %4980 = vmatprep.subr.bf16.mxu0 %v5506_v7  ;;  %v5562_v7 = vcombine.high %v3239_v32, %v3243_v5 }
 0x509   :  { %4899 = vmatpush1.bf16.msra.mxu1 %v5503_v42  ;;  %v5559_v42 = vcombine.low %v3238_v58, %v3242_v4  ;;  %v3298_v58 = vld [vmem:[#allocation14 + $0x4b0] sm:$0xff] }
 0x50a   :  { %4981 = vmatpush1.bf16.msra.mxu0 %v5505_v40  ;;  %4900 = vmatprep.subr.bf16.mxu1 %v5512_v8  ;;  %v5561_v40 = vcombine.low %v3239_v32, %v3243_v5  ;;  %v5568_v8 = vcombine.high %v3246_v60, %v3250_v1  ;;  %v3295_v32 = vld [vmem:[#allocation14 + $0x498] sm:$0xff] }
 0x50b   :  { %4982 = vmatprep.subr.bf16.mxu0 %v5514_v38  ;;  %v5570_v38 = vcombine.high %v3247_v36, %v3251_v37  ;;  %v3299_v5 = vld [vmem:[#allocation14 + $0x4b8] sm:$0xff] }
 0x50d   :  { %4901 = vmatpush1.bf16.msra.mxu1 %v5511_v13  ;;  %v5567_v13 = vcombine.low %v3246_v60, %v3250_v1  ;;  %v3302_v60 = vld [vmem:[#allocation14 + $0x4d0] sm:$0xff] }
 0x50e   :  { %4983 = vmatpush1.bf16.msra.mxu0 %v5513_v14  ;;  %4902 = vmatprep.subr.bf16.mxu1 %v5520_v15  ;;  %v5569_v14 = vcombine.low %v3247_v36, %v3251_v37  ;;  %v5576_v15 = vcombine.high %v3254_v41, %v3258_v9  ;;  %v3306_v1 = vld [vmem:[#allocation14 + $0x4f0] sm:$0xff]  ;;  %v3303_v36 = vld [vmem:[#allocation14 + $0x4d8] sm:$0xff] }
 0x50f   :  { %4984 = vmatprep.subr.bf16.mxu0 %v5522_v16  ;;  %v5578_v16 = vcombine.high %v3255_v12, %v3259_v44  ;;  %v3307_v37 = vld [vmem:[#allocation14 + $0x4f8] sm:$0xff] }
 0x511   :  { %4903 = vmatpush1.bf16.msra.mxu1 %v5519_v11  ;;  %v5575_v11 = vcombine.low %v3254_v41, %v3258_v9  ;;  %v3314_v41 = vld [vmem:[#allocation14 + $0x530] sm:$0xff]  ;;  %v3311_v9 = vld [vmem:[#allocation14 + $0x518] sm:$0xff] }
 0x512   :  { %4985 = vmatpush1.bf16.msra.mxu0 %v5521_v10  ;;  %4904 = vmatprep.subr.bf16.mxu1 %v5528_v22  ;;  %v5577_v10 = vcombine.low %v3255_v12, %v3259_v44  ;;  %v5584_v22 = vcombine.high %v3262_v17, %v3266_v18  ;;  %v3315_v12 = vld [vmem:[#allocation14 + $0x538] sm:$0xff]  ;;  %v5625_v44 = vcombine.low %v3303_v36, %v3307_v37 }
 0x513   :  { %4986 = vmatprep.subr.bf16.mxu0 %v5530_v23  ;;  %v5586_v23 = vcombine.high %v3263_v20, %v3267_v21 }
 0x515   :  { %4905 = vmatpush1.bf16.msra.mxu1 %v5527_v28  ;;  %v5583_v28 = vcombine.low %v3262_v17, %v3266_v18  ;;  %v3319_v17 = vld [vmem:[#allocation14 + $0x558] sm:$0xff] }
 0x516   :  { %4987 = vmatpush1.bf16.msra.mxu0 %v5529_v30  ;;  %4906 = vmatprep.subr.bf16.mxu1 %v5536_v31  ;;  %v5585_v30 = vcombine.low %v3263_v20, %v3267_v21  ;;  %v5592_v31 = vcombine.high %v3270_v24, %v3274_v25  ;;  %v3323_v18 = vld [vmem:[#allocation14 + $0x578] sm:$0xff]  ;;  %v5633_v21 = vcombine.low %v3311_v9, %v3315_v12 }
 0x517   :  { %4988 = vmatprep.subr.bf16.mxu0 %v5538_v33  ;;  %v5594_v33 = vcombine.high %v3271_v26, %v3275_v27 }
 0x519   :  { %4907 = vmatpush1.bf16.msra.mxu1 %v5535_v43  ;;  %v5591_v43 = vcombine.low %v3270_v24, %v3274_v25  ;;  %v3327_v24 = vld [vmem:[#allocation14 + $0x598] sm:$0xff] }
 0x51a   :  { %4989 = vmatpush1.bf16.msra.mxu0 %v5537_v2  ;;  %4908 = vmatprep.subr.bf16.mxu1 %v5544_v45  ;;  %v5593_v2 = vcombine.low %v3271_v26, %v3275_v27  ;;  %v5600_v45 = vcombine.high %v3278_v34, %v3282_v35  ;;  %v3331_v25 = vld [vmem:[#allocation14 + $0x5b8] sm:$0xff]  ;;  %v5641_v27 = vcombine.low %v3319_v17, %v3323_v18 }
 0x51b   :  { %4990 = vmatprep.subr.bf16.mxu0 %v5546_v46  ;;  %v5602_v46 = vcombine.high %v3279_v62, %v3283_v63  ;;  %v3335_v34 = vld [vmem:[#allocation14 + $0x5d8] sm:$0xff] }
 0x51c   :  { %v3339_v35 = vld [vmem:[#allocation14 + $0x5f8] sm:$0xff] }
 0x51d   :  { %4909 = vmatpush1.bf16.msra.mxu1 %v5543_v59  ;;  %v3291_v59 = vld [vmem:[#allocation14 + $0x478] sm:$0xff] }
 0x51e   :  { %4991 = vmatpush1.bf16.msra.mxu0 %v5545_v61  ;;  %4910 = vmatprep.subr.bf16.mxu1 %v5552_v56  ;;  %v5601_v61 = vcombine.low %v3279_v62, %v3283_v63  ;;  %v5608_v56 = vcombine.high %v3286_v47, %v3290_v49  ;;  %v5610_v4 = vcombine.high %v3287_v57, %v3291_v59 }
 0x51f   :  { %4992 = vmatprep.subr.bf16.mxu0 %v5554_v0  ;;  %v3294_v0 = vld [vmem:[#allocation14 + $0x490] sm:$0xff]  ;;  %v5649_v63 = vcombine.low %v3327_v24, %v3331_v25 }
 0x521   :  { %4911 = vmatpush1.bf16.msra.mxu1 %v5551_v53  ;;  %v5607_v53 = vcombine.low %v3286_v47, %v3290_v49  ;;  %v3343_v47 = vld [vmem:[#allocation14 + $0x618] sm:$0xff] }
 0x522   :  { %4993 = vmatpush1.bf16.msra.mxu0 %v5553_v48  ;;  %4912 = vmatprep.subr.bf16.mxu1 %v5560_v6  ;;  %v5609_v48 = vcombine.low %v3287_v57, %v3291_v59  ;;  %v5616_v6 = vcombine.high %v3294_v0, %v3298_v58  ;;  %v3347_v49 = vld [vmem:[#allocation14 + $0x638] sm:$0xff]  ;;  %v5657_v57 = vcombine.low %v3335_v34, %v3339_v35 }
 0x523   :  { %4994 = vmatprep.subr.bf16.mxu0 %v5562_v7  ;;  %v5618_v7 = vcombine.high %v3295_v32, %v3299_v5 }
 0x525   :  { %4913 = vmatpush1.bf16.msra.mxu1 %v5559_v42  ;;  %v5615_v42 = vcombine.low %v3294_v0, %v3298_v58  ;;  %v3354_v0 = vld [vmem:[#allocation14 + $0x670] sm:$0xff]  ;;  %v3351_v58 = vld [vmem:[#allocation14 + $0x658] sm:$0xff] }
 0x526   :  { %4995 = vmatpush1.bf16.msra.mxu0 %v5561_v40  ;;  %4914 = vmatprep.subr.bf16.mxu1 %v5568_v8  ;;  %v5624_v40 = vcombine.high %v3302_v60, %v3306_v1  ;;  %v5626_v8 = vcombine.high %v3303_v36, %v3307_v37 }
 0x527   :  { %4996 = vmatprep.subr.bf16.mxu0 %v5570_v38  ;;  %v3310_v38 = vld [vmem:[#allocation14 + $0x510] sm:$0xff] }
 0x528   :  { %v5631_v20 = vcombine.low %v3310_v38, %v3314_v41 }
 0x529   :  { %4915 = vmatpush1.bf16.msra.mxu1 %v5567_v13  ;;  %v5632_v13 = vcombine.high %v3310_v38, %v3314_v41  ;;  %v3367_v38 = vld [vmem:[#allocation14 + $0x6d8] sm:$0xff] }
 0x52a   :  { %4997 = vmatpush1.bf16.msra.mxu0 %v5569_v14  ;;  %4916 = vmatprep.subr.bf16.mxu1 %v5576_v15  ;;  %v5634_v14 = vcombine.high %v3311_v9, %v3315_v12  ;;  %v3318_v15 = vld [vmem:[#allocation14 + $0x550] sm:$0xff]  ;;  %v3371_v41 = vld [vmem:[#allocation14 + $0x6f8] sm:$0xff] }
 0x52b   :  { %4998 = vmatprep.subr.bf16.mxu0 %v5578_v16  ;;  %v3322_v16 = vld [vmem:[#allocation14 + $0x570] sm:$0xff] }
 0x52c   :  { %v5639_v26 = vcombine.low %v3318_v15, %v3322_v16 }
 0x52d   :  { %4917 = vmatpush1.bf16.msra.mxu1 %v5575_v11  ;;  %v5640_v11 = vcombine.high %v3318_v15, %v3322_v16  ;;  %v3375_v15 = vld [vmem:[#allocation14 + $0x718] sm:$0xff] }
 0x52e   :  { %4999 = vmatpush1.bf16.msra.mxu0 %v5577_v10  ;;  %4918 = vmatprep.subr.bf16.mxu1 %v5584_v22  ;;  %v5642_v10 = vcombine.high %v3319_v17, %v3323_v18  ;;  %v3326_v22 = vld [vmem:[#allocation14 + $0x590] sm:$0xff]  ;;  %v3379_v16 = vld [vmem:[#allocation14 + $0x738] sm:$0xff]  ;;  %v5689_v18 = vcombine.low %v3367_v38, %v3371_v41 }
 0x52f   :  { %5000 = vmatprep.subr.bf16.mxu0 %v5586_v23  ;;  %v3330_v23 = vld [vmem:[#allocation14 + $0x5b0] sm:$0xff] }
 0x530   :  { %v5647_v62 = vcombine.low %v3326_v22, %v3330_v23 }
 0x531   :  { %4919 = vmatpush1.bf16.msra.mxu1 %v5583_v28  ;;  %v5648_v28 = vcombine.high %v3326_v22, %v3330_v23  ;;  %v3383_v22 = vld [vmem:[#allocation14 + $0x758] sm:$0xff] }
 0x532   :  { %5001 = vmatpush1.bf16.msra.mxu0 %v5585_v30  ;;  %4920 = vmatprep.subr.bf16.mxu1 %v5592_v31  ;;  %v5650_v30 = vcombine.high %v3327_v24, %v3331_v25  ;;  %v3334_v31 = vld [vmem:[#allocation14 + $0x5d0] sm:$0xff]  ;;  %v3387_v23 = vld [vmem:[#allocation14 + $0x778] sm:$0xff]  ;;  %v5697_v25 = vcombine.low %v3375_v15, %v3379_v16 }
 0x533   :  { %5002 = vmatprep.subr.bf16.mxu0 %v5594_v33  ;;  %v3338_v33 = vld [vmem:[#allocation14 + $0x5f0] sm:$0xff] }
 0x535   :  { %4921 = vmatpush1.bf16.msra.mxu1 %v5591_v43  ;;  %v5656_v43 = vcombine.high %v3334_v31, %v3338_v33 }
 0x536   :  { %5003 = vmatpush1.bf16.msra.mxu0 %v5593_v2  ;;  %4931 = vmatprep.subr.bf16.mxu1 %v5600_v45  ;;  %v5658_v2 = vcombine.high %v3335_v34, %v3339_v35  ;;  %v3342_v45 = vld [vmem:[#allocation14 + $0x610] sm:$0xff]  ;;  %v5705_v35 = vcombine.low %v3383_v22, %v3387_v23 }
 0x537   :  { %5013 = vmatprep.subr.bf16.mxu0 %v5602_v46  ;;  %v3346_v46 = vld [vmem:[#allocation14 + $0x630] sm:$0xff] }
 0x538   :  { %4923 = vmatmul.mubr.bf16.vlgmr.msra.gmra.mrb[16].mxu1 %v6916_v39  ;;  %v5664_v59 = vcombine.high %v3342_v45, %v3346_v46 }
 0x539   :  { %5005 = vmatmul.mubr.bf16.vlgmr.msra.gmra.mrb[12].mxu0 %v6916_v39  ;;  %4932 = vmatpush1.bf16.msra.mxu1 %v5599_v3  ;;  %v5617_v39 = vcombine.low %v3295_v32, %v3299_v5  ;;  %v5655_v3 = vcombine.low %v3334_v31, %v3338_v33  ;;  %v5663_v32 = vcombine.low %v3342_v45, %v3346_v46  ;;  %v3391_v31 = vld [vmem:[#allocation14 + $0x798] sm:$0xff] }
 0x53a   :  { %4963 = vmatprep.mubr.bf16.mxu1 %v6950_v19  ;;  %5014 = vmatpush1.bf16.msra.mxu0 %v5601_v61  ;;  %v5666_v61 = vcombine.high %v3343_v47, %v3347_v49  ;;  %v5665_v5 = vcombine.low %v3343_v47, %v3347_v49  ;;  %v3395_v33 = vld [vmem:[#allocation14 + $0x7b8] sm:$0xff] }
 0x53b   :  { %5045 = vmatprep.mubr.bf16.mxu0 %v6950_v19  ;;  %4933 = vmatprep.subr.bf16.mxu1 %v5608_v56  ;;  %v5623_v19 = vcombine.low %v3302_v60, %v3306_v1  ;;  %v3350_v56 = vld [vmem:[#allocation14 + $0x650] sm:$0xff]  ;;  %v3359_v60 = vld [vmem:[#allocation14 + $0x698] sm:$0xff]  ;;  %v5713_v49 = vcombine.low %v3391_v31, %v3395_v33 }
 0x53c   :  { %5015 = vmatprep.subr.bf16.mxu0 %v5610_v4  ;;  %v3355_v4 = vld [vmem:[#allocation14 + $0x678] sm:$0xff]  ;;  %v5671_v36 = vcombine.low %v3350_v56, %v3354_v0 }
 0x53d   :  { %4934 = vmatpush1.bf16.msra.mxu1 %v5607_v53  ;;  %v5672_v53 = vcombine.high %v3350_v56, %v3354_v0  ;;  %v3363_v1 = vld [vmem:[#allocation14 + $0x6b8] sm:$0xff]  ;;  %v5673_v37 = vcombine.low %v3351_v58, %v3355_v4 }
 0x53e   :  { %5016 = vmatpush1.bf16.msra.mxu0 %v5609_v48  ;;  %4935 = vmatprep.subr.bf16.mxu1 %v5616_v6  ;;  %v5674_v48 = vcombine.high %v3351_v58, %v3355_v4  ;;  %v3358_v6 = vld [vmem:[#allocation14 + $0x690] sm:$0xff]  ;;  %v5681_v12 = vcombine.low %v3359_v60, %v3363_v1  ;;  %v3399_v45 = vld [vmem:[#allocation14 + $0x7d8] sm:$0xff] }
 0x53f   :  { %5017 = vmatprep.subr.bf16.mxu0 %v5618_v7  ;;  %v3362_v7 = vld [vmem:[#allocation14 + $0x6b0] sm:$0xff]  ;;  %v3403_v46 = vld [vmem:[#allocation14 + $0x7f8] sm:$0xff] }
 0x540   :  { %v5679_v9 = vcombine.low %v3358_v6, %v3362_v7  ;;  %v3404_v56 = vld [vmem:[%s7027_s13] sm:$0xff]  ;;  %s6590_s13 = smov [#allocation16]  }
 0x541   :  { %4936 = vmatpush1.bf16.msra.mxu1 %v5615_v42  ;;  %v5680_v42 = vcombine.high %v3358_v6, %v3362_v7  ;;  %v3409_v0 = vrot.slane %v3404_v56, %v6796_v51  ;;  %v3417_v58 = vrot.slane %v3404_v56, %v6799_v52  ;;  %v3413_v4 = vrot.slane %v3404_v56, %v6805_v54  ;;  %s5078_s18 = sshll.u32 %s6590_s13, 4  ;;  %s5079_s18 = int_to_ptr.vmem [resolvable:$true] %s5078_s18 }
 0x542   :  { %5018 = vmatpush1.bf16.msra.mxu0 %v5617_v39  ;;  %4937 = vmatprep.subr.bf16.mxu1 %v5624_v40  ;;  %v5682_v39 = vcombine.high %v3359_v60, %v3363_v1  ;;  %v3366_v40 = vld [vmem:[#allocation14 + $0x6d0] sm:$0xff]  ;;  %s6508_s17 = scalar_lea.vmem %s5079_s18, 128  ;;  %p6513_p1 = scmp.lt.s32.totalorder %s5079_s18, %s5079_s18 }
 0x543   :  { %5019 = vmatprep.subr.bf16.mxu0 %v5626_v8  ;;  %v3370_v8 = vld [vmem:[#allocation14 + $0x6f0] sm:$0xff]  ;;  %p6509_p0 = scmp.ne.s32.totalorder %s5079_s18, %s6508_s17  ;;  %p6514_p2 = scmp.lt.s32.totalorder %s6508_s17, %s6508_s17 }
 0x544   :  { %v5687_v17 = vcombine.low %v3366_v40, %v3370_v8 }
 0x545   :  { %4938 = vmatpush1.bf16.msra.mxu1 %v5623_v19  ;;  %v5688_v19 = vcombine.high %v3366_v40, %v3370_v8  ;;  %p6515_p3 = por %p6514_p2, %p6513_p1 }
 0x546   :  { %5020 = vmatpush1.bf16.msra.mxu0 %v5625_v44  ;;  %4939 = vmatprep.subr.bf16.mxu1 %v5632_v13  ;;  %v5690_v44 = vcombine.high %v3367_v38, %v3371_v41  ;;  %v3374_v13 = vld [vmem:[#allocation14 + $0x710] sm:$0xff] }
 0x547   :  { %5021 = vmatprep.subr.bf16.mxu0 %v5634_v14  ;;  %v3378_v14 = vld [vmem:[#allocation14 + $0x730] sm:$0xff]  ;;  %p6516_p4 = pnand %p6515_p3, %p6509_p0 }
 0x548   :  { %v5695_v24 = vcombine.low %v3374_v13, %v3378_v14 }
 0x549   :  { %4940 = vmatpush1.bf16.msra.mxu1 %v5631_v20  ;;  %v5696_v20 = vcombine.high %v3374_v13, %v3378_v14 }
 0x54a   :  { %5022 = vmatpush1.bf16.msra.mxu0 %v5633_v21  ;;  %4941 = vmatprep.subr.bf16.mxu1 %v5640_v11  ;;  %v5698_v21 = vcombine.high %v3375_v15, %v3379_v16  ;;  %v3382_v11 = vld [vmem:[#allocation14 + $0x750] sm:$0xff] }
 0x54b   :  { %5023 = vmatprep.subr.bf16.mxu0 %v5642_v10  ;;  %v3386_v10 = vld [vmem:[#allocation14 + $0x770] sm:$0xff] }
 0x54c   :  { %v5703_v34 = vcombine.low %v3382_v11, %v3386_v10 }
 0x54d   :  { %4942 = vmatpush1.bf16.msra.mxu1 %v5639_v26  ;;  %v5704_v26 = vcombine.high %v3382_v11, %v3386_v10 }
 0x54e   :  { %5024 = vmatpush1.bf16.msra.mxu0 %v5641_v27  ;;  %4943 = vmatprep.subr.bf16.mxu1 %v5648_v28  ;;  %v5706_v27 = vcombine.high %v3383_v22, %v3387_v23  ;;  %v3390_v28 = vld [vmem:[#allocation14 + $0x790] sm:$0xff] }
 0x54f   :  { %5025 = vmatprep.subr.bf16.mxu0 %v5650_v30  ;;  %v3394_v30 = vld [vmem:[#allocation14 + $0x7b0] sm:$0xff] }
 0x550   :  { %v5711_v47 = vcombine.low %v3390_v28, %v3394_v30 }
 0x551   :  { %4944 = vmatpush1.bf16.msra.mxu1 %v5647_v62  ;;  %v5712_v62 = vcombine.high %v3390_v28, %v3394_v30 }
 0x552   :  { %5026 = vmatpush1.bf16.msra.mxu0 %v5649_v63  ;;  %4945 = vmatprep.subr.bf16.mxu1 %v5656_v43  ;;  %v5714_v63 = vcombine.high %v3391_v31, %v3395_v33  ;;  %v3398_v43 = vld [vmem:[#allocation14 + $0x7d0] sm:$0xff] }
 0x553   :  { %5027 = vmatprep.subr.bf16.mxu0 %v5658_v2  ;;  %v3402_v2 = vld [vmem:[#allocation14 + $0x7f0] sm:$0xff] }
 0x555   :  { %4946 = vmatpush1.bf16.msra.mxu1 %v5655_v3  ;;  %v5720_v3 = vcombine.high %v3398_v43, %v3402_v2 }
 0x556   :  { %5028 = vmatpush1.bf16.msra.mxu0 %v5657_v57  ;;  %4947 = vmatprep.subr.bf16.mxu1 %v5664_v59  ;;  %v5722_v57 = vcombine.high %v3399_v45, %v3403_v46  ;;  %v5719_v59 = vcombine.low %v3398_v43, %v3402_v2 }
 0x557   :  { %5029 = vmatprep.subr.bf16.mxu0 %v5666_v61  ;;  %v5721_v61 = vcombine.low %v3399_v45, %v3403_v46 }
 0x559   :  { %4948 = vmatpush1.bf16.msra.mxu1 %v5663_v32  ;;  %v3421_v32 = vrot.slane %v3404_v56, %v6808_v55 }
 0x55a   :  { %5030 = vmatpush1.bf16.msra.mxu0 %v5665_v5  ;;  %4949 = vmatprep.subr.bf16.mxu1 %v5672_v53 }
 0x55b   :  { %5031 = vmatprep.subr.bf16.mxu0 %v5674_v48 }
 0x55d   :  { %4950 = vmatpush1.bf16.msra.mxu1 %v5671_v36 }
 0x55e   :  { %5032 = vmatpush1.bf16.msra.mxu0 %v5673_v37  ;;  %4951 = vmatprep.subr.bf16.mxu1 %v5680_v42 }
 0x55f   :  { %5033 = vmatprep.subr.bf16.mxu0 %v5682_v39 }
 0x561   :  { %4952 = vmatpush1.bf16.msra.mxu1 %v5679_v9 }
 0x562   :  { %5034 = vmatpush1.bf16.msra.mxu0 %v5681_v12  ;;  %4953 = vmatprep.subr.bf16.mxu1 %v5688_v19 }
 0x563   :  { %5035 = vmatprep.subr.bf16.mxu0 %v5690_v44 }
 0x565   :  { %4954 = vmatpush1.bf16.msra.mxu1 %v5687_v17 }
 0x566   :  { %5036 = vmatpush1.bf16.msra.mxu0 %v5689_v18  ;;  %4955 = vmatprep.subr.bf16.mxu1 %v5696_v20 }
 0x567   :  { %5037 = vmatprep.subr.bf16.mxu0 %v5698_v21 }
 0x569   :  { %4956 = vmatpush1.bf16.msra.mxu1 %v5695_v24 }
 0x56a   :  { %5038 = vmatpush1.bf16.msra.mxu0 %v5697_v25  ;;  %4957 = vmatprep.subr.bf16.mxu1 %v5704_v26 }
 0x56b   :  { %5039 = vmatprep.subr.bf16.mxu0 %v5706_v27 }
 0x56d   :  { %4958 = vmatpush1.bf16.msra.mxu1 %v5703_v34 }
 0x56e   :  { %5040 = vmatpush1.bf16.msra.mxu0 %v5705_v35  ;;  %4959 = vmatprep.subr.bf16.mxu1 %v5712_v62 }
 0x56f   :  { %5041 = vmatprep.subr.bf16.mxu0 %v5714_v63 }
 0x571   :  { %4960 = vmatpush1.bf16.msra.mxu1 %v5711_v47 }
 0x572   :  { %5042 = vmatpush1.bf16.msra.mxu0 %v5713_v49  ;;  %4961 = vmatprep.subr.bf16.mxu1 %v5720_v3 }
 0x573   :  { %5043 = vmatprep.subr.bf16.mxu0 %v5722_v57 }
 0x575   :  { %4962 = vmatpush1.bf16.msra.mxu1 %v5719_v59 }
 0x576   :  { %5044 = vmatpush1.bf16.msra.mxu0 %v5721_v61 }
 0x578   :  { %4964 = vmatmul.mubr.bf16.vlgmr.msra.gmra.mrb[16].mxu1 %v6955_v29 }
 0x579   :  { %5046 = vmatmul.mubr.bf16.vlgmr.msra.gmra.mrb[12].mxu0 %v6955_v29 }
 0x5cb   :  { %v4801_v5 = vpop.f32.mrb[12].mxu1  ;;  %v4883_v53 = vpop.f32.mrb[8].mxu0 }
 0x5cc   :  { %v5729_v48 = vadd.f32 %v4801_v5, %v3409_v0  ;;  %v5731_v6 = vadd.f32 %v4883_v53, %v3417_v58  ;;  %v4803_v7 = vpop.f32.mrb[13].mxu1  ;;  %v4885_v60 = vpop.f32.mrb[9].mxu0 }
 0x5cd   :  { %v5730_v1 = vadd.f32 %v4803_v7, %v3413_v4  ;;  %v5732_v29 = vadd.f32 %v4885_v60, %v3421_v32  ;;  %v4805_v36 = vpop.f32.mrb[14].mxu1  ;;  %v4887_v37 = vpop.f32.mrb[10].mxu0 }
 0x5ce   :  { %5054 = vst [vmem:[#allocation15] sm:$0xff] %v5729_v48  ;;  %5056 = vst [vmem:[#allocation15 + $0x10] sm:$0xff] %v5731_v6  ;;  %v4806_v42 = vpop.f32.mrb[15].mxu1  ;;  %v4888_v51 = vpop.f32.mrb[11].mxu0 }
 0x5cf   :  { %5055 = vst [vmem:[#allocation15 + $0x8] sm:$0xff] %v5730_v1  ;;  %5057 = vst [vmem:[#allocation15 + $0x18] sm:$0xff] %v5732_v29 }
 0x5d0   :  { %6519 = shalt.err (!%p6516_p4)
}
 0x5d1   :  { %s6520_s0 = scalar_lea.hbm %s7029_s15, 128 }
 0x5d2   :  { %p6521_p5 = scmp.ne.s32.totalorder %s7029_s15, %s6520_s0  ;;  %p6524_p6 = scmp.lt.u32.totalorder %s6520_s0, %s7029_s15 }
 0x5d4   :  { %p6526_p7 = pnand %p6524_p6, %p6521_p5 }
 0x5d6   :  { %6529 = shalt.err (!%p6526_p7)
}
 0x5d7   :  { %5081 = dma.vmem_to_hbm [thread:$0]  %s5079_s18, 128, %s7029_s15, [#allocation17]  }
 0x5d8   :  { %s6530_s3 = scalar_lea.hbm %s7030_s16, 16 }
 0x5d9   :  { %p6531_p8 = scmp.ne.s32.totalorder %s7030_s16, %s6530_s3  ;;  %p6534_p9 = scmp.lt.u32.totalorder %s6530_s3, %s7030_s16 }
 0x5db   :  { %p6536_p10 = pnand %p6534_p9, %p6531_p8 }
 0x5dd   :  { %6539 = shalt.err (!%p6536_p10)
}
 0x5de   :  { %s6591_s24 = smov [#allocation18]   ;;  %v3424_v52 = vsub.s32 4, %v6793_v50  ;;  %v3432_v54 = vsub.s32 6, %v6793_v50  ;;  %v3428_v55 = vsub.s32 5, %v6793_v50  ;;  %v3436_v39 = vsub.s32 7, %v6793_v50  ;;  %s6592_s15 = smov [#allocation15]  }
 0x5df   :  { %5089 = dma.smem_to_hbm %s6591_s24, 16, %s7030_s16, [#allocation5]  }
 0x5e0   :  { %v3425_v40 = vrot.slane %v3404_v56, %v3424_v52  ;;  %v3433_v8 = vrot.slane %v3404_v56, %v3432_v54  ;;  %v3429_v38 = vrot.slane %v3404_v56, %v3428_v55  ;;  %v3437_v41 = vrot.slane %v3404_v56, %v3436_v39  ;;  %s5068_s9 = sshll.u32 %s6592_s15, 4  ;;  %s5069_s9 = int_to_ptr.vmem [resolvable:$true] %s5068_s9 }
 0x5e1   :  { %s6540_s16 = scalar_lea.vmem %s5069_s9, 1024  ;;  %p6545_p12 = scmp.lt.s32.totalorder %s5069_s9, %s5069_s9 }
 0x5e2   :  { %p6541_p11 = scmp.ne.s32.totalorder %s5069_s9, %s6540_s16  ;;  %p6546_p13 = scmp.lt.s32.totalorder %s6540_s16, %s6540_s16 }
 0x5e4   :  { %p6547_p0 = por %p6546_p13, %p6545_p12 }
 0x5e6   :  { %p6548_p1 = pnand %p6547_p0, %p6541_p11 }
 0x64b   :  { %v4965_v9 = vpop.f32.mrb[16].mxu1 }
 0x64c   :  { %v5733_v12 = vadd.f32 %v4965_v9, %v3425_v40  ;;  %v5047_v19 = vpop.f32.mrb[12].mxu0  ;;  %v4967_v44 = vpop.f32.mrb[17].mxu1 }
 0x64d   :  { %v5735_v13 = vadd.f32 %v5047_v19, %v3433_v8  ;;  %v5734_v14 = vadd.f32 %v4967_v44, %v3429_v38  ;;  %v5049_v15 = vpop.f32.mrb[13].mxu0  ;;  %v4969_v16 = vpop.f32.mrb[18].mxu1 }
 0x64e   :  { %5058 = vst [vmem:[#allocation15 + $0x20] sm:$0xff] %v5733_v12  ;;  %v5736_v17 = vadd.f32 %v5049_v15, %v3437_v41  ;;  %v5051_v18 = vpop.f32.mrb[14].mxu0  ;;  %v4970_v20 = vpop.f32.mrb[19].mxu1 }
 0x64f   :  { %5060 = vst [vmem:[#allocation15 + $0x30] sm:$0xff] %v5735_v13  ;;  %5059 = vst [vmem:[#allocation15 + $0x28] sm:$0xff] %v5734_v14  ;;  %v5052_v50 = vpop.f32.mrb[15].mxu0 }
 0x650   :  { %5061 = vst [vmem:[#allocation15 + $0x38] sm:$0xff] %v5736_v17 }
 0x651   :  { %6551 = shalt.err (!%p6548_p1)
}
 0x652   :  { %s6552_s25 = scalar_lea.hbm %s7028_s14, 1024 }
 0x653   :  { %p6553_p2 = scmp.ne.s32.totalorder %s7028_s14, %s6552_s25  ;;  %p6556_p3 = scmp.lt.u32.totalorder %s6552_s25, %s7028_s14 }
 0x655   :  { %p6558_p4 = pnand %p6556_p3, %p6553_p2 }
 0x657   :  { %6561 = shalt.err (!%p6558_p4)
}
 0x658   :  { %5071 = dma.vmem_to_hbm [thread:$0]  %s5069_s9, 1024, %s7028_s14, [#allocation4]  }
 0x659   :  { %6570 = dma.done.wait [#allocation4], 1024  }
 0x65a   :  { %6571 = vsyncadd [#allocation4], 4294966272 }
 0x65b   :  { %6572 = dma.done.wait [#allocation17], 128  }
 0x65c   :  { %6573 = vsyncadd [#allocation17], 4294967168 }
 0x65d   :  { %6574 = dma.done.wait [#allocation5], 16  }
 0x65e   :  { %6575 = vsyncadd [#allocation5], 4294967280 }
 0x65f   :  { %5099 = sfence }
 0x660   :  { %5100 = vsyncpa [#allocation3], 1 }
 0x661   :  { %5101 = vsyncpa [#allocation7], 1 }
 0x662   :  { %5102 = vsyncpa [#allocation10], 1 }
 0x663   :  { %5103 = vsyncpa [#allocation13], 1 }
 0x664   :  { %5104 = vsyncpa [#allocation4], 1 }
 0x665   :  { %5105 = vsyncpa [#allocation17], 1 }
 0x666   :  { %5106 = vsyncpa [#allocation5], 1 }

</bundles_post_ra>
